<compile_context>
chip_gen: v6e
topology: v6e:2x2x1
jax: 0.10.0
libtpu: 0.0.40
codegen_flags: <defaults>
</compile_context>

<pallas_src>
import functools

import jax
import jax.numpy as jnp
from jax.experimental import pallas as pl
from jax.experimental.pallas import tpu as pltpu


# ----------------------------------------------------------------------------
# Fused kernel: DMA embedding gather -> LSTM recurrence -> pooling -> fc -> softmax
# ----------------------------------------------------------------------------
def _fused_kernel(idx_ref,                       # SMEM (S*B,) i32 (scalar prefetch)
                  emb_hbm,                       # HBM  (VOCAB, E) f32 (pl.ANY)
                  wih_ref, whh_ref, b_ref,       # VMEM (E,4H), (H,4H), (1,4H)
                  wfc_ref, bfc_ref,              # VMEM (3H,O), (1,O)
                  out_ref,                       # VMEM (S, O)
                  x_scr, sem,                    # VMEM (S*B, E), DMA sems (S*B,)
                  *, seq_len, batch, hidden_dim):
    S, B, H = seq_len, batch, hidden_dim
    SB = S * B

    # --- Embedding gather: DMA only the S*B needed rows out of HBM. ---------
    # (No bounds check on HBM DMA: indices are clamped in the wrapper.)
    copies = []
    for r in range(SB):
        cp = pltpu.make_async_copy(
            emb_hbm.at[pl.ds(idx_ref[r], 1), :],   # (1, E) row at dynamic offset
            x_scr.at[pl.ds(r, 1), :],
            sem.at[r])
        cp.start()
        copies.append(cp)
    for cp in copies:
        cp.wait()

    x_flat = x_scr[...]                                           # (S*B, E)

    # --- Input projection hoisted out of the recurrence (one batched matmul).
    xp = jnp.dot(x_flat, wih_ref[...],
                 preferred_element_type=jnp.float32) + b_ref[...]  # (S*B, 4H)

    whh = whh_ref[...]                                            # (H, 4H) hoisted
    h = jnp.zeros((B, H), jnp.float32)
    c = jnp.zeros((B, H), jnp.float32)

    avg_rows, max_rows, last_rows = [], [], []

    # Static unroll over time (S small & fixed); only h @ W_hh^T stays on the
    # serial critical path.  Gate order (i, f, g, o) matches PyTorch nn.LSTM.
    for t in range(S):
        gates = xp[t * B:(t + 1) * B, :] + jnp.dot(
            h, whh, preferred_element_type=jnp.float32)           # (B, 4H)
        sig = jax.nn.sigmoid(gates)                               # full-width EUP
        th = jnp.tanh(gates)                                      # full-width EUP
        i = sig[:, 0:H]
        f = sig[:, H:2 * H]
        g = th[:, 2 * H:3 * H]
        o = sig[:, 3 * H:4 * H]
        c = f * c + i * g
        h = o * jnp.tanh(c)

        # torch.mean(lstm_out, 1) / torch.max(lstm_out, 1).values reduce over
        # the batch axis; lstm_out[:, -1] is the last batch element.  Keep the
        # per-step (1, H) rows in vregs — no masked scratch stores.
        avg_rows.append(jnp.mean(h, axis=0, keepdims=True))
        max_rows.append(jnp.max(h, axis=0, keepdims=True))
        last_rows.append(h[B - 1:B, :])

    conc = jnp.concatenate(
        [jnp.concatenate(avg_rows, axis=0),
         jnp.concatenate(max_rows, axis=0),
         jnp.concatenate(last_rows, axis=0)], axis=1)             # (S, 3H)

    # --- Head: fc + softmax(dim=1).  Dropout is identity in eval mode. ------
    # TODO(synk): nn.Dropout(p) training-mode random masking is not implemented.
    z = jnp.dot(conc, wfc_ref[...],
                preferred_element_type=jnp.float32) + bfc_ref[...]  # (S, O)
    z = z - jnp.max(z, axis=1, keepdims=True)                     # stable softmax
    e = jnp.exp(z)
    # Exact divide kept so rows sum to 1 within 1e-5 (approx reciprocal would not).
    out_ref[...] = e / jnp.sum(e, axis=1, keepdims=True)


def model_forward(indices, params):
    """indices: (S, B) int32; returns (S, output_dim) f32 softmax."""
    S, B = indices.shape
    emb = jnp.asarray(params["emb_table"], jnp.float32)           # (VOCAB, E)
    vocab, E = emb.shape
    w_ih = jnp.asarray(params["w_ih"], jnp.float32)               # (4H, E)
    w_hh = jnp.asarray(params["w_hh"], jnp.float32)               # (4H, H)
    H4 = w_ih.shape[0]
    H = H4 // 4
    w_fc = jnp.asarray(params["w_fc"], jnp.float32)               # (O, 3H)
    O = w_fc.shape[0]

    # Row-major (t, b) flat index order; clamp so the HBM row-gather never reads OOB.
    idx = jnp.clip(indices.reshape(S * B).astype(jnp.int32), 0, vocab - 1)

    wih_t = w_ih.T                                                # (E, 4H)
    whh_t = w_hh.T                                                # (H, 4H)
    b2 = (params["b_ih"] + params["b_hh"]).astype(jnp.float32).reshape(1, H4)
    wfc_t = w_fc.T                                                # (3H, O)
    bfc2 = jnp.asarray(params["b_fc"], jnp.float32).reshape(1, O)

    kernel = functools.partial(_fused_kernel, seq_len=S, batch=B, hidden_dim=H)
    return pl.pallas_call(
        kernel,
        out_shape=jax.ShapeDtypeStruct((S, O), jnp.float32),
        grid_spec=pltpu.PrefetchScalarGridSpec(
            num_scalar_prefetch=1,                                # indices -> SMEM
            grid=(1,),
            in_specs=[
                pl.BlockSpec(memory_space=pl.ANY),                # emb table stays in HBM
                pl.BlockSpec((E, H4), lambda i, idx: (0, 0)),     # W_ih^T
                pl.BlockSpec((H, H4), lambda i, idx: (0, 0)),     # W_hh^T
                pl.BlockSpec((1, H4), lambda i, idx: (0, 0)),     # b_ih + b_hh
                pl.BlockSpec((3 * H, O), lambda i, idx: (0, 0)),  # W_fc^T
                pl.BlockSpec((1, O), lambda i, idx: (0, 0)),      # b_fc
            ],
            out_specs=pl.BlockSpec((S, O), lambda i, idx: (0, 0)),
            scratch_shapes=[
                pltpu.VMEM((S * B, E), jnp.float32),              # gathered embeddings
                pltpu.SemaphoreType.DMA((S * B,)),                # one sem per row DMA
            ],
        ),
        compiler_params=pltpu.CompilerParams(
            dimension_semantics=("arbitrary",),
            vmem_limit_bytes=64 * 1024 * 1024),
    )(idx, emb, wih_t, whh_t, b2, wfc_t, bfc2)


model_forward_jit = jax.jit(model_forward)


# ----------------------------------------------------------------------------
# Pure-JAX reference of the PyTorch forward for verification.
# ----------------------------------------------------------------------------
def reference_forward(indices, params):
    x = params["emb_table"][indices]                              # (S, B, E)
    S, B, E = x.shape
    w_ih, w_hh = params["w_ih"], params["w_hh"]
    b = params["b_ih"] + params["b_hh"]
    H = w_hh.shape[1]

    def step(carry, xt):
        h, c = carry
        gates = xt @ w_ih.T + h @ w_hh.T + b
        i = jax.nn.sigmoid(gates[:, 0:H])
        f = jax.nn.sigmoid(gates[:, H:2 * H])
        g = jnp.tanh(gates[:, 2 * H:3 * H])
        o = jax.nn.sigmoid(gates[:, 3 * H:4 * H])
        c = f * c + i * g
        h = o * jnp.tanh(c)
        return (h, c), h

    init = (jnp.zeros((B, H), jnp.float32), jnp.zeros((B, H), jnp.float32))
    _, ys = jax.lax.scan(step, init, x)                           # (S, B, H)

    avg = jnp.mean(ys, axis=1)
    mx = jnp.max(ys, axis=1)
    last = ys[:, -1]
    conc = jnp.concatenate([avg, mx, last], axis=1)               # (S, 3H)
    z = conc @ params["w_fc"].T + params["b_fc"]
    return jax.nn.softmax(z, axis=1)


if __name__ == "__main__":
    # Small deterministic config.
    VOCAB, E, H, O = 50, 16, 32, 4      # vocab, embedding_dim, hidden_dim, output_dim
    S, B = 8, 4                          # seq (LSTM time axis), LSTM batch axis

    key = jax.random.PRNGKey(0)
    k_emb, k_wih, k_whh, k_bih, k_bhh, k_wfc, k_bfc, k_idx = jax.random.split(key, 8)

    params = {
        "emb_table": 0.1 * jax.random.normal(k_emb, (VOCAB, E), jnp.float32),
        "w_ih": 0.1 * jax.random.normal(k_wih, (4 * H, E), jnp.float32),
        "w_hh": 0.1 * jax.random.normal(k_whh, (4 * H, H), jnp.float32),
        "b_ih": 0.1 * jax.random.normal(k_bih, (4 * H,), jnp.float32),
        "b_hh": 0.1 * jax.random.normal(k_bhh, (4 * H,), jnp.float32),
        "w_fc": 0.1 * jax.random.normal(k_wfc, (O, 3 * H), jnp.float32),
        "b_fc": 0.1 * jax.random.normal(k_bfc, (O,), jnp.float32),
    }
    indices = jax.random.randint(k_idx, (S, B), 0, VOCAB)

    out = jax.block_until_ready(model_forward_jit(indices, params))
    ref = jax.block_until_ready(reference_forward(indices, params))

    assert out.shape == (S, O), out.shape
    assert jnp.allclose(out, ref, rtol=1e-5, atol=1e-5), (
        f"mismatch: max abs err {jnp.max(jnp.abs(out - ref))}")
    assert jnp.allclose(jnp.sum(out, axis=1), 1.0, atol=1e-5)

    print("KERNEL_OK")
</pallas_src>

<mosaic_0001>
module attributes {stable_mosaic.version = 11 : i64} {
  func.func @_fused_kernel(%arg0: i32, %arg1: memref<32xi32, #tpu.memory_space<smem>>, %arg2: memref<50x16xf32, #tpu.memory_space<any>>, %arg3: memref<16x128xf32, #tpu.memory_space<vmem>>, %arg4: memref<32x128xf32, #tpu.memory_space<vmem>>, %arg5: memref<1x128xf32, #tpu.memory_space<vmem>>, %arg6: memref<96x4xf32, #tpu.memory_space<vmem>>, %arg7: memref<1x4xf32, #tpu.memory_space<vmem>>, %arg8: memref<8x4xf32, #tpu.memory_space<vmem>>, %arg9: memref<32x16xf32, #tpu.memory_space<vmem>>, %arg10: memref<32x!tpu.dma_semaphore, #tpu.memory_space<semaphore_mem>>) attributes {dimension_semantics = [#tpu.dimension_semantics<arbitrary>], iteration_bounds = array<i64: 1>, scalar_prefetch = 1 : i64, scratch_operands = 2 : i64, tpu.core_type = #tpu.core_type<tc>, window_params = [{}, {pipeline_mode = #tpu.pipeline_mode<synchronous>, transform_indices = @transform_1, window_bounds = array<i64: 16, 128>}, {pipeline_mode = #tpu.pipeline_mode<synchronous>, transform_indices = @transform_2, window_bounds = array<i64: 32, 128>}, {pipeline_mode = #tpu.pipeline_mode<synchronous>, transform_indices = @transform_3, window_bounds = array<i64: 1, 128>}, {pipeline_mode = #tpu.pipeline_mode<synchronous>, transform_indices = @transform_4, window_bounds = array<i64: 96, 4>}, {pipeline_mode = #tpu.pipeline_mode<synchronous>, transform_indices = @transform_5, window_bounds = array<i64: 1, 4>}, {pipeline_mode = #tpu.pipeline_mode<synchronous>, transform_indices = @transform_6, window_bounds = array<i64: 8, 4>}]} {
    %c0 = arith.constant 0 : index
    %0 = memref.load %arg1[%c0] : memref<32xi32, #tpu.memory_space<smem>>
    %c0_i32 = arith.constant 0 : i32
    %c0_i32_0 = arith.constant 0 : i32
    %1 = tpu.memref_slice %arg2[%0, %c0_i32_0] : memref<50x16xf32, #tpu.memory_space<any>> -> memref<1x16xf32, #tpu.memory_space<any>>
    %c0_i32_1 = arith.constant 0 : i32
    %c0_i32_2 = arith.constant 0 : i32
    %2 = tpu.memref_slice %arg9[%c0_i32_1, %c0_i32_2] : memref<32x16xf32, #tpu.memory_space<vmem>> -> memref<1x16xf32, #tpu.memory_space<vmem>>
    %3 = tpu.memref_slice %arg10[%c0_i32] : memref<32x!tpu.dma_semaphore, #tpu.memory_space<semaphore_mem>> -> memref<1x!tpu.dma_semaphore, #tpu.memory_space<semaphore_mem>>
    %4 = tpu.memref_squeeze %3 : memref<1x!tpu.dma_semaphore, #tpu.memory_space<semaphore_mem>> -> memref<!tpu.dma_semaphore, #tpu.memory_space<semaphore_mem>>
    tpu.enqueue_dma source(%1 : memref<1x16xf32, #tpu.memory_space<any>>) target(%2 : memref<1x16xf32, #tpu.memory_space<vmem>>) target_semaphore(%4 : memref<!tpu.dma_semaphore, #tpu.memory_space<semaphore_mem>>)
    %c1 = arith.constant 1 : index
    %5 = memref.load %arg1[%c1] : memref<32xi32, #tpu.memory_space<smem>>
    %c1_i32 = arith.constant 1 : i32
    %c0_i32_3 = arith.constant 0 : i32
    %6 = tpu.memref_slice %arg2[%5, %c0_i32_3] : memref<50x16xf32, #tpu.memory_space<any>> -> memref<1x16xf32, #tpu.memory_space<any>>
    %c1_i32_4 = arith.constant 1 : i32
    %c0_i32_5 = arith.constant 0 : i32
    %7 = tpu.memref_slice %arg9[%c1_i32_4, %c0_i32_5] : memref<32x16xf32, #tpu.memory_space<vmem>> -> memref<1x16xf32, #tpu.memory_space<vmem>>
    %8 = tpu.memref_slice %arg10[%c1_i32] : memref<32x!tpu.dma_semaphore, #tpu.memory_space<semaphore_mem>> -> memref<1x!tpu.dma_semaphore, #tpu.memory_space<semaphore_mem>>
    %9 = tpu.memref_squeeze %8 : memref<1x!tpu.dma_semaphore, #tpu.memory_space<semaphore_mem>> -> memref<!tpu.dma_semaphore, #tpu.memory_space<semaphore_mem>>
    tpu.enqueue_dma source(%6 : memref<1x16xf32, #tpu.memory_space<any>>) target(%7 : memref<1x16xf32, #tpu.memory_space<vmem>>) target_semaphore(%9 : memref<!tpu.dma_semaphore, #tpu.memory_space<semaphore_mem>>)
    %c2 = arith.constant 2 : index
    %10 = memref.load %arg1[%c2] : memref<32xi32, #tpu.memory_space<smem>>
    %c2_i32 = arith.constant 2 : i32
    %c0_i32_6 = arith.constant 0 : i32
    %11 = tpu.memref_slice %arg2[%10, %c0_i32_6] : memref<50x16xf32, #tpu.memory_space<any>> -> memref<1x16xf32, #tpu.memory_space<any>>
    %c2_i32_7 = arith.constant 2 : i32
    %c0_i32_8 = arith.constant 0 : i32
    %12 = tpu.memref_slice %arg9[%c2_i32_7, %c0_i32_8] : memref<32x16xf32, #tpu.memory_space<vmem>> -> memref<1x16xf32, #tpu.memory_space<vmem>>
    %13 = tpu.memref_slice %arg10[%c2_i32] : memref<32x!tpu.dma_semaphore, #tpu.memory_space<semaphore_mem>> -> memref<1x!tpu.dma_semaphore, #tpu.memory_space<semaphore_mem>>
    %14 = tpu.memref_squeeze %13 : memref<1x!tpu.dma_semaphore, #tpu.memory_space<semaphore_mem>> -> memref<!tpu.dma_semaphore, #tpu.memory_space<semaphore_mem>>
    tpu.enqueue_dma source(%11 : memref<1x16xf32, #tpu.memory_space<any>>) target(%12 : memref<1x16xf32, #tpu.memory_space<vmem>>) target_semaphore(%14 : memref<!tpu.dma_semaphore, #tpu.memory_space<semaphore_mem>>)
    %c3 = arith.constant 3 : index
    %15 = memref.load %arg1[%c3] : memref<32xi32, #tpu.memory_space<smem>>
    %c3_i32 = arith.constant 3 : i32
    %c0_i32_9 = arith.constant 0 : i32
    %16 = tpu.memref_slice %arg2[%15, %c0_i32_9] : memref<50x16xf32, #tpu.memory_space<any>> -> memref<1x16xf32, #tpu.memory_space<any>>
    %c3_i32_10 = arith.constant 3 : i32
    %c0_i32_11 = arith.constant 0 : i32
    %17 = tpu.memref_slice %arg9[%c3_i32_10, %c0_i32_11] : memref<32x16xf32, #tpu.memory_space<vmem>> -> memref<1x16xf32, #tpu.memory_space<vmem>>
    %18 = tpu.memref_slice %arg10[%c3_i32] : memref<32x!tpu.dma_semaphore, #tpu.memory_space<semaphore_mem>> -> memref<1x!tpu.dma_semaphore, #tpu.memory_space<semaphore_mem>>
    %19 = tpu.memref_squeeze %18 : memref<1x!tpu.dma_semaphore, #tpu.memory_space<semaphore_mem>> -> memref<!tpu.dma_semaphore, #tpu.memory_space<semaphore_mem>>
    tpu.enqueue_dma source(%16 : memref<1x16xf32, #tpu.memory_space<any>>) target(%17 : memref<1x16xf32, #tpu.memory_space<vmem>>) target_semaphore(%19 : memref<!tpu.dma_semaphore, #tpu.memory_space<semaphore_mem>>)
    %c4 = arith.constant 4 : index
    %20 = memref.load %arg1[%c4] : memref<32xi32, #tpu.memory_space<smem>>
    %c4_i32 = arith.constant 4 : i32
    %c0_i32_12 = arith.constant 0 : i32
    %21 = tpu.memref_slice %arg2[%20, %c0_i32_12] : memref<50x16xf32, #tpu.memory_space<any>> -> memref<1x16xf32, #tpu.memory_space<any>>
    %c4_i32_13 = arith.constant 4 : i32
    %c0_i32_14 = arith.constant 0 : i32
    %22 = tpu.memref_slice %arg9[%c4_i32_13, %c0_i32_14] : memref<32x16xf32, #tpu.memory_space<vmem>> -> memref<1x16xf32, #tpu.memory_space<vmem>>
    %23 = tpu.memref_slice %arg10[%c4_i32] : memref<32x!tpu.dma_semaphore, #tpu.memory_space<semaphore_mem>> -> memref<1x!tpu.dma_semaphore, #tpu.memory_space<semaphore_mem>>
    %24 = tpu.memref_squeeze %23 : memref<1x!tpu.dma_semaphore, #tpu.memory_space<semaphore_mem>> -> memref<!tpu.dma_semaphore, #tpu.memory_space<semaphore_mem>>
    tpu.enqueue_dma source(%21 : memref<1x16xf32, #tpu.memory_space<any>>) target(%22 : memref<1x16xf32, #tpu.memory_space<vmem>>) target_semaphore(%24 : memref<!tpu.dma_semaphore, #tpu.memory_space<semaphore_mem>>)
    %c5 = arith.constant 5 : index
    %25 = memref.load %arg1[%c5] : memref<32xi32, #tpu.memory_space<smem>>
    %c5_i32 = arith.constant 5 : i32
    %c0_i32_15 = arith.constant 0 : i32
    %26 = tpu.memref_slice %arg2[%25, %c0_i32_15] : memref<50x16xf32, #tpu.memory_space<any>> -> memref<1x16xf32, #tpu.memory_space<any>>
    %c5_i32_16 = arith.constant 5 : i32
    %c0_i32_17 = arith.constant 0 : i32
    %27 = tpu.memref_slice %arg9[%c5_i32_16, %c0_i32_17] : memref<32x16xf32, #tpu.memory_space<vmem>> -> memref<1x16xf32, #tpu.memory_space<vmem>>
    %28 = tpu.memref_slice %arg10[%c5_i32] : memref<32x!tpu.dma_semaphore, #tpu.memory_space<semaphore_mem>> -> memref<1x!tpu.dma_semaphore, #tpu.memory_space<semaphore_mem>>
    %29 = tpu.memref_squeeze %28 : memref<1x!tpu.dma_semaphore, #tpu.memory_space<semaphore_mem>> -> memref<!tpu.dma_semaphore, #tpu.memory_space<semaphore_mem>>
    tpu.enqueue_dma source(%26 : memref<1x16xf32, #tpu.memory_space<any>>) target(%27 : memref<1x16xf32, #tpu.memory_space<vmem>>) target_semaphore(%29 : memref<!tpu.dma_semaphore, #tpu.memory_space<semaphore_mem>>)
    %c6 = arith.constant 6 : index
    %30 = memref.load %arg1[%c6] : memref<32xi32, #tpu.memory_space<smem>>
    %c6_i32 = arith.constant 6 : i32
    %c0_i32_18 = arith.constant 0 : i32
    %31 = tpu.memref_slice %arg2[%30, %c0_i32_18] : memref<50x16xf32, #tpu.memory_space<any>> -> memref<1x16xf32, #tpu.memory_space<any>>
    %c6_i32_19 = arith.constant 6 : i32
    %c0_i32_20 = arith.constant 0 : i32
    %32 = tpu.memref_slice %arg9[%c6_i32_19, %c0_i32_20] : memref<32x16xf32, #tpu.memory_space<vmem>> -> memref<1x16xf32, #tpu.memory_space<vmem>>
    %33 = tpu.memref_slice %arg10[%c6_i32] : memref<32x!tpu.dma_semaphore, #tpu.memory_space<semaphore_mem>> -> memref<1x!tpu.dma_semaphore, #tpu.memory_space<semaphore_mem>>
    %34 = tpu.memref_squeeze %33 : memref<1x!tpu.dma_semaphore, #tpu.memory_space<semaphore_mem>> -> memref<!tpu.dma_semaphore, #tpu.memory_space<semaphore_mem>>
    tpu.enqueue_dma source(%31 : memref<1x16xf32, #tpu.memory_space<any>>) target(%32 : memref<1x16xf32, #tpu.memory_space<vmem>>) target_semaphore(%34 : memref<!tpu.dma_semaphore, #tpu.memory_space<semaphore_mem>>)
    %c7 = arith.constant 7 : index
    %35 = memref.load %arg1[%c7] : memref<32xi32, #tpu.memory_space<smem>>
    %c7_i32 = arith.constant 7 : i32
    %c0_i32_21 = arith.constant 0 : i32
    %36 = tpu.memref_slice %arg2[%35, %c0_i32_21] : memref<50x16xf32, #tpu.memory_space<any>> -> memref<1x16xf32, #tpu.memory_space<any>>
    %c7_i32_22 = arith.constant 7 : i32
    %c0_i32_23 = arith.constant 0 : i32
    %37 = tpu.memref_slice %arg9[%c7_i32_22, %c0_i32_23] : memref<32x16xf32, #tpu.memory_space<vmem>> -> memref<1x16xf32, #tpu.memory_space<vmem>>
    %38 = tpu.memref_slice %arg10[%c7_i32] : memref<32x!tpu.dma_semaphore, #tpu.memory_space<semaphore_mem>> -> memref<1x!tpu.dma_semaphore, #tpu.memory_space<semaphore_mem>>
    %39 = tpu.memref_squeeze %38 : memref<1x!tpu.dma_semaphore, #tpu.memory_space<semaphore_mem>> -> memref<!tpu.dma_semaphore, #tpu.memory_space<semaphore_mem>>
    tpu.enqueue_dma source(%36 : memref<1x16xf32, #tpu.memory_space<any>>) target(%37 : memref<1x16xf32, #tpu.memory_space<vmem>>) target_semaphore(%39 : memref<!tpu.dma_semaphore, #tpu.memory_space<semaphore_mem>>)
    %c8 = arith.constant 8 : index
    %40 = memref.load %arg1[%c8] : memref<32xi32, #tpu.memory_space<smem>>
    %c8_i32 = arith.constant 8 : i32
    %c0_i32_24 = arith.constant 0 : i32
    %41 = tpu.memref_slice %arg2[%40, %c0_i32_24] : memref<50x16xf32, #tpu.memory_space<any>> -> memref<1x16xf32, #tpu.memory_space<any>>
    %c8_i32_25 = arith.constant 8 : i32
    %c0_i32_26 = arith.constant 0 : i32
    %42 = tpu.memref_slice %arg9[%c8_i32_25, %c0_i32_26] : memref<32x16xf32, #tpu.memory_space<vmem>> -> memref<1x16xf32, #tpu.memory_space<vmem>>
    %43 = tpu.memref_slice %arg10[%c8_i32] : memref<32x!tpu.dma_semaphore, #tpu.memory_space<semaphore_mem>> -> memref<1x!tpu.dma_semaphore, #tpu.memory_space<semaphore_mem>>
    %44 = tpu.memref_squeeze %43 : memref<1x!tpu.dma_semaphore, #tpu.memory_space<semaphore_mem>> -> memref<!tpu.dma_semaphore, #tpu.memory_space<semaphore_mem>>
    tpu.enqueue_dma source(%41 : memref<1x16xf32, #tpu.memory_space<any>>) target(%42 : memref<1x16xf32, #tpu.memory_space<vmem>>) target_semaphore(%44 : memref<!tpu.dma_semaphore, #tpu.memory_space<semaphore_mem>>)
    %c9 = arith.constant 9 : index
    %45 = memref.load %arg1[%c9] : memref<32xi32, #tpu.memory_space<smem>>
    %c9_i32 = arith.constant 9 : i32
    %c0_i32_27 = arith.constant 0 : i32
    %46 = tpu.memref_slice %arg2[%45, %c0_i32_27] : memref<50x16xf32, #tpu.memory_space<any>> -> memref<1x16xf32, #tpu.memory_space<any>>
    %c9_i32_28 = arith.constant 9 : i32
    %c0_i32_29 = arith.constant 0 : i32
    %47 = tpu.memref_slice %arg9[%c9_i32_28, %c0_i32_29] : memref<32x16xf32, #tpu.memory_space<vmem>> -> memref<1x16xf32, #tpu.memory_space<vmem>>
    %48 = tpu.memref_slice %arg10[%c9_i32] : memref<32x!tpu.dma_semaphore, #tpu.memory_space<semaphore_mem>> -> memref<1x!tpu.dma_semaphore, #tpu.memory_space<semaphore_mem>>
    %49 = tpu.memref_squeeze %48 : memref<1x!tpu.dma_semaphore, #tpu.memory_space<semaphore_mem>> -> memref<!tpu.dma_semaphore, #tpu.memory_space<semaphore_mem>>
    tpu.enqueue_dma source(%46 : memref<1x16xf32, #tpu.memory_space<any>>) target(%47 : memref<1x16xf32, #tpu.memory_space<vmem>>) target_semaphore(%49 : memref<!tpu.dma_semaphore, #tpu.memory_space<semaphore_mem>>)
    %c10 = arith.constant 10 : index
    %50 = memref.load %arg1[%c10] : memref<32xi32, #tpu.memory_space<smem>>
    %c10_i32 = arith.constant 10 : i32
    %c0_i32_30 = arith.constant 0 : i32
    %51 = tpu.memref_slice %arg2[%50, %c0_i32_30] : memref<50x16xf32, #tpu.memory_space<any>> -> memref<1x16xf32, #tpu.memory_space<any>>
    %c10_i32_31 = arith.constant 10 : i32
    %c0_i32_32 = arith.constant 0 : i32
    %52 = tpu.memref_slice %arg9[%c10_i32_31, %c0_i32_32] : memref<32x16xf32, #tpu.memory_space<vmem>> -> memref<1x16xf32, #tpu.memory_space<vmem>>
    %53 = tpu.memref_slice %arg10[%c10_i32] : memref<32x!tpu.dma_semaphore, #tpu.memory_space<semaphore_mem>> -> memref<1x!tpu.dma_semaphore, #tpu.memory_space<semaphore_mem>>
    %54 = tpu.memref_squeeze %53 : memref<1x!tpu.dma_semaphore, #tpu.memory_space<semaphore_mem>> -> memref<!tpu.dma_semaphore, #tpu.memory_space<semaphore_mem>>
    tpu.enqueue_dma source(%51 : memref<1x16xf32, #tpu.memory_space<any>>) target(%52 : memref<1x16xf32, #tpu.memory_space<vmem>>) target_semaphore(%54 : memref<!tpu.dma_semaphore, #tpu.memory_space<semaphore_mem>>)
    %c11 = arith.constant 11 : index
    %55 = memref.load %arg1[%c11] : memref<32xi32, #tpu.memory_space<smem>>
    %c11_i32 = arith.constant 11 : i32
    %c0_i32_33 = arith.constant 0 : i32
    %56 = tpu.memref_slice %arg2[%55, %c0_i32_33] : memref<50x16xf32, #tpu.memory_space<any>> -> memref<1x16xf32, #tpu.memory_space<any>>
    %c11_i32_34 = arith.constant 11 : i32
    %c0_i32_35 = arith.constant 0 : i32
    %57 = tpu.memref_slice %arg9[%c11_i32_34, %c0_i32_35] : memref<32x16xf32, #tpu.memory_space<vmem>> -> memref<1x16xf32, #tpu.memory_space<vmem>>
    %58 = tpu.memref_slice %arg10[%c11_i32] : memref<32x!tpu.dma_semaphore, #tpu.memory_space<semaphore_mem>> -> memref<1x!tpu.dma_semaphore, #tpu.memory_space<semaphore_mem>>
    %59 = tpu.memref_squeeze %58 : memref<1x!tpu.dma_semaphore, #tpu.memory_space<semaphore_mem>> -> memref<!tpu.dma_semaphore, #tpu.memory_space<semaphore_mem>>
    tpu.enqueue_dma source(%56 : memref<1x16xf32, #tpu.memory_space<any>>) target(%57 : memref<1x16xf32, #tpu.memory_space<vmem>>) target_semaphore(%59 : memref<!tpu.dma_semaphore, #tpu.memory_space<semaphore_mem>>)
    %c12 = arith.constant 12 : index
    %60 = memref.load %arg1[%c12] : memref<32xi32, #tpu.memory_space<smem>>
    %c12_i32 = arith.constant 12 : i32
    %c0_i32_36 = arith.constant 0 : i32
    %61 = tpu.memref_slice %arg2[%60, %c0_i32_36] : memref<50x16xf32, #tpu.memory_space<any>> -> memref<1x16xf32, #tpu.memory_space<any>>
    %c12_i32_37 = arith.constant 12 : i32
    %c0_i32_38 = arith.constant 0 : i32
    %62 = tpu.memref_slice %arg9[%c12_i32_37, %c0_i32_38] : memref<32x16xf32, #tpu.memory_space<vmem>> -> memref<1x16xf32, #tpu.memory_space<vmem>>
    %63 = tpu.memref_slice %arg10[%c12_i32] : memref<32x!tpu.dma_semaphore, #tpu.memory_space<semaphore_mem>> -> memref<1x!tpu.dma_semaphore, #tpu.memory_space<semaphore_mem>>
    %64 = tpu.memref_squeeze %63 : memref<1x!tpu.dma_semaphore, #tpu.memory_space<semaphore_mem>> -> memref<!tpu.dma_semaphore, #tpu.memory_space<semaphore_mem>>
    tpu.enqueue_dma source(%61 : memref<1x16xf32, #tpu.memory_space<any>>) target(%62 : memref<1x16xf32, #tpu.memory_space<vmem>>) target_semaphore(%64 : memref<!tpu.dma_semaphore, #tpu.memory_space<semaphore_mem>>)
    %c13 = arith.constant 13 : index
    %65 = memref.load %arg1[%c13] : memref<32xi32, #tpu.memory_space<smem>>
    %c13_i32 = arith.constant 13 : i32
    %c0_i32_39 = arith.constant 0 : i32
    %66 = tpu.memref_slice %arg2[%65, %c0_i32_39] : memref<50x16xf32, #tpu.memory_space<any>> -> memref<1x16xf32, #tpu.memory_space<any>>
    %c13_i32_40 = arith.constant 13 : i32
    %c0_i32_41 = arith.constant 0 : i32
    %67 = tpu.memref_slice %arg9[%c13_i32_40, %c0_i32_41] : memref<32x16xf32, #tpu.memory_space<vmem>> -> memref<1x16xf32, #tpu.memory_space<vmem>>
    %68 = tpu.memref_slice %arg10[%c13_i32] : memref<32x!tpu.dma_semaphore, #tpu.memory_space<semaphore_mem>> -> memref<1x!tpu.dma_semaphore, #tpu.memory_space<semaphore_mem>>
    %69 = tpu.memref_squeeze %68 : memref<1x!tpu.dma_semaphore, #tpu.memory_space<semaphore_mem>> -> memref<!tpu.dma_semaphore, #tpu.memory_space<semaphore_mem>>
    tpu.enqueue_dma source(%66 : memref<1x16xf32, #tpu.memory_space<any>>) target(%67 : memref<1x16xf32, #tpu.memory_space<vmem>>) target_semaphore(%69 : memref<!tpu.dma_semaphore, #tpu.memory_space<semaphore_mem>>)
    %c14 = arith.constant 14 : index
    %70 = memref.load %arg1[%c14] : memref<32xi32, #tpu.memory_space<smem>>
    %c14_i32 = arith.constant 14 : i32
    %c0_i32_42 = arith.constant 0 : i32
    %71 = tpu.memref_slice %arg2[%70, %c0_i32_42] : memref<50x16xf32, #tpu.memory_space<any>> -> memref<1x16xf32, #tpu.memory_space<any>>
    %c14_i32_43 = arith.constant 14 : i32
    %c0_i32_44 = arith.constant 0 : i32
    %72 = tpu.memref_slice %arg9[%c14_i32_43, %c0_i32_44] : memref<32x16xf32, #tpu.memory_space<vmem>> -> memref<1x16xf32, #tpu.memory_space<vmem>>
    %73 = tpu.memref_slice %arg10[%c14_i32] : memref<32x!tpu.dma_semaphore, #tpu.memory_space<semaphore_mem>> -> memref<1x!tpu.dma_semaphore, #tpu.memory_space<semaphore_mem>>
    %74 = tpu.memref_squeeze %73 : memref<1x!tpu.dma_semaphore, #tpu.memory_space<semaphore_mem>> -> memref<!tpu.dma_semaphore, #tpu.memory_space<semaphore_mem>>
    tpu.enqueue_dma source(%71 : memref<1x16xf32, #tpu.memory_space<any>>) target(%72 : memref<1x16xf32, #tpu.memory_space<vmem>>) target_semaphore(%74 : memref<!tpu.dma_semaphore, #tpu.memory_space<semaphore_mem>>)
    %c15 = arith.constant 15 : index
    %75 = memref.load %arg1[%c15] : memref<32xi32, #tpu.memory_space<smem>>
    %c15_i32 = arith.constant 15 : i32
    %c0_i32_45 = arith.constant 0 : i32
    %76 = tpu.memref_slice %arg2[%75, %c0_i32_45] : memref<50x16xf32, #tpu.memory_space<any>> -> memref<1x16xf32, #tpu.memory_space<any>>
    %c15_i32_46 = arith.constant 15 : i32
    %c0_i32_47 = arith.constant 0 : i32
    %77 = tpu.memref_slice %arg9[%c15_i32_46, %c0_i32_47] : memref<32x16xf32, #tpu.memory_space<vmem>> -> memref<1x16xf32, #tpu.memory_space<vmem>>
    %78 = tpu.memref_slice %arg10[%c15_i32] : memref<32x!tpu.dma_semaphore, #tpu.memory_space<semaphore_mem>> -> memref<1x!tpu.dma_semaphore, #tpu.memory_space<semaphore_mem>>
    %79 = tpu.memref_squeeze %78 : memref<1x!tpu.dma_semaphore, #tpu.memory_space<semaphore_mem>> -> memref<!tpu.dma_semaphore, #tpu.memory_space<semaphore_mem>>
    tpu.enqueue_dma source(%76 : memref<1x16xf32, #tpu.memory_space<any>>) target(%77 : memref<1x16xf32, #tpu.memory_space<vmem>>) target_semaphore(%79 : memref<!tpu.dma_semaphore, #tpu.memory_space<semaphore_mem>>)
    %c16 = arith.constant 16 : index
    %80 = memref.load %arg1[%c16] : memref<32xi32, #tpu.memory_space<smem>>
    %c16_i32 = arith.constant 16 : i32
    %c0_i32_48 = arith.constant 0 : i32
    %81 = tpu.memref_slice %arg2[%80, %c0_i32_48] : memref<50x16xf32, #tpu.memory_space<any>> -> memref<1x16xf32, #tpu.memory_space<any>>
    %c16_i32_49 = arith.constant 16 : i32
    %c0_i32_50 = arith.constant 0 : i32
    %82 = tpu.memref_slice %arg9[%c16_i32_49, %c0_i32_50] : memref<32x16xf32, #tpu.memory_space<vmem>> -> memref<1x16xf32, #tpu.memory_space<vmem>>
    %83 = tpu.memref_slice %arg10[%c16_i32] : memref<32x!tpu.dma_semaphore, #tpu.memory_space<semaphore_mem>> -> memref<1x!tpu.dma_semaphore, #tpu.memory_space<semaphore_mem>>
    %84 = tpu.memref_squeeze %83 : memref<1x!tpu.dma_semaphore, #tpu.memory_space<semaphore_mem>> -> memref<!tpu.dma_semaphore, #tpu.memory_space<semaphore_mem>>
    tpu.enqueue_dma source(%81 : memref<1x16xf32, #tpu.memory_space<any>>) target(%82 : memref<1x16xf32, #tpu.memory_space<vmem>>) target_semaphore(%84 : memref<!tpu.dma_semaphore, #tpu.memory_space<semaphore_mem>>)
    %c17 = arith.constant 17 : index
    %85 = memref.load %arg1[%c17] : memref<32xi32, #tpu.memory_space<smem>>
    %c17_i32 = arith.constant 17 : i32
    %c0_i32_51 = arith.constant 0 : i32
    %86 = tpu.memref_slice %arg2[%85, %c0_i32_51] : memref<50x16xf32, #tpu.memory_space<any>> -> memref<1x16xf32, #tpu.memory_space<any>>
    %c17_i32_52 = arith.constant 17 : i32
    %c0_i32_53 = arith.constant 0 : i32
    %87 = tpu.memref_slice %arg9[%c17_i32_52, %c0_i32_53] : memref<32x16xf32, #tpu.memory_space<vmem>> -> memref<1x16xf32, #tpu.memory_space<vmem>>
    %88 = tpu.memref_slice %arg10[%c17_i32] : memref<32x!tpu.dma_semaphore, #tpu.memory_space<semaphore_mem>> -> memref<1x!tpu.dma_semaphore, #tpu.memory_space<semaphore_mem>>
    %89 = tpu.memref_squeeze %88 : memref<1x!tpu.dma_semaphore, #tpu.memory_space<semaphore_mem>> -> memref<!tpu.dma_semaphore, #tpu.memory_space<semaphore_mem>>
    tpu.enqueue_dma source(%86 : memref<1x16xf32, #tpu.memory_space<any>>) target(%87 : memref<1x16xf32, #tpu.memory_space<vmem>>) target_semaphore(%89 : memref<!tpu.dma_semaphore, #tpu.memory_space<semaphore_mem>>)
    %c18 = arith.constant 18 : index
    %90 = memref.load %arg1[%c18] : memref<32xi32, #tpu.memory_space<smem>>
    %c18_i32 = arith.constant 18 : i32
    %c0_i32_54 = arith.constant 0 : i32
    %91 = tpu.memref_slice %arg2[%90, %c0_i32_54] : memref<50x16xf32, #tpu.memory_space<any>> -> memref<1x16xf32, #tpu.memory_space<any>>
    %c18_i32_55 = arith.constant 18 : i32
    %c0_i32_56 = arith.constant 0 : i32
    %92 = tpu.memref_slice %arg9[%c18_i32_55, %c0_i32_56] : memref<32x16xf32, #tpu.memory_space<vmem>> -> memref<1x16xf32, #tpu.memory_space<vmem>>
    %93 = tpu.memref_slice %arg10[%c18_i32] : memref<32x!tpu.dma_semaphore, #tpu.memory_space<semaphore_mem>> -> memref<1x!tpu.dma_semaphore, #tpu.memory_space<semaphore_mem>>
    %94 = tpu.memref_squeeze %93 : memref<1x!tpu.dma_semaphore, #tpu.memory_space<semaphore_mem>> -> memref<!tpu.dma_semaphore, #tpu.memory_space<semaphore_mem>>
    tpu.enqueue_dma source(%91 : memref<1x16xf32, #tpu.memory_space<any>>) target(%92 : memref<1x16xf32, #tpu.memory_space<vmem>>) target_semaphore(%94 : memref<!tpu.dma_semaphore, #tpu.memory_space<semaphore_mem>>)
    %c19 = arith.constant 19 : index
    %95 = memref.load %arg1[%c19] : memref<32xi32, #tpu.memory_space<smem>>
    %c19_i32 = arith.constant 19 : i32
    %c0_i32_57 = arith.constant 0 : i32
    %96 = tpu.memref_slice %arg2[%95, %c0_i32_57] : memref<50x16xf32, #tpu.memory_space<any>> -> memref<1x16xf32, #tpu.memory_space<any>>
    %c19_i32_58 = arith.constant 19 : i32
    %c0_i32_59 = arith.constant 0 : i32
    %97 = tpu.memref_slice %arg9[%c19_i32_58, %c0_i32_59] : memref<32x16xf32, #tpu.memory_space<vmem>> -> memref<1x16xf32, #tpu.memory_space<vmem>>
    %98 = tpu.memref_slice %arg10[%c19_i32] : memref<32x!tpu.dma_semaphore, #tpu.memory_space<semaphore_mem>> -> memref<1x!tpu.dma_semaphore, #tpu.memory_space<semaphore_mem>>
    %99 = tpu.memref_squeeze %98 : memref<1x!tpu.dma_semaphore, #tpu.memory_space<semaphore_mem>> -> memref<!tpu.dma_semaphore, #tpu.memory_space<semaphore_mem>>
    tpu.enqueue_dma source(%96 : memref<1x16xf32, #tpu.memory_space<any>>) target(%97 : memref<1x16xf32, #tpu.memory_space<vmem>>) target_semaphore(%99 : memref<!tpu.dma_semaphore, #tpu.memory_space<semaphore_mem>>)
    %c20 = arith.constant 20 : index
    %100 = memref.load %arg1[%c20] : memref<32xi32, #tpu.memory_space<smem>>
    %c20_i32 = arith.constant 20 : i32
    %c0_i32_60 = arith.constant 0 : i32
    %101 = tpu.memref_slice %arg2[%100, %c0_i32_60] : memref<50x16xf32, #tpu.memory_space<any>> -> memref<1x16xf32, #tpu.memory_space<any>>
    %c20_i32_61 = arith.constant 20 : i32
    %c0_i32_62 = arith.constant 0 : i32
    %102 = tpu.memref_slice %arg9[%c20_i32_61, %c0_i32_62] : memref<32x16xf32, #tpu.memory_space<vmem>> -> memref<1x16xf32, #tpu.memory_space<vmem>>
    %103 = tpu.memref_slice %arg10[%c20_i32] : memref<32x!tpu.dma_semaphore, #tpu.memory_space<semaphore_mem>> -> memref<1x!tpu.dma_semaphore, #tpu.memory_space<semaphore_mem>>
    %104 = tpu.memref_squeeze %103 : memref<1x!tpu.dma_semaphore, #tpu.memory_space<semaphore_mem>> -> memref<!tpu.dma_semaphore, #tpu.memory_space<semaphore_mem>>
    tpu.enqueue_dma source(%101 : memref<1x16xf32, #tpu.memory_space<any>>) target(%102 : memref<1x16xf32, #tpu.memory_space<vmem>>) target_semaphore(%104 : memref<!tpu.dma_semaphore, #tpu.memory_space<semaphore_mem>>)
    %c21 = arith.constant 21 : index
    %105 = memref.load %arg1[%c21] : memref<32xi32, #tpu.memory_space<smem>>
    %c21_i32 = arith.constant 21 : i32
    %c0_i32_63 = arith.constant 0 : i32
    %106 = tpu.memref_slice %arg2[%105, %c0_i32_63] : memref<50x16xf32, #tpu.memory_space<any>> -> memref<1x16xf32, #tpu.memory_space<any>>
    %c21_i32_64 = arith.constant 21 : i32
    %c0_i32_65 = arith.constant 0 : i32
    %107 = tpu.memref_slice %arg9[%c21_i32_64, %c0_i32_65] : memref<32x16xf32, #tpu.memory_space<vmem>> -> memref<1x16xf32, #tpu.memory_space<vmem>>
    %108 = tpu.memref_slice %arg10[%c21_i32] : memref<32x!tpu.dma_semaphore, #tpu.memory_space<semaphore_mem>> -> memref<1x!tpu.dma_semaphore, #tpu.memory_space<semaphore_mem>>
    %109 = tpu.memref_squeeze %108 : memref<1x!tpu.dma_semaphore, #tpu.memory_space<semaphore_mem>> -> memref<!tpu.dma_semaphore, #tpu.memory_space<semaphore_mem>>
    tpu.enqueue_dma source(%106 : memref<1x16xf32, #tpu.memory_space<any>>) target(%107 : memref<1x16xf32, #tpu.memory_space<vmem>>) target_semaphore(%109 : memref<!tpu.dma_semaphore, #tpu.memory_space<semaphore_mem>>)
    %c22 = arith.constant 22 : index
    %110 = memref.load %arg1[%c22] : memref<32xi32, #tpu.memory_space<smem>>
    %c22_i32 = arith.constant 22 : i32
    %c0_i32_66 = arith.constant 0 : i32
    %111 = tpu.memref_slice %arg2[%110, %c0_i32_66] : memref<50x16xf32, #tpu.memory_space<any>> -> memref<1x16xf32, #tpu.memory_space<any>>
    %c22_i32_67 = arith.constant 22 : i32
    %c0_i32_68 = arith.constant 0 : i32
    %112 = tpu.memref_slice %arg9[%c22_i32_67, %c0_i32_68] : memref<32x16xf32, #tpu.memory_space<vmem>> -> memref<1x16xf32, #tpu.memory_space<vmem>>
    %113 = tpu.memref_slice %arg10[%c22_i32] : memref<32x!tpu.dma_semaphore, #tpu.memory_space<semaphore_mem>> -> memref<1x!tpu.dma_semaphore, #tpu.memory_space<semaphore_mem>>
    %114 = tpu.memref_squeeze %113 : memref<1x!tpu.dma_semaphore, #tpu.memory_space<semaphore_mem>> -> memref<!tpu.dma_semaphore, #tpu.memory_space<semaphore_mem>>
    tpu.enqueue_dma source(%111 : memref<1x16xf32, #tpu.memory_space<any>>) target(%112 : memref<1x16xf32, #tpu.memory_space<vmem>>) target_semaphore(%114 : memref<!tpu.dma_semaphore, #tpu.memory_space<semaphore_mem>>)
    %c23 = arith.constant 23 : index
    %115 = memref.load %arg1[%c23] : memref<32xi32, #tpu.memory_space<smem>>
    %c23_i32 = arith.constant 23 : i32
    %c0_i32_69 = arith.constant 0 : i32
    %116 = tpu.memref_slice %arg2[%115, %c0_i32_69] : memref<50x16xf32, #tpu.memory_space<any>> -> memref<1x16xf32, #tpu.memory_space<any>>
    %c23_i32_70 = arith.constant 23 : i32
    %c0_i32_71 = arith.constant 0 : i32
    %117 = tpu.memref_slice %arg9[%c23_i32_70, %c0_i32_71] : memref<32x16xf32, #tpu.memory_space<vmem>> -> memref<1x16xf32, #tpu.memory_space<vmem>>
    %118 = tpu.memref_slice %arg10[%c23_i32] : memref<32x!tpu.dma_semaphore, #tpu.memory_space<semaphore_mem>> -> memref<1x!tpu.dma_semaphore, #tpu.memory_space<semaphore_mem>>
    %119 = tpu.memref_squeeze %118 : memref<1x!tpu.dma_semaphore, #tpu.memory_space<semaphore_mem>> -> memref<!tpu.dma_semaphore, #tpu.memory_space<semaphore_mem>>
    tpu.enqueue_dma source(%116 : memref<1x16xf32, #tpu.memory_space<any>>) target(%117 : memref<1x16xf32, #tpu.memory_space<vmem>>) target_semaphore(%119 : memref<!tpu.dma_semaphore, #tpu.memory_space<semaphore_mem>>)
    %c24 = arith.constant 24 : index
    %120 = memref.load %arg1[%c24] : memref<32xi32, #tpu.memory_space<smem>>
    %c24_i32 = arith.constant 24 : i32
    %c0_i32_72 = arith.constant 0 : i32
    %121 = tpu.memref_slice %arg2[%120, %c0_i32_72] : memref<50x16xf32, #tpu.memory_space<any>> -> memref<1x16xf32, #tpu.memory_space<any>>
    %c24_i32_73 = arith.constant 24 : i32
    %c0_i32_74 = arith.constant 0 : i32
    %122 = tpu.memref_slice %arg9[%c24_i32_73, %c0_i32_74] : memref<32x16xf32, #tpu.memory_space<vmem>> -> memref<1x16xf32, #tpu.memory_space<vmem>>
    %123 = tpu.memref_slice %arg10[%c24_i32] : memref<32x!tpu.dma_semaphore, #tpu.memory_space<semaphore_mem>> -> memref<1x!tpu.dma_semaphore, #tpu.memory_space<semaphore_mem>>
    %124 = tpu.memref_squeeze %123 : memref<1x!tpu.dma_semaphore, #tpu.memory_space<semaphore_mem>> -> memref<!tpu.dma_semaphore, #tpu.memory_space<semaphore_mem>>
    tpu.enqueue_dma source(%121 : memref<1x16xf32, #tpu.memory_space<any>>) target(%122 : memref<1x16xf32, #tpu.memory_space<vmem>>) target_semaphore(%124 : memref<!tpu.dma_semaphore, #tpu.memory_space<semaphore_mem>>)
    %c25 = arith.constant 25 : index
    %125 = memref.load %arg1[%c25] : memref<32xi32, #tpu.memory_space<smem>>
    %c25_i32 = arith.constant 25 : i32
    %c0_i32_75 = arith.constant 0 : i32
    %126 = tpu.memref_slice %arg2[%125, %c0_i32_75] : memref<50x16xf32, #tpu.memory_space<any>> -> memref<1x16xf32, #tpu.memory_space<any>>
    %c25_i32_76 = arith.constant 25 : i32
    %c0_i32_77 = arith.constant 0 : i32
    %127 = tpu.memref_slice %arg9[%c25_i32_76, %c0_i32_77] : memref<32x16xf32, #tpu.memory_space<vmem>> -> memref<1x16xf32, #tpu.memory_space<vmem>>
    %128 = tpu.memref_slice %arg10[%c25_i32] : memref<32x!tpu.dma_semaphore, #tpu.memory_space<semaphore_mem>> -> memref<1x!tpu.dma_semaphore, #tpu.memory_space<semaphore_mem>>
    %129 = tpu.memref_squeeze %128 : memref<1x!tpu.dma_semaphore, #tpu.memory_space<semaphore_mem>> -> memref<!tpu.dma_semaphore, #tpu.memory_space<semaphore_mem>>
    tpu.enqueue_dma source(%126 : memref<1x16xf32, #tpu.memory_space<any>>) target(%127 : memref<1x16xf32, #tpu.memory_space<vmem>>) target_semaphore(%129 : memref<!tpu.dma_semaphore, #tpu.memory_space<semaphore_mem>>)
    %c26 = arith.constant 26 : index
    %130 = memref.load %arg1[%c26] : memref<32xi32, #tpu.memory_space<smem>>
    %c26_i32 = arith.constant 26 : i32
    %c0_i32_78 = arith.constant 0 : i32
    %131 = tpu.memref_slice %arg2[%130, %c0_i32_78] : memref<50x16xf32, #tpu.memory_space<any>> -> memref<1x16xf32, #tpu.memory_space<any>>
    %c26_i32_79 = arith.constant 26 : i32
    %c0_i32_80 = arith.constant 0 : i32
    %132 = tpu.memref_slice %arg9[%c26_i32_79, %c0_i32_80] : memref<32x16xf32, #tpu.memory_space<vmem>> -> memref<1x16xf32, #tpu.memory_space<vmem>>
    %133 = tpu.memref_slice %arg10[%c26_i32] : memref<32x!tpu.dma_semaphore, #tpu.memory_space<semaphore_mem>> -> memref<1x!tpu.dma_semaphore, #tpu.memory_space<semaphore_mem>>
    %134 = tpu.memref_squeeze %133 : memref<1x!tpu.dma_semaphore, #tpu.memory_space<semaphore_mem>> -> memref<!tpu.dma_semaphore, #tpu.memory_space<semaphore_mem>>
    tpu.enqueue_dma source(%131 : memref<1x16xf32, #tpu.memory_space<any>>) target(%132 : memref<1x16xf32, #tpu.memory_space<vmem>>) target_semaphore(%134 : memref<!tpu.dma_semaphore, #tpu.memory_space<semaphore_mem>>)
    %c27 = arith.constant 27 : index
    %135 = memref.load %arg1[%c27] : memref<32xi32, #tpu.memory_space<smem>>
    %c27_i32 = arith.constant 27 : i32
    %c0_i32_81 = arith.constant 0 : i32
    %136 = tpu.memref_slice %arg2[%135, %c0_i32_81] : memref<50x16xf32, #tpu.memory_space<any>> -> memref<1x16xf32, #tpu.memory_space<any>>
    %c27_i32_82 = arith.constant 27 : i32
    %c0_i32_83 = arith.constant 0 : i32
    %137 = tpu.memref_slice %arg9[%c27_i32_82, %c0_i32_83] : memref<32x16xf32, #tpu.memory_space<vmem>> -> memref<1x16xf32, #tpu.memory_space<vmem>>
    %138 = tpu.memref_slice %arg10[%c27_i32] : memref<32x!tpu.dma_semaphore, #tpu.memory_space<semaphore_mem>> -> memref<1x!tpu.dma_semaphore, #tpu.memory_space<semaphore_mem>>
    %139 = tpu.memref_squeeze %138 : memref<1x!tpu.dma_semaphore, #tpu.memory_space<semaphore_mem>> -> memref<!tpu.dma_semaphore, #tpu.memory_space<semaphore_mem>>
    tpu.enqueue_dma source(%136 : memref<1x16xf32, #tpu.memory_space<any>>) target(%137 : memref<1x16xf32, #tpu.memory_space<vmem>>) target_semaphore(%139 : memref<!tpu.dma_semaphore, #tpu.memory_space<semaphore_mem>>)
    %c28 = arith.constant 28 : index
    %140 = memref.load %arg1[%c28] : memref<32xi32, #tpu.memory_space<smem>>
    %c28_i32 = arith.constant 28 : i32
    %c0_i32_84 = arith.constant 0 : i32
    %141 = tpu.memref_slice %arg2[%140, %c0_i32_84] : memref<50x16xf32, #tpu.memory_space<any>> -> memref<1x16xf32, #tpu.memory_space<any>>
    %c28_i32_85 = arith.constant 28 : i32
    %c0_i32_86 = arith.constant 0 : i32
    %142 = tpu.memref_slice %arg9[%c28_i32_85, %c0_i32_86] : memref<32x16xf32, #tpu.memory_space<vmem>> -> memref<1x16xf32, #tpu.memory_space<vmem>>
    %143 = tpu.memref_slice %arg10[%c28_i32] : memref<32x!tpu.dma_semaphore, #tpu.memory_space<semaphore_mem>> -> memref<1x!tpu.dma_semaphore, #tpu.memory_space<semaphore_mem>>
    %144 = tpu.memref_squeeze %143 : memref<1x!tpu.dma_semaphore, #tpu.memory_space<semaphore_mem>> -> memref<!tpu.dma_semaphore, #tpu.memory_space<semaphore_mem>>
    tpu.enqueue_dma source(%141 : memref<1x16xf32, #tpu.memory_space<any>>) target(%142 : memref<1x16xf32, #tpu.memory_space<vmem>>) target_semaphore(%144 : memref<!tpu.dma_semaphore, #tpu.memory_space<semaphore_mem>>)
    %c29 = arith.constant 29 : index
    %145 = memref.load %arg1[%c29] : memref<32xi32, #tpu.memory_space<smem>>
    %c29_i32 = arith.constant 29 : i32
    %c0_i32_87 = arith.constant 0 : i32
    %146 = tpu.memref_slice %arg2[%145, %c0_i32_87] : memref<50x16xf32, #tpu.memory_space<any>> -> memref<1x16xf32, #tpu.memory_space<any>>
    %c29_i32_88 = arith.constant 29 : i32
    %c0_i32_89 = arith.constant 0 : i32
    %147 = tpu.memref_slice %arg9[%c29_i32_88, %c0_i32_89] : memref<32x16xf32, #tpu.memory_space<vmem>> -> memref<1x16xf32, #tpu.memory_space<vmem>>
    %148 = tpu.memref_slice %arg10[%c29_i32] : memref<32x!tpu.dma_semaphore, #tpu.memory_space<semaphore_mem>> -> memref<1x!tpu.dma_semaphore, #tpu.memory_space<semaphore_mem>>
    %149 = tpu.memref_squeeze %148 : memref<1x!tpu.dma_semaphore, #tpu.memory_space<semaphore_mem>> -> memref<!tpu.dma_semaphore, #tpu.memory_space<semaphore_mem>>
    tpu.enqueue_dma source(%146 : memref<1x16xf32, #tpu.memory_space<any>>) target(%147 : memref<1x16xf32, #tpu.memory_space<vmem>>) target_semaphore(%149 : memref<!tpu.dma_semaphore, #tpu.memory_space<semaphore_mem>>)
    %c30 = arith.constant 30 : index
    %150 = memref.load %arg1[%c30] : memref<32xi32, #tpu.memory_space<smem>>
    %c30_i32 = arith.constant 30 : i32
    %c0_i32_90 = arith.constant 0 : i32
    %151 = tpu.memref_slice %arg2[%150, %c0_i32_90] : memref<50x16xf32, #tpu.memory_space<any>> -> memref<1x16xf32, #tpu.memory_space<any>>
    %c30_i32_91 = arith.constant 30 : i32
    %c0_i32_92 = arith.constant 0 : i32
    %152 = tpu.memref_slice %arg9[%c30_i32_91, %c0_i32_92] : memref<32x16xf32, #tpu.memory_space<vmem>> -> memref<1x16xf32, #tpu.memory_space<vmem>>
    %153 = tpu.memref_slice %arg10[%c30_i32] : memref<32x!tpu.dma_semaphore, #tpu.memory_space<semaphore_mem>> -> memref<1x!tpu.dma_semaphore, #tpu.memory_space<semaphore_mem>>
    %154 = tpu.memref_squeeze %153 : memref<1x!tpu.dma_semaphore, #tpu.memory_space<semaphore_mem>> -> memref<!tpu.dma_semaphore, #tpu.memory_space<semaphore_mem>>
    tpu.enqueue_dma source(%151 : memref<1x16xf32, #tpu.memory_space<any>>) target(%152 : memref<1x16xf32, #tpu.memory_space<vmem>>) target_semaphore(%154 : memref<!tpu.dma_semaphore, #tpu.memory_space<semaphore_mem>>)
    %c31 = arith.constant 31 : index
    %155 = memref.load %arg1[%c31] : memref<32xi32, #tpu.memory_space<smem>>
    %c31_i32 = arith.constant 31 : i32
    %c0_i32_93 = arith.constant 0 : i32
    %156 = tpu.memref_slice %arg2[%155, %c0_i32_93] : memref<50x16xf32, #tpu.memory_space<any>> -> memref<1x16xf32, #tpu.memory_space<any>>
    %c31_i32_94 = arith.constant 31 : i32
    %c0_i32_95 = arith.constant 0 : i32
    %157 = tpu.memref_slice %arg9[%c31_i32_94, %c0_i32_95] : memref<32x16xf32, #tpu.memory_space<vmem>> -> memref<1x16xf32, #tpu.memory_space<vmem>>
    %158 = tpu.memref_slice %arg10[%c31_i32] : memref<32x!tpu.dma_semaphore, #tpu.memory_space<semaphore_mem>> -> memref<1x!tpu.dma_semaphore, #tpu.memory_space<semaphore_mem>>
    %159 = tpu.memref_squeeze %158 : memref<1x!tpu.dma_semaphore, #tpu.memory_space<semaphore_mem>> -> memref<!tpu.dma_semaphore, #tpu.memory_space<semaphore_mem>>
    tpu.enqueue_dma source(%156 : memref<1x16xf32, #tpu.memory_space<any>>) target(%157 : memref<1x16xf32, #tpu.memory_space<vmem>>) target_semaphore(%159 : memref<!tpu.dma_semaphore, #tpu.memory_space<semaphore_mem>>)
    %c0_i32_96 = arith.constant 0 : i32
    %c0_i32_97 = arith.constant 0 : i32
    %160 = tpu.memref_slice %arg2[%0, %c0_i32_97] : memref<50x16xf32, #tpu.memory_space<any>> -> memref<1x16xf32, #tpu.memory_space<any>>
    %c0_i32_98 = arith.constant 0 : i32
    %c0_i32_99 = arith.constant 0 : i32
    %161 = tpu.memref_slice %arg9[%c0_i32_98, %c0_i32_99] : memref<32x16xf32, #tpu.memory_space<vmem>> -> memref<1x16xf32, #tpu.memory_space<vmem>>
    %162 = tpu.memref_slice %arg10[%c0_i32_96] : memref<32x!tpu.dma_semaphore, #tpu.memory_space<semaphore_mem>> -> memref<1x!tpu.dma_semaphore, #tpu.memory_space<semaphore_mem>>
    %163 = tpu.memref_squeeze %162 : memref<1x!tpu.dma_semaphore, #tpu.memory_space<semaphore_mem>> -> memref<!tpu.dma_semaphore, #tpu.memory_space<semaphore_mem>>
    tpu.wait_dma2 semaphore(%163 : memref<!tpu.dma_semaphore, #tpu.memory_space<semaphore_mem>>) src(%160 : memref<1x16xf32, #tpu.memory_space<any>>) dst(%161 : memref<1x16xf32, #tpu.memory_space<vmem>>)
    %c1_i32_100 = arith.constant 1 : i32
    %c0_i32_101 = arith.constant 0 : i32
    %164 = tpu.memref_slice %arg2[%5, %c0_i32_101] : memref<50x16xf32, #tpu.memory_space<any>> -> memref<1x16xf32, #tpu.memory_space<any>>
    %c1_i32_102 = arith.constant 1 : i32
    %c0_i32_103 = arith.constant 0 : i32
    %165 = tpu.memref_slice %arg9[%c1_i32_102, %c0_i32_103] : memref<32x16xf32, #tpu.memory_space<vmem>> -> memref<1x16xf32, #tpu.memory_space<vmem>>
    %166 = tpu.memref_slice %arg10[%c1_i32_100] : memref<32x!tpu.dma_semaphore, #tpu.memory_space<semaphore_mem>> -> memref<1x!tpu.dma_semaphore, #tpu.memory_space<semaphore_mem>>
    %167 = tpu.memref_squeeze %166 : memref<1x!tpu.dma_semaphore, #tpu.memory_space<semaphore_mem>> -> memref<!tpu.dma_semaphore, #tpu.memory_space<semaphore_mem>>
    tpu.wait_dma2 semaphore(%167 : memref<!tpu.dma_semaphore, #tpu.memory_space<semaphore_mem>>) src(%164 : memref<1x16xf32, #tpu.memory_space<any>>) dst(%165 : memref<1x16xf32, #tpu.memory_space<vmem>>)
    %c2_i32_104 = arith.constant 2 : i32
    %c0_i32_105 = arith.constant 0 : i32
    %168 = tpu.memref_slice %arg2[%10, %c0_i32_105] : memref<50x16xf32, #tpu.memory_space<any>> -> memref<1x16xf32, #tpu.memory_space<any>>
    %c2_i32_106 = arith.constant 2 : i32
    %c0_i32_107 = arith.constant 0 : i32
    %169 = tpu.memref_slice %arg9[%c2_i32_106, %c0_i32_107] : memref<32x16xf32, #tpu.memory_space<vmem>> -> memref<1x16xf32, #tpu.memory_space<vmem>>
    %170 = tpu.memref_slice %arg10[%c2_i32_104] : memref<32x!tpu.dma_semaphore, #tpu.memory_space<semaphore_mem>> -> memref<1x!tpu.dma_semaphore, #tpu.memory_space<semaphore_mem>>
    %171 = tpu.memref_squeeze %170 : memref<1x!tpu.dma_semaphore, #tpu.memory_space<semaphore_mem>> -> memref<!tpu.dma_semaphore, #tpu.memory_space<semaphore_mem>>
    tpu.wait_dma2 semaphore(%171 : memref<!tpu.dma_semaphore, #tpu.memory_space<semaphore_mem>>) src(%168 : memref<1x16xf32, #tpu.memory_space<any>>) dst(%169 : memref<1x16xf32, #tpu.memory_space<vmem>>)
    %c3_i32_108 = arith.constant 3 : i32
    %c0_i32_109 = arith.constant 0 : i32
    %172 = tpu.memref_slice %arg2[%15, %c0_i32_109] : memref<50x16xf32, #tpu.memory_space<any>> -> memref<1x16xf32, #tpu.memory_space<any>>
    %c3_i32_110 = arith.constant 3 : i32
    %c0_i32_111 = arith.constant 0 : i32
    %173 = tpu.memref_slice %arg9[%c3_i32_110, %c0_i32_111] : memref<32x16xf32, #tpu.memory_space<vmem>> -> memref<1x16xf32, #tpu.memory_space<vmem>>
    %174 = tpu.memref_slice %arg10[%c3_i32_108] : memref<32x!tpu.dma_semaphore, #tpu.memory_space<semaphore_mem>> -> memref<1x!tpu.dma_semaphore, #tpu.memory_space<semaphore_mem>>
    %175 = tpu.memref_squeeze %174 : memref<1x!tpu.dma_semaphore, #tpu.memory_space<semaphore_mem>> -> memref<!tpu.dma_semaphore, #tpu.memory_space<semaphore_mem>>
    tpu.wait_dma2 semaphore(%175 : memref<!tpu.dma_semaphore, #tpu.memory_space<semaphore_mem>>) src(%172 : memref<1x16xf32, #tpu.memory_space<any>>) dst(%173 : memref<1x16xf32, #tpu.memory_space<vmem>>)
    %c4_i32_112 = arith.constant 4 : i32
    %c0_i32_113 = arith.constant 0 : i32
    %176 = tpu.memref_slice %arg2[%20, %c0_i32_113] : memref<50x16xf32, #tpu.memory_space<any>> -> memref<1x16xf32, #tpu.memory_space<any>>
    %c4_i32_114 = arith.constant 4 : i32
    %c0_i32_115 = arith.constant 0 : i32
    %177 = tpu.memref_slice %arg9[%c4_i32_114, %c0_i32_115] : memref<32x16xf32, #tpu.memory_space<vmem>> -> memref<1x16xf32, #tpu.memory_space<vmem>>
    %178 = tpu.memref_slice %arg10[%c4_i32_112] : memref<32x!tpu.dma_semaphore, #tpu.memory_space<semaphore_mem>> -> memref<1x!tpu.dma_semaphore, #tpu.memory_space<semaphore_mem>>
    %179 = tpu.memref_squeeze %178 : memref<1x!tpu.dma_semaphore, #tpu.memory_space<semaphore_mem>> -> memref<!tpu.dma_semaphore, #tpu.memory_space<semaphore_mem>>
    tpu.wait_dma2 semaphore(%179 : memref<!tpu.dma_semaphore, #tpu.memory_space<semaphore_mem>>) src(%176 : memref<1x16xf32, #tpu.memory_space<any>>) dst(%177 : memref<1x16xf32, #tpu.memory_space<vmem>>)
    %c5_i32_116 = arith.constant 5 : i32
    %c0_i32_117 = arith.constant 0 : i32
    %180 = tpu.memref_slice %arg2[%25, %c0_i32_117] : memref<50x16xf32, #tpu.memory_space<any>> -> memref<1x16xf32, #tpu.memory_space<any>>
    %c5_i32_118 = arith.constant 5 : i32
    %c0_i32_119 = arith.constant 0 : i32
    %181 = tpu.memref_slice %arg9[%c5_i32_118, %c0_i32_119] : memref<32x16xf32, #tpu.memory_space<vmem>> -> memref<1x16xf32, #tpu.memory_space<vmem>>
    %182 = tpu.memref_slice %arg10[%c5_i32_116] : memref<32x!tpu.dma_semaphore, #tpu.memory_space<semaphore_mem>> -> memref<1x!tpu.dma_semaphore, #tpu.memory_space<semaphore_mem>>
    %183 = tpu.memref_squeeze %182 : memref<1x!tpu.dma_semaphore, #tpu.memory_space<semaphore_mem>> -> memref<!tpu.dma_semaphore, #tpu.memory_space<semaphore_mem>>
    tpu.wait_dma2 semaphore(%183 : memref<!tpu.dma_semaphore, #tpu.memory_space<semaphore_mem>>) src(%180 : memref<1x16xf32, #tpu.memory_space<any>>) dst(%181 : memref<1x16xf32, #tpu.memory_space<vmem>>)
    %c6_i32_120 = arith.constant 6 : i32
    %c0_i32_121 = arith.constant 0 : i32
    %184 = tpu.memref_slice %arg2[%30, %c0_i32_121] : memref<50x16xf32, #tpu.memory_space<any>> -> memref<1x16xf32, #tpu.memory_space<any>>
    %c6_i32_122 = arith.constant 6 : i32
    %c0_i32_123 = arith.constant 0 : i32
    %185 = tpu.memref_slice %arg9[%c6_i32_122, %c0_i32_123] : memref<32x16xf32, #tpu.memory_space<vmem>> -> memref<1x16xf32, #tpu.memory_space<vmem>>
    %186 = tpu.memref_slice %arg10[%c6_i32_120] : memref<32x!tpu.dma_semaphore, #tpu.memory_space<semaphore_mem>> -> memref<1x!tpu.dma_semaphore, #tpu.memory_space<semaphore_mem>>
    %187 = tpu.memref_squeeze %186 : memref<1x!tpu.dma_semaphore, #tpu.memory_space<semaphore_mem>> -> memref<!tpu.dma_semaphore, #tpu.memory_space<semaphore_mem>>
    tpu.wait_dma2 semaphore(%187 : memref<!tpu.dma_semaphore, #tpu.memory_space<semaphore_mem>>) src(%184 : memref<1x16xf32, #tpu.memory_space<any>>) dst(%185 : memref<1x16xf32, #tpu.memory_space<vmem>>)
    %c7_i32_124 = arith.constant 7 : i32
    %c0_i32_125 = arith.constant 0 : i32
    %188 = tpu.memref_slice %arg2[%35, %c0_i32_125] : memref<50x16xf32, #tpu.memory_space<any>> -> memref<1x16xf32, #tpu.memory_space<any>>
    %c7_i32_126 = arith.constant 7 : i32
    %c0_i32_127 = arith.constant 0 : i32
    %189 = tpu.memref_slice %arg9[%c7_i32_126, %c0_i32_127] : memref<32x16xf32, #tpu.memory_space<vmem>> -> memref<1x16xf32, #tpu.memory_space<vmem>>
    %190 = tpu.memref_slice %arg10[%c7_i32_124] : memref<32x!tpu.dma_semaphore, #tpu.memory_space<semaphore_mem>> -> memref<1x!tpu.dma_semaphore, #tpu.memory_space<semaphore_mem>>
    %191 = tpu.memref_squeeze %190 : memref<1x!tpu.dma_semaphore, #tpu.memory_space<semaphore_mem>> -> memref<!tpu.dma_semaphore, #tpu.memory_space<semaphore_mem>>
    tpu.wait_dma2 semaphore(%191 : memref<!tpu.dma_semaphore, #tpu.memory_space<semaphore_mem>>) src(%188 : memref<1x16xf32, #tpu.memory_space<any>>) dst(%189 : memref<1x16xf32, #tpu.memory_space<vmem>>)
    %c8_i32_128 = arith.constant 8 : i32
    %c0_i32_129 = arith.constant 0 : i32
    %192 = tpu.memref_slice %arg2[%40, %c0_i32_129] : memref<50x16xf32, #tpu.memory_space<any>> -> memref<1x16xf32, #tpu.memory_space<any>>
    %c8_i32_130 = arith.constant 8 : i32
    %c0_i32_131 = arith.constant 0 : i32
    %193 = tpu.memref_slice %arg9[%c8_i32_130, %c0_i32_131] : memref<32x16xf32, #tpu.memory_space<vmem>> -> memref<1x16xf32, #tpu.memory_space<vmem>>
    %194 = tpu.memref_slice %arg10[%c8_i32_128] : memref<32x!tpu.dma_semaphore, #tpu.memory_space<semaphore_mem>> -> memref<1x!tpu.dma_semaphore, #tpu.memory_space<semaphore_mem>>
    %195 = tpu.memref_squeeze %194 : memref<1x!tpu.dma_semaphore, #tpu.memory_space<semaphore_mem>> -> memref<!tpu.dma_semaphore, #tpu.memory_space<semaphore_mem>>
    tpu.wait_dma2 semaphore(%195 : memref<!tpu.dma_semaphore, #tpu.memory_space<semaphore_mem>>) src(%192 : memref<1x16xf32, #tpu.memory_space<any>>) dst(%193 : memref<1x16xf32, #tpu.memory_space<vmem>>)
    %c9_i32_132 = arith.constant 9 : i32
    %c0_i32_133 = arith.constant 0 : i32
    %196 = tpu.memref_slice %arg2[%45, %c0_i32_133] : memref<50x16xf32, #tpu.memory_space<any>> -> memref<1x16xf32, #tpu.memory_space<any>>
    %c9_i32_134 = arith.constant 9 : i32
    %c0_i32_135 = arith.constant 0 : i32
    %197 = tpu.memref_slice %arg9[%c9_i32_134, %c0_i32_135] : memref<32x16xf32, #tpu.memory_space<vmem>> -> memref<1x16xf32, #tpu.memory_space<vmem>>
    %198 = tpu.memref_slice %arg10[%c9_i32_132] : memref<32x!tpu.dma_semaphore, #tpu.memory_space<semaphore_mem>> -> memref<1x!tpu.dma_semaphore, #tpu.memory_space<semaphore_mem>>
    %199 = tpu.memref_squeeze %198 : memref<1x!tpu.dma_semaphore, #tpu.memory_space<semaphore_mem>> -> memref<!tpu.dma_semaphore, #tpu.memory_space<semaphore_mem>>
    tpu.wait_dma2 semaphore(%199 : memref<!tpu.dma_semaphore, #tpu.memory_space<semaphore_mem>>) src(%196 : memref<1x16xf32, #tpu.memory_space<any>>) dst(%197 : memref<1x16xf32, #tpu.memory_space<vmem>>)
    %c10_i32_136 = arith.constant 10 : i32
    %c0_i32_137 = arith.constant 0 : i32
    %200 = tpu.memref_slice %arg2[%50, %c0_i32_137] : memref<50x16xf32, #tpu.memory_space<any>> -> memref<1x16xf32, #tpu.memory_space<any>>
    %c10_i32_138 = arith.constant 10 : i32
    %c0_i32_139 = arith.constant 0 : i32
    %201 = tpu.memref_slice %arg9[%c10_i32_138, %c0_i32_139] : memref<32x16xf32, #tpu.memory_space<vmem>> -> memref<1x16xf32, #tpu.memory_space<vmem>>
    %202 = tpu.memref_slice %arg10[%c10_i32_136] : memref<32x!tpu.dma_semaphore, #tpu.memory_space<semaphore_mem>> -> memref<1x!tpu.dma_semaphore, #tpu.memory_space<semaphore_mem>>
    %203 = tpu.memref_squeeze %202 : memref<1x!tpu.dma_semaphore, #tpu.memory_space<semaphore_mem>> -> memref<!tpu.dma_semaphore, #tpu.memory_space<semaphore_mem>>
    tpu.wait_dma2 semaphore(%203 : memref<!tpu.dma_semaphore, #tpu.memory_space<semaphore_mem>>) src(%200 : memref<1x16xf32, #tpu.memory_space<any>>) dst(%201 : memref<1x16xf32, #tpu.memory_space<vmem>>)
    %c11_i32_140 = arith.constant 11 : i32
    %c0_i32_141 = arith.constant 0 : i32
    %204 = tpu.memref_slice %arg2[%55, %c0_i32_141] : memref<50x16xf32, #tpu.memory_space<any>> -> memref<1x16xf32, #tpu.memory_space<any>>
    %c11_i32_142 = arith.constant 11 : i32
    %c0_i32_143 = arith.constant 0 : i32
    %205 = tpu.memref_slice %arg9[%c11_i32_142, %c0_i32_143] : memref<32x16xf32, #tpu.memory_space<vmem>> -> memref<1x16xf32, #tpu.memory_space<vmem>>
    %206 = tpu.memref_slice %arg10[%c11_i32_140] : memref<32x!tpu.dma_semaphore, #tpu.memory_space<semaphore_mem>> -> memref<1x!tpu.dma_semaphore, #tpu.memory_space<semaphore_mem>>
    %207 = tpu.memref_squeeze %206 : memref<1x!tpu.dma_semaphore, #tpu.memory_space<semaphore_mem>> -> memref<!tpu.dma_semaphore, #tpu.memory_space<semaphore_mem>>
    tpu.wait_dma2 semaphore(%207 : memref<!tpu.dma_semaphore, #tpu.memory_space<semaphore_mem>>) src(%204 : memref<1x16xf32, #tpu.memory_space<any>>) dst(%205 : memref<1x16xf32, #tpu.memory_space<vmem>>)
    %c12_i32_144 = arith.constant 12 : i32
    %c0_i32_145 = arith.constant 0 : i32
    %208 = tpu.memref_slice %arg2[%60, %c0_i32_145] : memref<50x16xf32, #tpu.memory_space<any>> -> memref<1x16xf32, #tpu.memory_space<any>>
    %c12_i32_146 = arith.constant 12 : i32
    %c0_i32_147 = arith.constant 0 : i32
    %209 = tpu.memref_slice %arg9[%c12_i32_146, %c0_i32_147] : memref<32x16xf32, #tpu.memory_space<vmem>> -> memref<1x16xf32, #tpu.memory_space<vmem>>
    %210 = tpu.memref_slice %arg10[%c12_i32_144] : memref<32x!tpu.dma_semaphore, #tpu.memory_space<semaphore_mem>> -> memref<1x!tpu.dma_semaphore, #tpu.memory_space<semaphore_mem>>
    %211 = tpu.memref_squeeze %210 : memref<1x!tpu.dma_semaphore, #tpu.memory_space<semaphore_mem>> -> memref<!tpu.dma_semaphore, #tpu.memory_space<semaphore_mem>>
    tpu.wait_dma2 semaphore(%211 : memref<!tpu.dma_semaphore, #tpu.memory_space<semaphore_mem>>) src(%208 : memref<1x16xf32, #tpu.memory_space<any>>) dst(%209 : memref<1x16xf32, #tpu.memory_space<vmem>>)
    %c13_i32_148 = arith.constant 13 : i32
    %c0_i32_149 = arith.constant 0 : i32
    %212 = tpu.memref_slice %arg2[%65, %c0_i32_149] : memref<50x16xf32, #tpu.memory_space<any>> -> memref<1x16xf32, #tpu.memory_space<any>>
    %c13_i32_150 = arith.constant 13 : i32
    %c0_i32_151 = arith.constant 0 : i32
    %213 = tpu.memref_slice %arg9[%c13_i32_150, %c0_i32_151] : memref<32x16xf32, #tpu.memory_space<vmem>> -> memref<1x16xf32, #tpu.memory_space<vmem>>
    %214 = tpu.memref_slice %arg10[%c13_i32_148] : memref<32x!tpu.dma_semaphore, #tpu.memory_space<semaphore_mem>> -> memref<1x!tpu.dma_semaphore, #tpu.memory_space<semaphore_mem>>
    %215 = tpu.memref_squeeze %214 : memref<1x!tpu.dma_semaphore, #tpu.memory_space<semaphore_mem>> -> memref<!tpu.dma_semaphore, #tpu.memory_space<semaphore_mem>>
    tpu.wait_dma2 semaphore(%215 : memref<!tpu.dma_semaphore, #tpu.memory_space<semaphore_mem>>) src(%212 : memref<1x16xf32, #tpu.memory_space<any>>) dst(%213 : memref<1x16xf32, #tpu.memory_space<vmem>>)
    %c14_i32_152 = arith.constant 14 : i32
    %c0_i32_153 = arith.constant 0 : i32
    %216 = tpu.memref_slice %arg2[%70, %c0_i32_153] : memref<50x16xf32, #tpu.memory_space<any>> -> memref<1x16xf32, #tpu.memory_space<any>>
    %c14_i32_154 = arith.constant 14 : i32
    %c0_i32_155 = arith.constant 0 : i32
    %217 = tpu.memref_slice %arg9[%c14_i32_154, %c0_i32_155] : memref<32x16xf32, #tpu.memory_space<vmem>> -> memref<1x16xf32, #tpu.memory_space<vmem>>
    %218 = tpu.memref_slice %arg10[%c14_i32_152] : memref<32x!tpu.dma_semaphore, #tpu.memory_space<semaphore_mem>> -> memref<1x!tpu.dma_semaphore, #tpu.memory_space<semaphore_mem>>
    %219 = tpu.memref_squeeze %218 : memref<1x!tpu.dma_semaphore, #tpu.memory_space<semaphore_mem>> -> memref<!tpu.dma_semaphore, #tpu.memory_space<semaphore_mem>>
    tpu.wait_dma2 semaphore(%219 : memref<!tpu.dma_semaphore, #tpu.memory_space<semaphore_mem>>) src(%216 : memref<1x16xf32, #tpu.memory_space<any>>) dst(%217 : memref<1x16xf32, #tpu.memory_space<vmem>>)
    %c15_i32_156 = arith.constant 15 : i32
    %c0_i32_157 = arith.constant 0 : i32
    %220 = tpu.memref_slice %arg2[%75, %c0_i32_157] : memref<50x16xf32, #tpu.memory_space<any>> -> memref<1x16xf32, #tpu.memory_space<any>>
    %c15_i32_158 = arith.constant 15 : i32
    %c0_i32_159 = arith.constant 0 : i32
    %221 = tpu.memref_slice %arg9[%c15_i32_158, %c0_i32_159] : memref<32x16xf32, #tpu.memory_space<vmem>> -> memref<1x16xf32, #tpu.memory_space<vmem>>
    %222 = tpu.memref_slice %arg10[%c15_i32_156] : memref<32x!tpu.dma_semaphore, #tpu.memory_space<semaphore_mem>> -> memref<1x!tpu.dma_semaphore, #tpu.memory_space<semaphore_mem>>
    %223 = tpu.memref_squeeze %222 : memref<1x!tpu.dma_semaphore, #tpu.memory_space<semaphore_mem>> -> memref<!tpu.dma_semaphore, #tpu.memory_space<semaphore_mem>>
    tpu.wait_dma2 semaphore(%223 : memref<!tpu.dma_semaphore, #tpu.memory_space<semaphore_mem>>) src(%220 : memref<1x16xf32, #tpu.memory_space<any>>) dst(%221 : memref<1x16xf32, #tpu.memory_space<vmem>>)
    %c16_i32_160 = arith.constant 16 : i32
    %c0_i32_161 = arith.constant 0 : i32
    %224 = tpu.memref_slice %arg2[%80, %c0_i32_161] : memref<50x16xf32, #tpu.memory_space<any>> -> memref<1x16xf32, #tpu.memory_space<any>>
    %c16_i32_162 = arith.constant 16 : i32
    %c0_i32_163 = arith.constant 0 : i32
    %225 = tpu.memref_slice %arg9[%c16_i32_162, %c0_i32_163] : memref<32x16xf32, #tpu.memory_space<vmem>> -> memref<1x16xf32, #tpu.memory_space<vmem>>
    %226 = tpu.memref_slice %arg10[%c16_i32_160] : memref<32x!tpu.dma_semaphore, #tpu.memory_space<semaphore_mem>> -> memref<1x!tpu.dma_semaphore, #tpu.memory_space<semaphore_mem>>
    %227 = tpu.memref_squeeze %226 : memref<1x!tpu.dma_semaphore, #tpu.memory_space<semaphore_mem>> -> memref<!tpu.dma_semaphore, #tpu.memory_space<semaphore_mem>>
    tpu.wait_dma2 semaphore(%227 : memref<!tpu.dma_semaphore, #tpu.memory_space<semaphore_mem>>) src(%224 : memref<1x16xf32, #tpu.memory_space<any>>) dst(%225 : memref<1x16xf32, #tpu.memory_space<vmem>>)
    %c17_i32_164 = arith.constant 17 : i32
    %c0_i32_165 = arith.constant 0 : i32
    %228 = tpu.memref_slice %arg2[%85, %c0_i32_165] : memref<50x16xf32, #tpu.memory_space<any>> -> memref<1x16xf32, #tpu.memory_space<any>>
    %c17_i32_166 = arith.constant 17 : i32
    %c0_i32_167 = arith.constant 0 : i32
    %229 = tpu.memref_slice %arg9[%c17_i32_166, %c0_i32_167] : memref<32x16xf32, #tpu.memory_space<vmem>> -> memref<1x16xf32, #tpu.memory_space<vmem>>
    %230 = tpu.memref_slice %arg10[%c17_i32_164] : memref<32x!tpu.dma_semaphore, #tpu.memory_space<semaphore_mem>> -> memref<1x!tpu.dma_semaphore, #tpu.memory_space<semaphore_mem>>
    %231 = tpu.memref_squeeze %230 : memref<1x!tpu.dma_semaphore, #tpu.memory_space<semaphore_mem>> -> memref<!tpu.dma_semaphore, #tpu.memory_space<semaphore_mem>>
    tpu.wait_dma2 semaphore(%231 : memref<!tpu.dma_semaphore, #tpu.memory_space<semaphore_mem>>) src(%228 : memref<1x16xf32, #tpu.memory_space<any>>) dst(%229 : memref<1x16xf32, #tpu.memory_space<vmem>>)
    %c18_i32_168 = arith.constant 18 : i32
    %c0_i32_169 = arith.constant 0 : i32
    %232 = tpu.memref_slice %arg2[%90, %c0_i32_169] : memref<50x16xf32, #tpu.memory_space<any>> -> memref<1x16xf32, #tpu.memory_space<any>>
    %c18_i32_170 = arith.constant 18 : i32
    %c0_i32_171 = arith.constant 0 : i32
    %233 = tpu.memref_slice %arg9[%c18_i32_170, %c0_i32_171] : memref<32x16xf32, #tpu.memory_space<vmem>> -> memref<1x16xf32, #tpu.memory_space<vmem>>
    %234 = tpu.memref_slice %arg10[%c18_i32_168] : memref<32x!tpu.dma_semaphore, #tpu.memory_space<semaphore_mem>> -> memref<1x!tpu.dma_semaphore, #tpu.memory_space<semaphore_mem>>
    %235 = tpu.memref_squeeze %234 : memref<1x!tpu.dma_semaphore, #tpu.memory_space<semaphore_mem>> -> memref<!tpu.dma_semaphore, #tpu.memory_space<semaphore_mem>>
    tpu.wait_dma2 semaphore(%235 : memref<!tpu.dma_semaphore, #tpu.memory_space<semaphore_mem>>) src(%232 : memref<1x16xf32, #tpu.memory_space<any>>) dst(%233 : memref<1x16xf32, #tpu.memory_space<vmem>>)
    %c19_i32_172 = arith.constant 19 : i32
    %c0_i32_173 = arith.constant 0 : i32
    %236 = tpu.memref_slice %arg2[%95, %c0_i32_173] : memref<50x16xf32, #tpu.memory_space<any>> -> memref<1x16xf32, #tpu.memory_space<any>>
    %c19_i32_174 = arith.constant 19 : i32
    %c0_i32_175 = arith.constant 0 : i32
    %237 = tpu.memref_slice %arg9[%c19_i32_174, %c0_i32_175] : memref<32x16xf32, #tpu.memory_space<vmem>> -> memref<1x16xf32, #tpu.memory_space<vmem>>
    %238 = tpu.memref_slice %arg10[%c19_i32_172] : memref<32x!tpu.dma_semaphore, #tpu.memory_space<semaphore_mem>> -> memref<1x!tpu.dma_semaphore, #tpu.memory_space<semaphore_mem>>
    %239 = tpu.memref_squeeze %238 : memref<1x!tpu.dma_semaphore, #tpu.memory_space<semaphore_mem>> -> memref<!tpu.dma_semaphore, #tpu.memory_space<semaphore_mem>>
    tpu.wait_dma2 semaphore(%239 : memref<!tpu.dma_semaphore, #tpu.memory_space<semaphore_mem>>) src(%236 : memref<1x16xf32, #tpu.memory_space<any>>) dst(%237 : memref<1x16xf32, #tpu.memory_space<vmem>>)
    %c20_i32_176 = arith.constant 20 : i32
    %c0_i32_177 = arith.constant 0 : i32
    %240 = tpu.memref_slice %arg2[%100, %c0_i32_177] : memref<50x16xf32, #tpu.memory_space<any>> -> memref<1x16xf32, #tpu.memory_space<any>>
    %c20_i32_178 = arith.constant 20 : i32
    %c0_i32_179 = arith.constant 0 : i32
    %241 = tpu.memref_slice %arg9[%c20_i32_178, %c0_i32_179] : memref<32x16xf32, #tpu.memory_space<vmem>> -> memref<1x16xf32, #tpu.memory_space<vmem>>
    %242 = tpu.memref_slice %arg10[%c20_i32_176] : memref<32x!tpu.dma_semaphore, #tpu.memory_space<semaphore_mem>> -> memref<1x!tpu.dma_semaphore, #tpu.memory_space<semaphore_mem>>
    %243 = tpu.memref_squeeze %242 : memref<1x!tpu.dma_semaphore, #tpu.memory_space<semaphore_mem>> -> memref<!tpu.dma_semaphore, #tpu.memory_space<semaphore_mem>>
    tpu.wait_dma2 semaphore(%243 : memref<!tpu.dma_semaphore, #tpu.memory_space<semaphore_mem>>) src(%240 : memref<1x16xf32, #tpu.memory_space<any>>) dst(%241 : memref<1x16xf32, #tpu.memory_space<vmem>>)
    %c21_i32_180 = arith.constant 21 : i32
    %c0_i32_181 = arith.constant 0 : i32
    %244 = tpu.memref_slice %arg2[%105, %c0_i32_181] : memref<50x16xf32, #tpu.memory_space<any>> -> memref<1x16xf32, #tpu.memory_space<any>>
    %c21_i32_182 = arith.constant 21 : i32
    %c0_i32_183 = arith.constant 0 : i32
    %245 = tpu.memref_slice %arg9[%c21_i32_182, %c0_i32_183] : memref<32x16xf32, #tpu.memory_space<vmem>> -> memref<1x16xf32, #tpu.memory_space<vmem>>
    %246 = tpu.memref_slice %arg10[%c21_i32_180] : memref<32x!tpu.dma_semaphore, #tpu.memory_space<semaphore_mem>> -> memref<1x!tpu.dma_semaphore, #tpu.memory_space<semaphore_mem>>
    %247 = tpu.memref_squeeze %246 : memref<1x!tpu.dma_semaphore, #tpu.memory_space<semaphore_mem>> -> memref<!tpu.dma_semaphore, #tpu.memory_space<semaphore_mem>>
    tpu.wait_dma2 semaphore(%247 : memref<!tpu.dma_semaphore, #tpu.memory_space<semaphore_mem>>) src(%244 : memref<1x16xf32, #tpu.memory_space<any>>) dst(%245 : memref<1x16xf32, #tpu.memory_space<vmem>>)
    %c22_i32_184 = arith.constant 22 : i32
    %c0_i32_185 = arith.constant 0 : i32
    %248 = tpu.memref_slice %arg2[%110, %c0_i32_185] : memref<50x16xf32, #tpu.memory_space<any>> -> memref<1x16xf32, #tpu.memory_space<any>>
    %c22_i32_186 = arith.constant 22 : i32
    %c0_i32_187 = arith.constant 0 : i32
    %249 = tpu.memref_slice %arg9[%c22_i32_186, %c0_i32_187] : memref<32x16xf32, #tpu.memory_space<vmem>> -> memref<1x16xf32, #tpu.memory_space<vmem>>
    %250 = tpu.memref_slice %arg10[%c22_i32_184] : memref<32x!tpu.dma_semaphore, #tpu.memory_space<semaphore_mem>> -> memref<1x!tpu.dma_semaphore, #tpu.memory_space<semaphore_mem>>
    %251 = tpu.memref_squeeze %250 : memref<1x!tpu.dma_semaphore, #tpu.memory_space<semaphore_mem>> -> memref<!tpu.dma_semaphore, #tpu.memory_space<semaphore_mem>>
    tpu.wait_dma2 semaphore(%251 : memref<!tpu.dma_semaphore, #tpu.memory_space<semaphore_mem>>) src(%248 : memref<1x16xf32, #tpu.memory_space<any>>) dst(%249 : memref<1x16xf32, #tpu.memory_space<vmem>>)
    %c23_i32_188 = arith.constant 23 : i32
    %c0_i32_189 = arith.constant 0 : i32
    %252 = tpu.memref_slice %arg2[%115, %c0_i32_189] : memref<50x16xf32, #tpu.memory_space<any>> -> memref<1x16xf32, #tpu.memory_space<any>>
    %c23_i32_190 = arith.constant 23 : i32
    %c0_i32_191 = arith.constant 0 : i32
    %253 = tpu.memref_slice %arg9[%c23_i32_190, %c0_i32_191] : memref<32x16xf32, #tpu.memory_space<vmem>> -> memref<1x16xf32, #tpu.memory_space<vmem>>
    %254 = tpu.memref_slice %arg10[%c23_i32_188] : memref<32x!tpu.dma_semaphore, #tpu.memory_space<semaphore_mem>> -> memref<1x!tpu.dma_semaphore, #tpu.memory_space<semaphore_mem>>
    %255 = tpu.memref_squeeze %254 : memref<1x!tpu.dma_semaphore, #tpu.memory_space<semaphore_mem>> -> memref<!tpu.dma_semaphore, #tpu.memory_space<semaphore_mem>>
    tpu.wait_dma2 semaphore(%255 : memref<!tpu.dma_semaphore, #tpu.memory_space<semaphore_mem>>) src(%252 : memref<1x16xf32, #tpu.memory_space<any>>) dst(%253 : memref<1x16xf32, #tpu.memory_space<vmem>>)
    %c24_i32_192 = arith.constant 24 : i32
    %c0_i32_193 = arith.constant 0 : i32
    %256 = tpu.memref_slice %arg2[%120, %c0_i32_193] : memref<50x16xf32, #tpu.memory_space<any>> -> memref<1x16xf32, #tpu.memory_space<any>>
    %c24_i32_194 = arith.constant 24 : i32
    %c0_i32_195 = arith.constant 0 : i32
    %257 = tpu.memref_slice %arg9[%c24_i32_194, %c0_i32_195] : memref<32x16xf32, #tpu.memory_space<vmem>> -> memref<1x16xf32, #tpu.memory_space<vmem>>
    %258 = tpu.memref_slice %arg10[%c24_i32_192] : memref<32x!tpu.dma_semaphore, #tpu.memory_space<semaphore_mem>> -> memref<1x!tpu.dma_semaphore, #tpu.memory_space<semaphore_mem>>
    %259 = tpu.memref_squeeze %258 : memref<1x!tpu.dma_semaphore, #tpu.memory_space<semaphore_mem>> -> memref<!tpu.dma_semaphore, #tpu.memory_space<semaphore_mem>>
    tpu.wait_dma2 semaphore(%259 : memref<!tpu.dma_semaphore, #tpu.memory_space<semaphore_mem>>) src(%256 : memref<1x16xf32, #tpu.memory_space<any>>) dst(%257 : memref<1x16xf32, #tpu.memory_space<vmem>>)
    %c25_i32_196 = arith.constant 25 : i32
    %c0_i32_197 = arith.constant 0 : i32
    %260 = tpu.memref_slice %arg2[%125, %c0_i32_197] : memref<50x16xf32, #tpu.memory_space<any>> -> memref<1x16xf32, #tpu.memory_space<any>>
    %c25_i32_198 = arith.constant 25 : i32
    %c0_i32_199 = arith.constant 0 : i32
    %261 = tpu.memref_slice %arg9[%c25_i32_198, %c0_i32_199] : memref<32x16xf32, #tpu.memory_space<vmem>> -> memref<1x16xf32, #tpu.memory_space<vmem>>
    %262 = tpu.memref_slice %arg10[%c25_i32_196] : memref<32x!tpu.dma_semaphore, #tpu.memory_space<semaphore_mem>> -> memref<1x!tpu.dma_semaphore, #tpu.memory_space<semaphore_mem>>
    %263 = tpu.memref_squeeze %262 : memref<1x!tpu.dma_semaphore, #tpu.memory_space<semaphore_mem>> -> memref<!tpu.dma_semaphore, #tpu.memory_space<semaphore_mem>>
    tpu.wait_dma2 semaphore(%263 : memref<!tpu.dma_semaphore, #tpu.memory_space<semaphore_mem>>) src(%260 : memref<1x16xf32, #tpu.memory_space<any>>) dst(%261 : memref<1x16xf32, #tpu.memory_space<vmem>>)
    %c26_i32_200 = arith.constant 26 : i32
    %c0_i32_201 = arith.constant 0 : i32
    %264 = tpu.memref_slice %arg2[%130, %c0_i32_201] : memref<50x16xf32, #tpu.memory_space<any>> -> memref<1x16xf32, #tpu.memory_space<any>>
    %c26_i32_202 = arith.constant 26 : i32
    %c0_i32_203 = arith.constant 0 : i32
    %265 = tpu.memref_slice %arg9[%c26_i32_202, %c0_i32_203] : memref<32x16xf32, #tpu.memory_space<vmem>> -> memref<1x16xf32, #tpu.memory_space<vmem>>
    %266 = tpu.memref_slice %arg10[%c26_i32_200] : memref<32x!tpu.dma_semaphore, #tpu.memory_space<semaphore_mem>> -> memref<1x!tpu.dma_semaphore, #tpu.memory_space<semaphore_mem>>
    %267 = tpu.memref_squeeze %266 : memref<1x!tpu.dma_semaphore, #tpu.memory_space<semaphore_mem>> -> memref<!tpu.dma_semaphore, #tpu.memory_space<semaphore_mem>>
    tpu.wait_dma2 semaphore(%267 : memref<!tpu.dma_semaphore, #tpu.memory_space<semaphore_mem>>) src(%264 : memref<1x16xf32, #tpu.memory_space<any>>) dst(%265 : memref<1x16xf32, #tpu.memory_space<vmem>>)
    %c27_i32_204 = arith.constant 27 : i32
    %c0_i32_205 = arith.constant 0 : i32
    %268 = tpu.memref_slice %arg2[%135, %c0_i32_205] : memref<50x16xf32, #tpu.memory_space<any>> -> memref<1x16xf32, #tpu.memory_space<any>>
    %c27_i32_206 = arith.constant 27 : i32
    %c0_i32_207 = arith.constant 0 : i32
    %269 = tpu.memref_slice %arg9[%c27_i32_206, %c0_i32_207] : memref<32x16xf32, #tpu.memory_space<vmem>> -> memref<1x16xf32, #tpu.memory_space<vmem>>
    %270 = tpu.memref_slice %arg10[%c27_i32_204] : memref<32x!tpu.dma_semaphore, #tpu.memory_space<semaphore_mem>> -> memref<1x!tpu.dma_semaphore, #tpu.memory_space<semaphore_mem>>
    %271 = tpu.memref_squeeze %270 : memref<1x!tpu.dma_semaphore, #tpu.memory_space<semaphore_mem>> -> memref<!tpu.dma_semaphore, #tpu.memory_space<semaphore_mem>>
    tpu.wait_dma2 semaphore(%271 : memref<!tpu.dma_semaphore, #tpu.memory_space<semaphore_mem>>) src(%268 : memref<1x16xf32, #tpu.memory_space<any>>) dst(%269 : memref<1x16xf32, #tpu.memory_space<vmem>>)
    %c28_i32_208 = arith.constant 28 : i32
    %c0_i32_209 = arith.constant 0 : i32
    %272 = tpu.memref_slice %arg2[%140, %c0_i32_209] : memref<50x16xf32, #tpu.memory_space<any>> -> memref<1x16xf32, #tpu.memory_space<any>>
    %c28_i32_210 = arith.constant 28 : i32
    %c0_i32_211 = arith.constant 0 : i32
    %273 = tpu.memref_slice %arg9[%c28_i32_210, %c0_i32_211] : memref<32x16xf32, #tpu.memory_space<vmem>> -> memref<1x16xf32, #tpu.memory_space<vmem>>
    %274 = tpu.memref_slice %arg10[%c28_i32_208] : memref<32x!tpu.dma_semaphore, #tpu.memory_space<semaphore_mem>> -> memref<1x!tpu.dma_semaphore, #tpu.memory_space<semaphore_mem>>
    %275 = tpu.memref_squeeze %274 : memref<1x!tpu.dma_semaphore, #tpu.memory_space<semaphore_mem>> -> memref<!tpu.dma_semaphore, #tpu.memory_space<semaphore_mem>>
    tpu.wait_dma2 semaphore(%275 : memref<!tpu.dma_semaphore, #tpu.memory_space<semaphore_mem>>) src(%272 : memref<1x16xf32, #tpu.memory_space<any>>) dst(%273 : memref<1x16xf32, #tpu.memory_space<vmem>>)
    %c29_i32_212 = arith.constant 29 : i32
    %c0_i32_213 = arith.constant 0 : i32
    %276 = tpu.memref_slice %arg2[%145, %c0_i32_213] : memref<50x16xf32, #tpu.memory_space<any>> -> memref<1x16xf32, #tpu.memory_space<any>>
    %c29_i32_214 = arith.constant 29 : i32
    %c0_i32_215 = arith.constant 0 : i32
    %277 = tpu.memref_slice %arg9[%c29_i32_214, %c0_i32_215] : memref<32x16xf32, #tpu.memory_space<vmem>> -> memref<1x16xf32, #tpu.memory_space<vmem>>
    %278 = tpu.memref_slice %arg10[%c29_i32_212] : memref<32x!tpu.dma_semaphore, #tpu.memory_space<semaphore_mem>> -> memref<1x!tpu.dma_semaphore, #tpu.memory_space<semaphore_mem>>
    %279 = tpu.memref_squeeze %278 : memref<1x!tpu.dma_semaphore, #tpu.memory_space<semaphore_mem>> -> memref<!tpu.dma_semaphore, #tpu.memory_space<semaphore_mem>>
    tpu.wait_dma2 semaphore(%279 : memref<!tpu.dma_semaphore, #tpu.memory_space<semaphore_mem>>) src(%276 : memref<1x16xf32, #tpu.memory_space<any>>) dst(%277 : memref<1x16xf32, #tpu.memory_space<vmem>>)
    %c30_i32_216 = arith.constant 30 : i32
    %c0_i32_217 = arith.constant 0 : i32
    %280 = tpu.memref_slice %arg2[%150, %c0_i32_217] : memref<50x16xf32, #tpu.memory_space<any>> -> memref<1x16xf32, #tpu.memory_space<any>>
    %c30_i32_218 = arith.constant 30 : i32
    %c0_i32_219 = arith.constant 0 : i32
    %281 = tpu.memref_slice %arg9[%c30_i32_218, %c0_i32_219] : memref<32x16xf32, #tpu.memory_space<vmem>> -> memref<1x16xf32, #tpu.memory_space<vmem>>
    %282 = tpu.memref_slice %arg10[%c30_i32_216] : memref<32x!tpu.dma_semaphore, #tpu.memory_space<semaphore_mem>> -> memref<1x!tpu.dma_semaphore, #tpu.memory_space<semaphore_mem>>
    %283 = tpu.memref_squeeze %282 : memref<1x!tpu.dma_semaphore, #tpu.memory_space<semaphore_mem>> -> memref<!tpu.dma_semaphore, #tpu.memory_space<semaphore_mem>>
    tpu.wait_dma2 semaphore(%283 : memref<!tpu.dma_semaphore, #tpu.memory_space<semaphore_mem>>) src(%280 : memref<1x16xf32, #tpu.memory_space<any>>) dst(%281 : memref<1x16xf32, #tpu.memory_space<vmem>>)
    %c31_i32_220 = arith.constant 31 : i32
    %c0_i32_221 = arith.constant 0 : i32
    %284 = tpu.memref_slice %arg2[%155, %c0_i32_221] : memref<50x16xf32, #tpu.memory_space<any>> -> memref<1x16xf32, #tpu.memory_space<any>>
    %c31_i32_222 = arith.constant 31 : i32
    %c0_i32_223 = arith.constant 0 : i32
    %285 = tpu.memref_slice %arg9[%c31_i32_222, %c0_i32_223] : memref<32x16xf32, #tpu.memory_space<vmem>> -> memref<1x16xf32, #tpu.memory_space<vmem>>
    %286 = tpu.memref_slice %arg10[%c31_i32_220] : memref<32x!tpu.dma_semaphore, #tpu.memory_space<semaphore_mem>> -> memref<1x!tpu.dma_semaphore, #tpu.memory_space<semaphore_mem>>
    %287 = tpu.memref_squeeze %286 : memref<1x!tpu.dma_semaphore, #tpu.memory_space<semaphore_mem>> -> memref<!tpu.dma_semaphore, #tpu.memory_space<semaphore_mem>>
    tpu.wait_dma2 semaphore(%287 : memref<!tpu.dma_semaphore, #tpu.memory_space<semaphore_mem>>) src(%284 : memref<1x16xf32, #tpu.memory_space<any>>) dst(%285 : memref<1x16xf32, #tpu.memory_space<vmem>>)
    %c0_224 = arith.constant 0 : index
    %c0_225 = arith.constant 0 : index
    %288 = vector.load %arg9[%c0_224, %c0_225] : memref<32x16xf32, #tpu.memory_space<vmem>>, vector<32x16xf32>
    %c0_226 = arith.constant 0 : index
    %c0_227 = arith.constant 0 : index
    %289 = vector.load %arg3[%c0_226, %c0_227] : memref<16x128xf32, #tpu.memory_space<vmem>>, vector<16x128xf32>
    %cst = arith.constant dense<0.000000e+00> : vector<32x128xf32>
    %290 = tpu.matmul %288, %289, %cst {dimension_numbers = #tpu.dot_dimension_numbers<[1], [0], [0], [1], [0, 0, 1, 1], [], []>} : vector<32x16xf32>, vector<16x128xf32>, vector<32x128xf32> -> vector<32x128xf32>
    %c0_228 = arith.constant 0 : index
    %c0_229 = arith.constant 0 : index
    %291 = vector.load %arg5[%c0_228, %c0_229] : memref<1x128xf32, #tpu.memory_space<vmem>>, vector<1x128xf32>
    %292 = vector.broadcast %291 : vector<1x128xf32> to vector<32x128xf32>
    %293 = arith.addf %290, %292 : vector<32x128xf32>
    %c0_230 = arith.constant 0 : index
    %c0_231 = arith.constant 0 : index
    %294 = vector.load %arg4[%c0_230, %c0_231] : memref<32x128xf32, #tpu.memory_space<vmem>>, vector<32x128xf32>
    %cst_232 = arith.constant 0.000000e+00 : f32
    %295 = vector.broadcast %cst_232 : f32 to vector<4x32xf32>
    %cst_233 = arith.constant 0.000000e+00 : f32
    %296 = vector.broadcast %cst_233 : f32 to vector<4x32xf32>
    %297 = vector.extract_strided_slice %293 {offsets = [0, 0], sizes = [4, 128], strides = [1, 1]} : vector<32x128xf32> to vector<4x128xf32>
    %cst_234 = arith.constant dense<0.000000e+00> : vector<4x128xf32>
    %298 = tpu.matmul %295, %294, %cst_234 {dimension_numbers = #tpu.dot_dimension_numbers<[1], [0], [0], [1], [0, 0, 1, 1], [], []>} : vector<4x32xf32>, vector<32x128xf32>, vector<4x128xf32> -> vector<4x128xf32>
    %299 = arith.addf %297, %298 : vector<4x128xf32>
    %300 = arith.negf %299 : vector<4x128xf32>
    %301 = math.exp %300 : vector<4x128xf32>
    %cst_235 = arith.constant 1.000000e+00 : f32
    %302 = vector.broadcast %cst_235 : f32 to vector<4x128xf32>
    %303 = arith.addf %302, %301 : vector<4x128xf32>
    %304 = arith.divf %302, %303 : vector<4x128xf32>
    %305 = math.tanh %299 : vector<4x128xf32>
    %306 = vector.extract_strided_slice %304 {offsets = [0, 0], sizes = [4, 32], strides = [1, 1]} : vector<4x128xf32> to vector<4x32xf32>
    %307 = vector.extract_strided_slice %304 {offsets = [0, 32], sizes = [4, 32], strides = [1, 1]} : vector<4x128xf32> to vector<4x32xf32>
    %308 = vector.extract_strided_slice %305 {offsets = [0, 64], sizes = [4, 32], strides = [1, 1]} : vector<4x128xf32> to vector<4x32xf32>
    %309 = vector.extract_strided_slice %304 {offsets = [0, 96], sizes = [4, 32], strides = [1, 1]} : vector<4x128xf32> to vector<4x32xf32>
    %310 = arith.mulf %307, %296 : vector<4x32xf32>
    %311 = arith.mulf %306, %308 : vector<4x32xf32>
    %312 = arith.addf %310, %311 : vector<4x32xf32>
    %313 = math.tanh %312 : vector<4x32xf32>
    %314 = arith.mulf %309, %313 : vector<4x32xf32>
    %cst_236 = arith.constant dense<0.000000e+00> : vector<32xf32>
    %315 = vector.multi_reduction <add>, %314, %cst_236 [0] : vector<4x32xf32> to vector<32xf32>
    %316 = vector.shape_cast %315 : vector<32xf32> to vector<1x32xf32>
    %cst_237 = arith.constant 4.000000e+00 : f32
    %317 = vector.broadcast %cst_237 : f32 to vector<1x32xf32>
    %318 = arith.divf %316, %317 : vector<1x32xf32>
    %cst_238 = arith.constant dense<0xFF800000> : vector<32xf32>
    %319 = vector.multi_reduction <maximumf>, %314, %cst_238 [0] : vector<4x32xf32> to vector<32xf32>
    %320 = vector.shape_cast %319 : vector<32xf32> to vector<1x32xf32>
    %321 = vector.extract_strided_slice %314 {offsets = [3, 0], sizes = [1, 32], strides = [1, 1]} : vector<4x32xf32> to vector<1x32xf32>
    %322 = vector.extract_strided_slice %293 {offsets = [4, 0], sizes = [4, 128], strides = [1, 1]} : vector<32x128xf32> to vector<4x128xf32>
    %cst_239 = arith.constant dense<0.000000e+00> : vector<4x128xf32>
    %323 = tpu.matmul %314, %294, %cst_239 {dimension_numbers = #tpu.dot_dimension_numbers<[1], [0], [0], [1], [0, 0, 1, 1], [], []>} : vector<4x32xf32>, vector<32x128xf32>, vector<4x128xf32> -> vector<4x128xf32>
    %324 = arith.addf %322, %323 : vector<4x128xf32>
    %325 = arith.negf %324 : vector<4x128xf32>
    %326 = math.exp %325 : vector<4x128xf32>
    %cst_240 = arith.constant 1.000000e+00 : f32
    %327 = vector.broadcast %cst_240 : f32 to vector<4x128xf32>
    %328 = arith.addf %327, %326 : vector<4x128xf32>
    %329 = arith.divf %327, %328 : vector<4x128xf32>
    %330 = math.tanh %324 : vector<4x128xf32>
    %331 = vector.extract_strided_slice %329 {offsets = [0, 0], sizes = [4, 32], strides = [1, 1]} : vector<4x128xf32> to vector<4x32xf32>
    %332 = vector.extract_strided_slice %329 {offsets = [0, 32], sizes = [4, 32], strides = [1, 1]} : vector<4x128xf32> to vector<4x32xf32>
    %333 = vector.extract_strided_slice %330 {offsets = [0, 64], sizes = [4, 32], strides = [1, 1]} : vector<4x128xf32> to vector<4x32xf32>
    %334 = vector.extract_strided_slice %329 {offsets = [0, 96], sizes = [4, 32], strides = [1, 1]} : vector<4x128xf32> to vector<4x32xf32>
    %335 = arith.mulf %332, %312 : vector<4x32xf32>
    %336 = arith.mulf %331, %333 : vector<4x32xf32>
    %337 = arith.addf %335, %336 : vector<4x32xf32>
    %338 = math.tanh %337 : vector<4x32xf32>
    %339 = arith.mulf %334, %338 : vector<4x32xf32>
    %cst_241 = arith.constant dense<0.000000e+00> : vector<32xf32>
    %340 = vector.multi_reduction <add>, %339, %cst_241 [0] : vector<4x32xf32> to vector<32xf32>
    %341 = vector.shape_cast %340 : vector<32xf32> to vector<1x32xf32>
    %cst_242 = arith.constant 4.000000e+00 : f32
    %342 = vector.broadcast %cst_242 : f32 to vector<1x32xf32>
    %343 = arith.divf %341, %342 : vector<1x32xf32>
    %cst_243 = arith.constant dense<0xFF800000> : vector<32xf32>
    %344 = vector.multi_reduction <maximumf>, %339, %cst_243 [0] : vector<4x32xf32> to vector<32xf32>
    %345 = vector.shape_cast %344 : vector<32xf32> to vector<1x32xf32>
    %346 = vector.extract_strided_slice %339 {offsets = [3, 0], sizes = [1, 32], strides = [1, 1]} : vector<4x32xf32> to vector<1x32xf32>
    %347 = vector.extract_strided_slice %293 {offsets = [8, 0], sizes = [4, 128], strides = [1, 1]} : vector<32x128xf32> to vector<4x128xf32>
    %cst_244 = arith.constant dense<0.000000e+00> : vector<4x128xf32>
    %348 = tpu.matmul %339, %294, %cst_244 {dimension_numbers = #tpu.dot_dimension_numbers<[1], [0], [0], [1], [0, 0, 1, 1], [], []>} : vector<4x32xf32>, vector<32x128xf32>, vector<4x128xf32> -> vector<4x128xf32>
    %349 = arith.addf %347, %348 : vector<4x128xf32>
    %350 = arith.negf %349 : vector<4x128xf32>
    %351 = math.exp %350 : vector<4x128xf32>
    %cst_245 = arith.constant 1.000000e+00 : f32
    %352 = vector.broadcast %cst_245 : f32 to vector<4x128xf32>
    %353 = arith.addf %352, %351 : vector<4x128xf32>
    %354 = arith.divf %352, %353 : vector<4x128xf32>
    %355 = math.tanh %349 : vector<4x128xf32>
    %356 = vector.extract_strided_slice %354 {offsets = [0, 0], sizes = [4, 32], strides = [1, 1]} : vector<4x128xf32> to vector<4x32xf32>
    %357 = vector.extract_strided_slice %354 {offsets = [0, 32], sizes = [4, 32], strides = [1, 1]} : vector<4x128xf32> to vector<4x32xf32>
    %358 = vector.extract_strided_slice %355 {offsets = [0, 64], sizes = [4, 32], strides = [1, 1]} : vector<4x128xf32> to vector<4x32xf32>
    %359 = vector.extract_strided_slice %354 {offsets = [0, 96], sizes = [4, 32], strides = [1, 1]} : vector<4x128xf32> to vector<4x32xf32>
    %360 = arith.mulf %357, %337 : vector<4x32xf32>
    %361 = arith.mulf %356, %358 : vector<4x32xf32>
    %362 = arith.addf %360, %361 : vector<4x32xf32>
    %363 = math.tanh %362 : vector<4x32xf32>
    %364 = arith.mulf %359, %363 : vector<4x32xf32>
    %cst_246 = arith.constant dense<0.000000e+00> : vector<32xf32>
    %365 = vector.multi_reduction <add>, %364, %cst_246 [0] : vector<4x32xf32> to vector<32xf32>
    %366 = vector.shape_cast %365 : vector<32xf32> to vector<1x32xf32>
    %cst_247 = arith.constant 4.000000e+00 : f32
    %367 = vector.broadcast %cst_247 : f32 to vector<1x32xf32>
    %368 = arith.divf %366, %367 : vector<1x32xf32>
    %cst_248 = arith.constant dense<0xFF800000> : vector<32xf32>
    %369 = vector.multi_reduction <maximumf>, %364, %cst_248 [0] : vector<4x32xf32> to vector<32xf32>
    %370 = vector.shape_cast %369 : vector<32xf32> to vector<1x32xf32>
    %371 = vector.extract_strided_slice %364 {offsets = [3, 0], sizes = [1, 32], strides = [1, 1]} : vector<4x32xf32> to vector<1x32xf32>
    %372 = vector.extract_strided_slice %293 {offsets = [12, 0], sizes = [4, 128], strides = [1, 1]} : vector<32x128xf32> to vector<4x128xf32>
    %cst_249 = arith.constant dense<0.000000e+00> : vector<4x128xf32>
    %373 = tpu.matmul %364, %294, %cst_249 {dimension_numbers = #tpu.dot_dimension_numbers<[1], [0], [0], [1], [0, 0, 1, 1], [], []>} : vector<4x32xf32>, vector<32x128xf32>, vector<4x128xf32> -> vector<4x128xf32>
    %374 = arith.addf %372, %373 : vector<4x128xf32>
    %375 = arith.negf %374 : vector<4x128xf32>
    %376 = math.exp %375 : vector<4x128xf32>
    %cst_250 = arith.constant 1.000000e+00 : f32
    %377 = vector.broadcast %cst_250 : f32 to vector<4x128xf32>
    %378 = arith.addf %377, %376 : vector<4x128xf32>
    %379 = arith.divf %377, %378 : vector<4x128xf32>
    %380 = math.tanh %374 : vector<4x128xf32>
    %381 = vector.extract_strided_slice %379 {offsets = [0, 0], sizes = [4, 32], strides = [1, 1]} : vector<4x128xf32> to vector<4x32xf32>
    %382 = vector.extract_strided_slice %379 {offsets = [0, 32], sizes = [4, 32], strides = [1, 1]} : vector<4x128xf32> to vector<4x32xf32>
    %383 = vector.extract_strided_slice %380 {offsets = [0, 64], sizes = [4, 32], strides = [1, 1]} : vector<4x128xf32> to vector<4x32xf32>
    %384 = vector.extract_strided_slice %379 {offsets = [0, 96], sizes = [4, 32], strides = [1, 1]} : vector<4x128xf32> to vector<4x32xf32>
    %385 = arith.mulf %382, %362 : vector<4x32xf32>
    %386 = arith.mulf %381, %383 : vector<4x32xf32>
    %387 = arith.addf %385, %386 : vector<4x32xf32>
    %388 = math.tanh %387 : vector<4x32xf32>
    %389 = arith.mulf %384, %388 : vector<4x32xf32>
    %cst_251 = arith.constant dense<0.000000e+00> : vector<32xf32>
    %390 = vector.multi_reduction <add>, %389, %cst_251 [0] : vector<4x32xf32> to vector<32xf32>
    %391 = vector.shape_cast %390 : vector<32xf32> to vector<1x32xf32>
    %cst_252 = arith.constant 4.000000e+00 : f32
    %392 = vector.broadcast %cst_252 : f32 to vector<1x32xf32>
    %393 = arith.divf %391, %392 : vector<1x32xf32>
    %cst_253 = arith.constant dense<0xFF800000> : vector<32xf32>
    %394 = vector.multi_reduction <maximumf>, %389, %cst_253 [0] : vector<4x32xf32> to vector<32xf32>
    %395 = vector.shape_cast %394 : vector<32xf32> to vector<1x32xf32>
    %396 = vector.extract_strided_slice %389 {offsets = [3, 0], sizes = [1, 32], strides = [1, 1]} : vector<4x32xf32> to vector<1x32xf32>
    %397 = vector.extract_strided_slice %293 {offsets = [16, 0], sizes = [4, 128], strides = [1, 1]} : vector<32x128xf32> to vector<4x128xf32>
    %cst_254 = arith.constant dense<0.000000e+00> : vector<4x128xf32>
    %398 = tpu.matmul %389, %294, %cst_254 {dimension_numbers = #tpu.dot_dimension_numbers<[1], [0], [0], [1], [0, 0, 1, 1], [], []>} : vector<4x32xf32>, vector<32x128xf32>, vector<4x128xf32> -> vector<4x128xf32>
    %399 = arith.addf %397, %398 : vector<4x128xf32>
    %400 = arith.negf %399 : vector<4x128xf32>
    %401 = math.exp %400 : vector<4x128xf32>
    %cst_255 = arith.constant 1.000000e+00 : f32
    %402 = vector.broadcast %cst_255 : f32 to vector<4x128xf32>
    %403 = arith.addf %402, %401 : vector<4x128xf32>
    %404 = arith.divf %402, %403 : vector<4x128xf32>
    %405 = math.tanh %399 : vector<4x128xf32>
    %406 = vector.extract_strided_slice %404 {offsets = [0, 0], sizes = [4, 32], strides = [1, 1]} : vector<4x128xf32> to vector<4x32xf32>
    %407 = vector.extract_strided_slice %404 {offsets = [0, 32], sizes = [4, 32], strides = [1, 1]} : vector<4x128xf32> to vector<4x32xf32>
    %408 = vector.extract_strided_slice %405 {offsets = [0, 64], sizes = [4, 32], strides = [1, 1]} : vector<4x128xf32> to vector<4x32xf32>
    %409 = vector.extract_strided_slice %404 {offsets = [0, 96], sizes = [4, 32], strides = [1, 1]} : vector<4x128xf32> to vector<4x32xf32>
    %410 = arith.mulf %407, %387 : vector<4x32xf32>
    %411 = arith.mulf %406, %408 : vector<4x32xf32>
    %412 = arith.addf %410, %411 : vector<4x32xf32>
    %413 = math.tanh %412 : vector<4x32xf32>
    %414 = arith.mulf %409, %413 : vector<4x32xf32>
    %cst_256 = arith.constant dense<0.000000e+00> : vector<32xf32>
    %415 = vector.multi_reduction <add>, %414, %cst_256 [0] : vector<4x32xf32> to vector<32xf32>
    %416 = vector.shape_cast %415 : vector<32xf32> to vector<1x32xf32>
    %cst_257 = arith.constant 4.000000e+00 : f32
    %417 = vector.broadcast %cst_257 : f32 to vector<1x32xf32>
    %418 = arith.divf %416, %417 : vector<1x32xf32>
    %cst_258 = arith.constant dense<0xFF800000> : vector<32xf32>
    %419 = vector.multi_reduction <maximumf>, %414, %cst_258 [0] : vector<4x32xf32> to vector<32xf32>
    %420 = vector.shape_cast %419 : vector<32xf32> to vector<1x32xf32>
    %421 = vector.extract_strided_slice %414 {offsets = [3, 0], sizes = [1, 32], strides = [1, 1]} : vector<4x32xf32> to vector<1x32xf32>
    %422 = vector.extract_strided_slice %293 {offsets = [20, 0], sizes = [4, 128], strides = [1, 1]} : vector<32x128xf32> to vector<4x128xf32>
    %cst_259 = arith.constant dense<0.000000e+00> : vector<4x128xf32>
    %423 = tpu.matmul %414, %294, %cst_259 {dimension_numbers = #tpu.dot_dimension_numbers<[1], [0], [0], [1], [0, 0, 1, 1], [], []>} : vector<4x32xf32>, vector<32x128xf32>, vector<4x128xf32> -> vector<4x128xf32>
    %424 = arith.addf %422, %423 : vector<4x128xf32>
    %425 = arith.negf %424 : vector<4x128xf32>
    %426 = math.exp %425 : vector<4x128xf32>
    %cst_260 = arith.constant 1.000000e+00 : f32
    %427 = vector.broadcast %cst_260 : f32 to vector<4x128xf32>
    %428 = arith.addf %427, %426 : vector<4x128xf32>
    %429 = arith.divf %427, %428 : vector<4x128xf32>
    %430 = math.tanh %424 : vector<4x128xf32>
    %431 = vector.extract_strided_slice %429 {offsets = [0, 0], sizes = [4, 32], strides = [1, 1]} : vector<4x128xf32> to vector<4x32xf32>
    %432 = vector.extract_strided_slice %429 {offsets = [0, 32], sizes = [4, 32], strides = [1, 1]} : vector<4x128xf32> to vector<4x32xf32>
    %433 = vector.extract_strided_slice %430 {offsets = [0, 64], sizes = [4, 32], strides = [1, 1]} : vector<4x128xf32> to vector<4x32xf32>
    %434 = vector.extract_strided_slice %429 {offsets = [0, 96], sizes = [4, 32], strides = [1, 1]} : vector<4x128xf32> to vector<4x32xf32>
    %435 = arith.mulf %432, %412 : vector<4x32xf32>
    %436 = arith.mulf %431, %433 : vector<4x32xf32>
    %437 = arith.addf %435, %436 : vector<4x32xf32>
    %438 = math.tanh %437 : vector<4x32xf32>
    %439 = arith.mulf %434, %438 : vector<4x32xf32>
    %cst_261 = arith.constant dense<0.000000e+00> : vector<32xf32>
    %440 = vector.multi_reduction <add>, %439, %cst_261 [0] : vector<4x32xf32> to vector<32xf32>
    %441 = vector.shape_cast %440 : vector<32xf32> to vector<1x32xf32>
    %cst_262 = arith.constant 4.000000e+00 : f32
    %442 = vector.broadcast %cst_262 : f32 to vector<1x32xf32>
    %443 = arith.divf %441, %442 : vector<1x32xf32>
    %cst_263 = arith.constant dense<0xFF800000> : vector<32xf32>
    %444 = vector.multi_reduction <maximumf>, %439, %cst_263 [0] : vector<4x32xf32> to vector<32xf32>
    %445 = vector.shape_cast %444 : vector<32xf32> to vector<1x32xf32>
    %446 = vector.extract_strided_slice %439 {offsets = [3, 0], sizes = [1, 32], strides = [1, 1]} : vector<4x32xf32> to vector<1x32xf32>
    %447 = vector.extract_strided_slice %293 {offsets = [24, 0], sizes = [4, 128], strides = [1, 1]} : vector<32x128xf32> to vector<4x128xf32>
    %cst_264 = arith.constant dense<0.000000e+00> : vector<4x128xf32>
    %448 = tpu.matmul %439, %294, %cst_264 {dimension_numbers = #tpu.dot_dimension_numbers<[1], [0], [0], [1], [0, 0, 1, 1], [], []>} : vector<4x32xf32>, vector<32x128xf32>, vector<4x128xf32> -> vector<4x128xf32>
    %449 = arith.addf %447, %448 : vector<4x128xf32>
    %450 = arith.negf %449 : vector<4x128xf32>
    %451 = math.exp %450 : vector<4x128xf32>
    %cst_265 = arith.constant 1.000000e+00 : f32
    %452 = vector.broadcast %cst_265 : f32 to vector<4x128xf32>
    %453 = arith.addf %452, %451 : vector<4x128xf32>
    %454 = arith.divf %452, %453 : vector<4x128xf32>
    %455 = math.tanh %449 : vector<4x128xf32>
    %456 = vector.extract_strided_slice %454 {offsets = [0, 0], sizes = [4, 32], strides = [1, 1]} : vector<4x128xf32> to vector<4x32xf32>
    %457 = vector.extract_strided_slice %454 {offsets = [0, 32], sizes = [4, 32], strides = [1, 1]} : vector<4x128xf32> to vector<4x32xf32>
    %458 = vector.extract_strided_slice %455 {offsets = [0, 64], sizes = [4, 32], strides = [1, 1]} : vector<4x128xf32> to vector<4x32xf32>
    %459 = vector.extract_strided_slice %454 {offsets = [0, 96], sizes = [4, 32], strides = [1, 1]} : vector<4x128xf32> to vector<4x32xf32>
    %460 = arith.mulf %457, %437 : vector<4x32xf32>
    %461 = arith.mulf %456, %458 : vector<4x32xf32>
    %462 = arith.addf %460, %461 : vector<4x32xf32>
    %463 = math.tanh %462 : vector<4x32xf32>
    %464 = arith.mulf %459, %463 : vector<4x32xf32>
    %cst_266 = arith.constant dense<0.000000e+00> : vector<32xf32>
    %465 = vector.multi_reduction <add>, %464, %cst_266 [0] : vector<4x32xf32> to vector<32xf32>
    %466 = vector.shape_cast %465 : vector<32xf32> to vector<1x32xf32>
    %cst_267 = arith.constant 4.000000e+00 : f32
    %467 = vector.broadcast %cst_267 : f32 to vector<1x32xf32>
    %468 = arith.divf %466, %467 : vector<1x32xf32>
    %cst_268 = arith.constant dense<0xFF800000> : vector<32xf32>
    %469 = vector.multi_reduction <maximumf>, %464, %cst_268 [0] : vector<4x32xf32> to vector<32xf32>
    %470 = vector.shape_cast %469 : vector<32xf32> to vector<1x32xf32>
    %471 = vector.extract_strided_slice %464 {offsets = [3, 0], sizes = [1, 32], strides = [1, 1]} : vector<4x32xf32> to vector<1x32xf32>
    %472 = vector.extract_strided_slice %293 {offsets = [28, 0], sizes = [4, 128], strides = [1, 1]} : vector<32x128xf32> to vector<4x128xf32>
    %cst_269 = arith.constant dense<0.000000e+00> : vector<4x128xf32>
    %473 = tpu.matmul %464, %294, %cst_269 {dimension_numbers = #tpu.dot_dimension_numbers<[1], [0], [0], [1], [0, 0, 1, 1], [], []>} : vector<4x32xf32>, vector<32x128xf32>, vector<4x128xf32> -> vector<4x128xf32>
    %474 = arith.addf %472, %473 : vector<4x128xf32>
    %475 = arith.negf %474 : vector<4x128xf32>
    %476 = math.exp %475 : vector<4x128xf32>
    %cst_270 = arith.constant 1.000000e+00 : f32
    %477 = vector.broadcast %cst_270 : f32 to vector<4x128xf32>
    %478 = arith.addf %477, %476 : vector<4x128xf32>
    %479 = arith.divf %477, %478 : vector<4x128xf32>
    %480 = math.tanh %474 : vector<4x128xf32>
    %481 = vector.extract_strided_slice %479 {offsets = [0, 0], sizes = [4, 32], strides = [1, 1]} : vector<4x128xf32> to vector<4x32xf32>
    %482 = vector.extract_strided_slice %479 {offsets = [0, 32], sizes = [4, 32], strides = [1, 1]} : vector<4x128xf32> to vector<4x32xf32>
    %483 = vector.extract_strided_slice %480 {offsets = [0, 64], sizes = [4, 32], strides = [1, 1]} : vector<4x128xf32> to vector<4x32xf32>
    %484 = vector.extract_strided_slice %479 {offsets = [0, 96], sizes = [4, 32], strides = [1, 1]} : vector<4x128xf32> to vector<4x32xf32>
    %485 = arith.mulf %482, %462 : vector<4x32xf32>
    %486 = arith.mulf %481, %483 : vector<4x32xf32>
    %487 = arith.addf %485, %486 : vector<4x32xf32>
    %488 = math.tanh %487 : vector<4x32xf32>
    %489 = arith.mulf %484, %488 : vector<4x32xf32>
    %cst_271 = arith.constant dense<0.000000e+00> : vector<32xf32>
    %490 = vector.multi_reduction <add>, %489, %cst_271 [0] : vector<4x32xf32> to vector<32xf32>
    %491 = vector.shape_cast %490 : vector<32xf32> to vector<1x32xf32>
    %cst_272 = arith.constant 4.000000e+00 : f32
    %492 = vector.broadcast %cst_272 : f32 to vector<1x32xf32>
    %493 = arith.divf %491, %492 : vector<1x32xf32>
    %cst_273 = arith.constant dense<0xFF800000> : vector<32xf32>
    %494 = vector.multi_reduction <maximumf>, %489, %cst_273 [0] : vector<4x32xf32> to vector<32xf32>
    %495 = vector.shape_cast %494 : vector<32xf32> to vector<1x32xf32>
    %496 = vector.extract_strided_slice %489 {offsets = [3, 0], sizes = [1, 32], strides = [1, 1]} : vector<4x32xf32> to vector<1x32xf32>
    %497 = tpu.concatenate %318, %343, %368, %393, %418, %443, %468, %493 in 0 : vector<1x32xf32>, vector<1x32xf32>, vector<1x32xf32>, vector<1x32xf32>, vector<1x32xf32>, vector<1x32xf32>, vector<1x32xf32>, vector<1x32xf32> -> vector<8x32xf32>
    %498 = tpu.concatenate %320, %345, %370, %395, %420, %445, %470, %495 in 0 : vector<1x32xf32>, vector<1x32xf32>, vector<1x32xf32>, vector<1x32xf32>, vector<1x32xf32>, vector<1x32xf32>, vector<1x32xf32>, vector<1x32xf32> -> vector<8x32xf32>
    %499 = tpu.concatenate %321, %346, %371, %396, %421, %446, %471, %496 in 0 : vector<1x32xf32>, vector<1x32xf32>, vector<1x32xf32>, vector<1x32xf32>, vector<1x32xf32>, vector<1x32xf32>, vector<1x32xf32>, vector<1x32xf32> -> vector<8x32xf32>
    %500 = tpu.concatenate %497, %498, %499 in 1 : vector<8x32xf32>, vector<8x32xf32>, vector<8x32xf32> -> vector<8x96xf32>
    %c0_274 = arith.constant 0 : index
    %c0_275 = arith.constant 0 : index
    %501 = vector.load %arg6[%c0_274, %c0_275] : memref<96x4xf32, #tpu.memory_space<vmem>>, vector<96x4xf32>
    %cst_276 = arith.constant dense<0.000000e+00> : vector<8x4xf32>
    %502 = tpu.matmul %500, %501, %cst_276 {dimension_numbers = #tpu.dot_dimension_numbers<[1], [0], [0], [1], [0, 0, 1, 1], [], []>} : vector<8x96xf32>, vector<96x4xf32>, vector<8x4xf32> -> vector<8x4xf32>
    %c0_277 = arith.constant 0 : index
    %c0_278 = arith.constant 0 : index
    %503 = vector.load %arg7[%c0_277, %c0_278] : memref<1x4xf32, #tpu.memory_space<vmem>>, vector<1x4xf32>
    %504 = vector.broadcast %503 : vector<1x4xf32> to vector<8x4xf32>
    %505 = arith.addf %502, %504 : vector<8x4xf32>
    %cst_279 = arith.constant dense<0xFF800000> : vector<8xf32>
    %506 = vector.multi_reduction <maximumf>, %505, %cst_279 [1] : vector<8x4xf32> to vector<8xf32>
    %507 = vector.shape_cast %506 : vector<8xf32> to vector<8x1xf32>
    %508 = vector.broadcast %507 : vector<8x1xf32> to vector<8x4xf32>
    %509 = arith.subf %505, %508 : vector<8x4xf32>
    %510 = math.exp %509 : vector<8x4xf32>
    %cst_280 = arith.constant dense<0.000000e+00> : vector<8xf32>
    %511 = vector.multi_reduction <add>, %510, %cst_280 [1] : vector<8x4xf32> to vector<8xf32>
    %512 = vector.shape_cast %511 : vector<8xf32> to vector<8x1xf32>
    %513 = vector.broadcast %512 : vector<8x1xf32> to vector<8x4xf32>
    %514 = arith.divf %510, %513 : vector<8x4xf32>
    %c0_281 = arith.constant 0 : index
    %c0_282 = arith.constant 0 : index
    %515 = vector.load %arg8[%c0_281, %c0_282] : memref<8x4xf32, #tpu.memory_space<vmem>>, vector<8x4xf32>
    tpu.vector_store %arg8[%c0_281, %c0_282], %514 {strides = array<i32>} : memref<8x4xf32, #tpu.memory_space<vmem>>, vector<8x4xf32>,
    return
  }
  func.func @transform_1(%arg0: i32, %arg1: memref<32xi32, #tpu.memory_space<smem>>) -> (i32, i32) {
    %c0_i32 = arith.constant 0 : i32
    %c0_i32_0 = arith.constant 0 : i32
    %c0_i32_1 = arith.constant 0 : i32
    return %c0_i32, %c0_i32_0 : i32, i32
  }
  func.func @transform_2(%arg0: i32, %arg1: memref<32xi32, #tpu.memory_space<smem>>) -> (i32, i32) {
    %c0_i32 = arith.constant 0 : i32
    %c0_i32_0 = arith.constant 0 : i32
    %c0_i32_1 = arith.constant 0 : i32
    return %c0_i32, %c0_i32_0 : i32, i32
  }
  func.func @transform_3(%arg0: i32, %arg1: memref<32xi32, #tpu.memory_space<smem>>) -> (i32, i32) {
    %c0_i32 = arith.constant 0 : i32
    %c0_i32_0 = arith.constant 0 : i32
    %c0_i32_1 = arith.constant 0 : i32
    return %c0_i32, %c0_i32_0 : i32, i32
  }
  func.func @transform_4(%arg0: i32, %arg1: memref<32xi32, #tpu.memory_space<smem>>) -> (i32, i32) {
    %c0_i32 = arith.constant 0 : i32
    %c0_i32_0 = arith.constant 0 : i32
    %c0_i32_1 = arith.constant 0 : i32
    return %c0_i32, %c0_i32_0 : i32, i32
  }
  func.func @transform_5(%arg0: i32, %arg1: memref<32xi32, #tpu.memory_space<smem>>) -> (i32, i32) {
    %c0_i32 = arith.constant 0 : i32
    %c0_i32_0 = arith.constant 0 : i32
    %c0_i32_1 = arith.constant 0 : i32
    return %c0_i32, %c0_i32_0 : i32, i32
  }
  func.func @transform_6(%arg0: i32, %arg1: memref<32xi32, #tpu.memory_space<smem>>) -> (i32, i32) {
    %c0_i32 = arith.constant 0 : i32
    %c0_i32_0 = arith.constant 0 : i32
    %c0_i32_1 = arith.constant 0 : i32
    return %c0_i32, %c0_i32_0 : i32, i32
  }
}

</mosaic_0001>

<bundles_post_ra>
// kernel: model_forward.1
= control target key start
LH: loop header
LB: loop body
LE: loop exit
PB: predicated region body
PF: predicated region fallthrough
CT: control target
= control target key end

     0   :  { %s4383_s0 = inlined_call_operand.vmem [shape: s32[32], index: 0, kind: input, shape index: {}]   ;;  %s4384_s1 = inlined_call_operand.vmem [shape: f32[50,16], index: 1, kind: input, shape index: {}]   ;;  %s4385_s2 = inlined_call_operand.vmem [shape: f32[16,128], index: 2, kind: input, shape index: {}]   ;;  %s4386_s3 = inlined_call_operand.vmem [shape: f32[32,128], index: 3, kind: input, shape index: {}]   ;;  %s4387_s4 = inlined_call_operand.vmem [shape: f32[1,128], index: 4, kind: input, shape index: {}]   ;;  %s4388_s5 = inlined_call_operand.vmem [shape: f32[96,4], index: 5, kind: input, shape index: {}]   ;;  %s4389_s6 = inlined_call_operand.vmem [shape: f32[1,4], index: 6, kind: input, shape index: {}]   ;;  %s4390_s7 = inlined_call_operand.vmem [shape: f32[8,4], index: 7, kind: output, shape index: {}]  }
   0x1   :  { %s12_s26 = sshll.u32 %s4383_s0, 4  ;;  %s13_s26 = int_to_ptr.vmem [resolvable:$true] %s12_s26 }
   0x2   :  { %s3884_s27 = scalar_lea.vmem %s13_s26, 16  ;;  %p3889_p1 = scmp.lt.s32.totalorder %s13_s26, %s13_s26 }
   0x3   :  { %p3885_p0 = scmp.ne.s32.totalorder %s13_s26, %s3884_s27  ;;  %p3890_p2 = scmp.lt.s32.totalorder %s3884_s27, %s3884_s27 }
   0x5   :  { %p3891_p3 = por %p3890_p2, %p3889_p1 }
   0x7   :  { %p3892_p4 = pnand %p3891_p3, %p3885_p0 }
   0x9   :  { %3895 = shalt.err (!%p3892_p4)  }
   0xa   :  { %s3962_s28 = smov [#allocation5]  }
   0xb   :  { %15 = dma.vmem_to_smem %s13_s26, 16, %s3962_s28, [#allocation4] }
   0xc   :  { %3896 = dma.done.wait [#allocation4], 16 }
   0xd   :  { %3897 = vsyncadd [#allocation4], 4294967280 }
   0xe   :  { %17 = sfence }
   0xf   :  { %s28_s29 = sld [smem:[#allocation5]] }
  0x15   :  { %s29_s9 = scalar_lea.vmem %s4384_s1, %s28_s29 }
  0x16   :  { %v48_v0 = vld [vmem:[%s29_s9] sm:$0x1] }
  0x17   :  { %49 = vst [vmem:[#allocation2] sm:$0x1] %v48_v0 }
  0x18   :  { %75 = vsyncadd [#allocation3], 16  ;;  %s3541_s0 = sld [smem:[#allocation5 + $0x1]] }
  0x1e   :  { %s77_s12 = scalar_lea.vmem %s4384_s1, %s3541_s0 }
  0x1f   :  { %v98_v1 = vld [vmem:[%s77_s12] sm:$0x1] }
  0x20   :  { %99 = vst [vmem:[#allocation2 + $0x1] sm:$0x1] %v98_v1 }
  0x21   :  { %125 = vsyncadd [#allocation3 + $0x1], 16  ;;  %s3542_s13 = sld [smem:[#allocation5 + $0x2]] }
  0x27   :  { %s127_s16 = scalar_lea.vmem %s4384_s1, %s3542_s13 }
  0x28   :  { %v148_v2 = vld [vmem:[%s127_s16] sm:$0x1] }
  0x29   :  { %149 = vst [vmem:[#allocation2 + $0x2] sm:$0x1] %v148_v2 }
  0x2a   :  { %175 = vsyncadd [#allocation3 + $0x2], 16  ;;  %s3543_s17 = sld [smem:[#allocation5 + $0x3]] }
  0x30   :  { %s177_s20 = scalar_lea.vmem %s4384_s1, %s3543_s17 }
  0x31   :  { %v198_v3 = vld [vmem:[%s177_s20] sm:$0x1] }
  0x32   :  { %199 = vst [vmem:[#allocation2 + $0x3] sm:$0x1] %v198_v3 }
  0x33   :  { %225 = vsyncadd [#allocation3 + $0x3], 16  ;;  %s3544_s21 = sld [smem:[#allocation5 + $0x4]] }
  0x39   :  { %s227_s24 = scalar_lea.vmem %s4384_s1, %s3544_s21 }
  0x3a   :  { %v248_v4 = vld [vmem:[%s227_s24] sm:$0x1] }
  0x3b   :  { %249 = vst [vmem:[#allocation2 + $0x4] sm:$0x1] %v248_v4 }
  0x3c   :  { %275 = vsyncadd [#allocation3 + $0x4], 16  ;;  %s3545_s25 = sld [smem:[#allocation5 + $0x5]] }
  0x42   :  { %s277_s28 = scalar_lea.vmem %s4384_s1, %s3545_s25 }
  0x43   :  { %v298_v5 = vld [vmem:[%s277_s28] sm:$0x1] }
  0x44   :  { %299 = vst [vmem:[#allocation2 + $0x5] sm:$0x1] %v298_v5 }
  0x45   :  { %325 = vsyncadd [#allocation3 + $0x5], 16  ;;  %s3546_s29 = sld [smem:[#allocation5 + $0x6]] }
  0x4b   :  { %s327_s9 = scalar_lea.vmem %s4384_s1, %s3546_s29 }
  0x4c   :  { %v348_v6 = vld [vmem:[%s327_s9] sm:$0x1] }
  0x4d   :  { %349 = vst [vmem:[#allocation2 + $0x6] sm:$0x1] %v348_v6 }
  0x4e   :  { %375 = vsyncadd [#allocation3 + $0x6], 16  ;;  %s3547_s0 = sld [smem:[#allocation5 + $0x7]] }
  0x54   :  { %s377_s12 = scalar_lea.vmem %s4384_s1, %s3547_s0 }
  0x55   :  { %v398_v7 = vld [vmem:[%s377_s12] sm:$0x1] }
  0x56   :  { %399 = vst [vmem:[#allocation2 + $0x7] sm:$0x1] %v398_v7 }
  0x57   :  { %425 = vsyncadd [#allocation3 + $0x7], 16  ;;  %s3548_s13 = sld [smem:[#allocation5 + $0x8]] }
  0x5d   :  { %s427_s16 = scalar_lea.vmem %s4384_s1, %s3548_s13 }
  0x5e   :  { %v448_v8 = vld [vmem:[%s427_s16] sm:$0x1] }
  0x5f   :  { %449 = vst [vmem:[#allocation2 + $0x8] sm:$0x1] %v448_v8 }
  0x60   :  { %475 = vsyncadd [#allocation3 + $0x8], 16  ;;  %s3549_s17 = sld [smem:[#allocation5 + $0x9]] }
  0x66   :  { %s477_s20 = scalar_lea.vmem %s4384_s1, %s3549_s17 }
  0x67   :  { %v498_v9 = vld [vmem:[%s477_s20] sm:$0x1] }
  0x68   :  { %499 = vst [vmem:[#allocation2 + $0x9] sm:$0x1] %v498_v9 }
  0x69   :  { %525 = vsyncadd [#allocation3 + $0x9], 16  ;;  %s3550_s21 = sld [smem:[#allocation5 + $0xa]] }
  0x6f   :  { %s527_s24 = scalar_lea.vmem %s4384_s1, %s3550_s21 }
  0x70   :  { %v548_v10 = vld [vmem:[%s527_s24] sm:$0x1] }
  0x71   :  { %549 = vst [vmem:[#allocation2 + $0xa] sm:$0x1] %v548_v10 }
  0x72   :  { %575 = vsyncadd [#allocation3 + $0xa], 16  ;;  %s3551_s25 = sld [smem:[#allocation5 + $0xb]] }
  0x78   :  { %s577_s28 = scalar_lea.vmem %s4384_s1, %s3551_s25 }
  0x79   :  { %v598_v11 = vld [vmem:[%s577_s28] sm:$0x1] }
  0x7a   :  { %599 = vst [vmem:[#allocation2 + $0xb] sm:$0x1] %v598_v11 }
  0x7b   :  { %625 = vsyncadd [#allocation3 + $0xb], 16  ;;  %s3552_s29 = sld [smem:[#allocation5 + $0xc]] }
  0x81   :  { %s627_s9 = scalar_lea.vmem %s4384_s1, %s3552_s29 }
  0x82   :  { %v648_v12 = vld [vmem:[%s627_s9] sm:$0x1] }
  0x83   :  { %649 = vst [vmem:[#allocation2 + $0xc] sm:$0x1] %v648_v12 }
  0x84   :  { %675 = vsyncadd [#allocation3 + $0xc], 16  ;;  %s3553_s0 = sld [smem:[#allocation5 + $0xd]] }
  0x8a   :  { %s677_s12 = scalar_lea.vmem %s4384_s1, %s3553_s0 }
  0x8b   :  { %v698_v13 = vld [vmem:[%s677_s12] sm:$0x1] }
  0x8c   :  { %699 = vst [vmem:[#allocation2 + $0xd] sm:$0x1] %v698_v13 }
  0x8d   :  { %725 = vsyncadd [#allocation3 + $0xd], 16  ;;  %s3554_s13 = sld [smem:[#allocation5 + $0xe]] }
  0x93   :  { %s727_s16 = scalar_lea.vmem %s4384_s1, %s3554_s13 }
  0x94   :  { %v748_v14 = vld [vmem:[%s727_s16] sm:$0x1] }
  0x95   :  { %749 = vst [vmem:[#allocation2 + $0xe] sm:$0x1] %v748_v14 }
  0x96   :  { %775 = vsyncadd [#allocation3 + $0xe], 16  ;;  %s3555_s17 = sld [smem:[#allocation5 + $0xf]] }
  0x9c   :  { %s777_s20 = scalar_lea.vmem %s4384_s1, %s3555_s17 }
  0x9d   :  { %v798_v15 = vld [vmem:[%s777_s20] sm:$0x1] }
  0x9e   :  { %799 = vst [vmem:[#allocation2 + $0xf] sm:$0x1] %v798_v15 }
  0x9f   :  { %825 = vsyncadd [#allocation3 + $0xf], 16  ;;  %s3556_s21 = sld [smem:[#allocation5 + $0x10]] }
  0xa5   :  { %s827_s24 = scalar_lea.vmem %s4384_s1, %s3556_s21 }
  0xa6   :  { %v848_v16 = vld [vmem:[%s827_s24] sm:$0x1] }
  0xa7   :  { %849 = vst [vmem:[#allocation2 + $0x10] sm:$0x1] %v848_v16 }
  0xa8   :  { %875 = vsyncadd [#allocation3 + $0x10], 16  ;;  %s3557_s25 = sld [smem:[#allocation5 + $0x11]] }
  0xae   :  { %s877_s28 = scalar_lea.vmem %s4384_s1, %s3557_s25 }
  0xaf   :  { %v898_v17 = vld [vmem:[%s877_s28] sm:$0x1] }
  0xb0   :  { %899 = vst [vmem:[#allocation2 + $0x11] sm:$0x1] %v898_v17 }
  0xb1   :  { %925 = vsyncadd [#allocation3 + $0x11], 16  ;;  %s3558_s29 = sld [smem:[#allocation5 + $0x12]] }
  0xb7   :  { %s927_s9 = scalar_lea.vmem %s4384_s1, %s3558_s29 }
  0xb8   :  { %v948_v18 = vld [vmem:[%s927_s9] sm:$0x1] }
  0xb9   :  { %949 = vst [vmem:[#allocation2 + $0x12] sm:$0x1] %v948_v18 }
  0xba   :  { %975 = vsyncadd [#allocation3 + $0x12], 16  ;;  %s3559_s0 = sld [smem:[#allocation5 + $0x13]] }
  0xc0   :  { %s977_s12 = scalar_lea.vmem %s4384_s1, %s3559_s0 }
  0xc1   :  { %v998_v19 = vld [vmem:[%s977_s12] sm:$0x1] }
  0xc2   :  { %999 = vst [vmem:[#allocation2 + $0x13] sm:$0x1] %v998_v19 }
  0xc3   :  { %1025 = vsyncadd [#allocation3 + $0x13], 16  ;;  %s3560_s13 = sld [smem:[#allocation5 + $0x14]] }
  0xc9   :  { %s1027_s16 = scalar_lea.vmem %s4384_s1, %s3560_s13 }
  0xca   :  { %v1048_v20 = vld [vmem:[%s1027_s16] sm:$0x1] }
  0xcb   :  { %1049 = vst [vmem:[#allocation2 + $0x14] sm:$0x1] %v1048_v20 }
  0xcc   :  { %1075 = vsyncadd [#allocation3 + $0x14], 16  ;;  %s3561_s17 = sld [smem:[#allocation5 + $0x15]] }
  0xd2   :  { %s1077_s20 = scalar_lea.vmem %s4384_s1, %s3561_s17 }
  0xd3   :  { %v1098_v21 = vld [vmem:[%s1077_s20] sm:$0x1] }
  0xd4   :  { %1099 = vst [vmem:[#allocation2 + $0x15] sm:$0x1] %v1098_v21 }
  0xd5   :  { %1125 = vsyncadd [#allocation3 + $0x15], 16  ;;  %s3562_s21 = sld [smem:[#allocation5 + $0x16]] }
  0xdb   :  { %s1127_s24 = scalar_lea.vmem %s4384_s1, %s3562_s21 }
  0xdc   :  { %v1148_v22 = vld [vmem:[%s1127_s24] sm:$0x1] }
  0xdd   :  { %1149 = vst [vmem:[#allocation2 + $0x16] sm:$0x1] %v1148_v22 }
  0xde   :  { %1175 = vsyncadd [#allocation3 + $0x16], 16  ;;  %s3563_s25 = sld [smem:[#allocation5 + $0x17]] }
  0xe4   :  { %s1177_s28 = scalar_lea.vmem %s4384_s1, %s3563_s25 }
  0xe5   :  { %v1198_v23 = vld [vmem:[%s1177_s28] sm:$0x1] }
  0xe6   :  { %1199 = vst [vmem:[#allocation2 + $0x17] sm:$0x1] %v1198_v23 }
  0xe7   :  { %1225 = vsyncadd [#allocation3 + $0x17], 16  ;;  %s3564_s29 = sld [smem:[#allocation5 + $0x18]] }
  0xed   :  { %s1227_s9 = scalar_lea.vmem %s4384_s1, %s3564_s29 }
  0xee   :  { %v1248_v24 = vld [vmem:[%s1227_s9] sm:$0x1] }
  0xef   :  { %1249 = vst [vmem:[#allocation2 + $0x18] sm:$0x1] %v1248_v24 }
  0xf0   :  { %1275 = vsyncadd [#allocation3 + $0x18], 16  ;;  %s3565_s0 = sld [smem:[#allocation5 + $0x19]] }
  0xf6   :  { %s1277_s12 = scalar_lea.vmem %s4384_s1, %s3565_s0 }
  0xf7   :  { %v1298_v25 = vld [vmem:[%s1277_s12] sm:$0x1] }
  0xf8   :  { %1299 = vst [vmem:[#allocation2 + $0x19] sm:$0x1] %v1298_v25 }
  0xf9   :  { %1325 = vsyncadd [#allocation3 + $0x19], 16  ;;  %s3566_s13 = sld [smem:[#allocation5 + $0x1a]] }
  0xff   :  { %s1327_s16 = scalar_lea.vmem %s4384_s1, %s3566_s13 }
 0x100   :  { %v1348_v26 = vld [vmem:[%s1327_s16] sm:$0x1] }
 0x101   :  { %1349 = vst [vmem:[#allocation2 + $0x1a] sm:$0x1] %v1348_v26 }
 0x102   :  { %1375 = vsyncadd [#allocation3 + $0x1a], 16  ;;  %s3567_s17 = sld [smem:[#allocation5 + $0x1b]] }
 0x108   :  { %s1377_s20 = scalar_lea.vmem %s4384_s1, %s3567_s17 }
 0x109   :  { %v1398_v27 = vld [vmem:[%s1377_s20] sm:$0x1] }
 0x10a   :  { %1399 = vst [vmem:[#allocation2 + $0x1b] sm:$0x1] %v1398_v27 }
 0x10b   :  { %1425 = vsyncadd [#allocation3 + $0x1b], 16  ;;  %s3568_s21 = sld [smem:[#allocation5 + $0x1c]] }
 0x111   :  { %s1427_s24 = scalar_lea.vmem %s4384_s1, %s3568_s21 }
 0x112   :  { %v1448_v28 = vld [vmem:[%s1427_s24] sm:$0x1] }
 0x113   :  { %1449 = vst [vmem:[#allocation2 + $0x1c] sm:$0x1] %v1448_v28 }
 0x114   :  { %1475 = vsyncadd [#allocation3 + $0x1c], 16  ;;  %s3569_s25 = sld [smem:[#allocation5 + $0x1d]] }
 0x11a   :  { %s1477_s28 = scalar_lea.vmem %s4384_s1, %s3569_s25 }
 0x11b   :  { %v1498_v29 = vld [vmem:[%s1477_s28] sm:$0x1] }
 0x11c   :  { %1499 = vst [vmem:[#allocation2 + $0x1d] sm:$0x1] %v1498_v29 }
 0x11d   :  { %1525 = vsyncadd [#allocation3 + $0x1d], 16  ;;  %s3570_s29 = sld [smem:[#allocation5 + $0x1e]] }
 0x123   :  { %s1527_s9 = scalar_lea.vmem %s4384_s1, %s3570_s29 }
 0x124   :  { %v1548_v30 = vld [vmem:[%s1527_s9] sm:$0x1] }
 0x125   :  { %1549 = vst [vmem:[#allocation2 + $0x1e] sm:$0x1] %v1548_v30 }
 0x126   :  { %1575 = vsyncadd [#allocation3 + $0x1e], 16  ;;  %s3571_s0 = sld [smem:[#allocation5 + $0x1f]] }
 0x12c   :  { %s1577_s12 = scalar_lea.vmem %s4384_s1, %s3571_s0 }
 0x12d   :  { %v1598_v31 = vld [vmem:[%s1577_s12] sm:$0x1] }
 0x12e   :  { %1599 = vst [vmem:[#allocation2 + $0x1f] sm:$0x1] %v1598_v31 }
 0x12f   :  { %1625 = vsyncadd [#allocation3 + $0x1f], 16 }
 0x130   :  { %3898 = dma.done.wait [#allocation3], 16 }
 0x131   :  { %3899 = vsyncadd [#allocation3], 4294967280 }
 0x132   :  { %3900 = dma.done.wait [#allocation3 + $0x1], 16 }
 0x133   :  { %3901 = vsyncadd [#allocation3 + $0x1], 4294967280 }
 0x134   :  { %3902 = dma.done.wait [#allocation3 + $0x2], 16 }
 0x135   :  { %3903 = vsyncadd [#allocation3 + $0x2], 4294967280 }
 0x136   :  { %3904 = dma.done.wait [#allocation3 + $0x3], 16 }
 0x137   :  { %3905 = vsyncadd [#allocation3 + $0x3], 4294967280 }
 0x138   :  { %3906 = dma.done.wait [#allocation3 + $0x4], 16 }
 0x139   :  { %3907 = vsyncadd [#allocation3 + $0x4], 4294967280 }
 0x13a   :  { %3908 = dma.done.wait [#allocation3 + $0x5], 16 }
 0x13b   :  { %3909 = vsyncadd [#allocation3 + $0x5], 4294967280 }
 0x13c   :  { %3910 = dma.done.wait [#allocation3 + $0x6], 16 }
 0x13d   :  { %3911 = vsyncadd [#allocation3 + $0x6], 4294967280 }
 0x13e   :  { %3912 = dma.done.wait [#allocation3 + $0x7], 16 }
 0x13f   :  { %3913 = vsyncadd [#allocation3 + $0x7], 4294967280 }
 0x140   :  { %3914 = dma.done.wait [#allocation3 + $0x8], 16 }
 0x141   :  { %3915 = vsyncadd [#allocation3 + $0x8], 4294967280 }
 0x142   :  { %3916 = dma.done.wait [#allocation3 + $0x9], 16 }
 0x143   :  { %3917 = vsyncadd [#allocation3 + $0x9], 4294967280 }
 0x144   :  { %3918 = dma.done.wait [#allocation3 + $0xa], 16 }
 0x145   :  { %3919 = vsyncadd [#allocation3 + $0xa], 4294967280 }
 0x146   :  { %3920 = dma.done.wait [#allocation3 + $0xb], 16 }
 0x147   :  { %3921 = vsyncadd [#allocation3 + $0xb], 4294967280 }
 0x148   :  { %3922 = dma.done.wait [#allocation3 + $0xc], 16 }
 0x149   :  { %3923 = vsyncadd [#allocation3 + $0xc], 4294967280 }
 0x14a   :  { %3924 = dma.done.wait [#allocation3 + $0xd], 16 }
 0x14b   :  { %3925 = vsyncadd [#allocation3 + $0xd], 4294967280 }
 0x14c   :  { %3926 = dma.done.wait [#allocation3 + $0xe], 16 }
 0x14d   :  { %3927 = vsyncadd [#allocation3 + $0xe], 4294967280 }
 0x14e   :  { %3928 = dma.done.wait [#allocation3 + $0xf], 16 }
 0x14f   :  { %3929 = vsyncadd [#allocation3 + $0xf], 4294967280 }
 0x150   :  { %3930 = dma.done.wait [#allocation3 + $0x10], 16 }
 0x151   :  { %3931 = vsyncadd [#allocation3 + $0x10], 4294967280 }
 0x152   :  { %3932 = dma.done.wait [#allocation3 + $0x11], 16 }
 0x153   :  { %3933 = vsyncadd [#allocation3 + $0x11], 4294967280 }
 0x154   :  { %3934 = dma.done.wait [#allocation3 + $0x12], 16 }
 0x155   :  { %3935 = vsyncadd [#allocation3 + $0x12], 4294967280 }
 0x156   :  { %3936 = dma.done.wait [#allocation3 + $0x13], 16 }
 0x157   :  { %3937 = vsyncadd [#allocation3 + $0x13], 4294967280 }
 0x158   :  { %3938 = dma.done.wait [#allocation3 + $0x14], 16 }
 0x159   :  { %3939 = vsyncadd [#allocation3 + $0x14], 4294967280 }
 0x15a   :  { %3940 = dma.done.wait [#allocation3 + $0x15], 16 }
 0x15b   :  { %3941 = vsyncadd [#allocation3 + $0x15], 4294967280 }
 0x15c   :  { %3942 = dma.done.wait [#allocation3 + $0x16], 16 }
 0x15d   :  { %3943 = vsyncadd [#allocation3 + $0x16], 4294967280 }
 0x15e   :  { %3944 = dma.done.wait [#allocation3 + $0x17], 16 }
 0x15f   :  { %3945 = vsyncadd [#allocation3 + $0x17], 4294967280 }
 0x160   :  { %3946 = dma.done.wait [#allocation3 + $0x18], 16 }
 0x161   :  { %3947 = vsyncadd [#allocation3 + $0x18], 4294967280 }
 0x162   :  { %3948 = dma.done.wait [#allocation3 + $0x19], 16 }
 0x163   :  { %3949 = vsyncadd [#allocation3 + $0x19], 4294967280 }
 0x164   :  { %3950 = dma.done.wait [#allocation3 + $0x1a], 16 }
 0x165   :  { %3951 = vsyncadd [#allocation3 + $0x1a], 4294967280 }
 0x166   :  { %3952 = dma.done.wait [#allocation3 + $0x1b], 16 }
 0x167   :  { %3953 = vsyncadd [#allocation3 + $0x1b], 4294967280 }
 0x168   :  { %3954 = dma.done.wait [#allocation3 + $0x1c], 16 }
 0x169   :  { %3955 = vsyncadd [#allocation3 + $0x1c], 4294967280 }
 0x16a   :  { %3956 = dma.done.wait [#allocation3 + $0x1d], 16 }
 0x16b   :  { %3957 = vsyncadd [#allocation3 + $0x1d], 4294967280 }
 0x16c   :  { %3958 = dma.done.wait [#allocation3 + $0x1e], 16 }
 0x16d   :  { %3959 = vsyncadd [#allocation3 + $0x1e], 4294967280 }
 0x16e   :  { %3960 = dma.done.wait [#allocation3 + $0x1f], 16 }
 0x16f   :  { %3961 = vsyncadd [#allocation3 + $0x1f], 4294967280  ;;  %v3963_v32 = vmov 0.0   ;;  %vm3964_vm0 = vmmov 0   ;;  %vm1704_vm1 = vcmask 130048   ;;  %v1696_v33 = vld [vmem:[%s4385_s2 + $0x8] sm:$0xff] }
 0x170   :  { %3717 = vmatprep.subr.mxu1 %v3963_v32  ;;  %3725 = vmatprep.mubr.msk.f32.mxu1 %vm3964_vm0, %v3963_v32  ;;  %v1695_v34 = vld [vmem:[%s4385_s2] sm:$0xff]  ;;  %v4120_v36 = vld [vmem:[%s4386_s3 + $0x18] sm:$0xff]  ;;  %v1692_v37 = vld [vmem:[#allocation2 + $0x8] sm:$0xff]  ;;  %s3965_s24 = smov 64   ;;  %vm1806_vm2 = vcmask 261120   ;;  %vm1905_vm3 = vcmask 1044224  }
 0x171   :  { %v1691_v35 = vld [vmem:[#allocation2] sm:$0xff]  ;;  %3685 = vmatprep.subr.mxu0 %v1696_v33  ;;  %3718 = vmatpush3.msra.mxu1 %v4120_v36  ;;  %v1693_v38 = vld [vmem:[#allocation2 + $0x10] sm:$0xff]  ;;  %v1694_v40 = vld [vmem:[#allocation2 + $0x18] sm:$0xff]  ;;  %vm2039_vm4 = vcmask 1048324   ;;  %vm2770_vm5 = vcmask 1040384   ;;  %vm2772_vm6 = vcmask 1041408  }
 0x172   :  { %3689 = vmatprep.mubr.msk.f32.mxu0 %vm1704_vm1, %v1691_v35  ;;  %3686 = vmatpush3.msra.mxu0 %v1696_v33  ;;  %v4126_v39 = vld [vmem:[%s4386_s3 + $0x10] sm:$0xff]  ;;  %v4138_v41 = vld [vmem:[%s4386_s3 + $0x8] sm:$0xff]  ;;  %v4148_v42 = vld [vmem:[%s4386_s3] sm:$0xff]  ;;  %vm2774_vm7 = vcmask 1042432   ;;  %vm2776_vm8 = vcmask 1043456   ;;  %vm2778_vm9 = vcmask 1044480  }
 0x173   :  { %3687 = vmatprep.subr.mxu0 %v1695_v34  ;;  %3719 = vmatprep.subr.mxu1 %v3963_v32  ;;  %v3572_v43 = vld [vmem:[%s4387_s4] ss:$0 sm:$0xff]  ;;  %s3966_s4 = smov 32   ;;  %vm2780_vm10 = vcmask 1045504   ;;  %vm2782_vm11 = vcmask 1046528   ;;  %s3967_s3 = smov 96  }
 0x174   :  { %3688 = vmatpush3.msra.mxu0 %v1695_v34  ;;  %3720 = vmatpush3.msra.mxu1 %v4126_v39  ;;  %vm2823_vm12 = vcmask 523264   ;;  %vm2844_vm13 = vcmask 785408   ;;  %vm2918_vm14 = vcmask 31744  }
 0x175   :  { %3690 = vmatmul.mubr.msk.f32.vlgmr.msra.gmra.mxu0 %vm1704_vm1, %v1692_v37  ;;  %3695 = vmatprep.subr.mxu0 %v3963_v32 }
 0x176   :  { %3696 = vmatpush3.msra.mxu0 %v4120_v36  ;;  %3692 = vmatprep.mubr.msk.f32.mxu0 %vm1704_vm1, %v1693_v38 }
 0x177   :  { %3697 = vmatprep.subr.mxu0 %v3963_v32  ;;  %3721 = vmatprep.subr.mxu1 %v3963_v32 }
 0x178   :  { %3698 = vmatpush3.msra.mxu0 %v4126_v39  ;;  %3722 = vmatpush3.msra.mxu1 %v4138_v41 }
 0x179   :  { %3693 = vmatmul.mubr.msk.f32.gmra.mxu0 %vm1704_vm1, %v1694_v40  ;;  %3699 = vmatprep.subr.mxu0 %v3963_v32 }
 0x17a   :  { %3700 = vmatpush3.msra.mxu0 %v4138_v41  ;;  %3703 = vmatprep.mubr.msk.f32.mxu0 %vm3964_vm0, %v3963_v32 }
 0x17b   :  { %3701 = vmatprep.subr.mxu0 %v3963_v32  ;;  %3723 = vmatprep.subr.mxu1 %v3963_v32 }
 0x17c   :  { %3702 = vmatpush3.msra.mxu0 %v4148_v42  ;;  %3724 = vmatpush3.msra.mxu1 %v4148_v42 }
 0x17d   :  { %3704 = vmatmul.mubr.f32.vlgmr.msra.gmra.mxu0 %v3963_v32  ;;  %3706 = vmatprep.subr.mxu0 %v3963_v32 }
 0x17e   :  { %3707 = vmatpush3.msra.mxu0 %v4120_v36  ;;  %3714 = vmatprep.mubr.msk.f32.mxu0 %vm3964_vm0, %v3963_v32 }
 0x17f   :  { %3708 = vmatprep.subr.mxu0 %v3963_v32  ;;  %3739 = vmatprep.subr.mxu1 %v3963_v32 }
 0x180   :  { %3709 = vmatpush3.msra.mxu0 %v4126_v39 }
 0x181   :  { %3710 = vmatprep.subr.mxu0 %v3963_v32 }
 0x182   :  { %3711 = vmatpush3.msra.mxu0 %v4138_v41 }
 0x183   :  { %3712 = vmatprep.subr.mxu0 %v3963_v32 }
 0x184   :  { %3713 = vmatpush3.msra.mxu0 %v4148_v42 }
 0x185   :  { %3728 = vmatprep.subr.mxu0 %v3963_v32 }
 0x235   :  { %v3691_v44 = vpop.f32.mrf.mxu0 }
 0x236   :  { %v4173_v45 = vadd.f32 %v3691_v44, %v3572_v43 }
 0x237   :  { %v1783_v46 = vpop.f32.mrf.mxu0 }
 0x238   :  { %v1784_v50 = vadd.f32 %v3572_v43, %v1783_v46 }
 0x239   :  { %v3694_v47 = vpop.f32.mrf.mxu0 }
 0x23a   :  { %v4175_v48 = vadd.f32 %v3694_v47, %v3572_v43 }
 0x23b   :  { %v1793_v49 = vpop.f32.mrf.mxu0 }
 0x23c   :  { %v4177_v51 = vadd.f32 %v3572_v43, %v1793_v49 }
 0x23d   :  { %v1876_v52 = vpop.f32.mrf.mxu0 }
 0x23e   :  { %v1880_v53 = vadd.f32 %v1876_v52, %v1784_v50 }
 0x23f   :  { %v3705_v54 = vpop.f32.mrf.mxu0 }
 0x240   :  { %3816 = vtanh.f32 %v1880_v53  ;;  %v3577_v56 = vmul.f32 -1.442695, %v1880_v53 }
 0x242   :  { %3818 = vpow2.f32 %v3577_v56 }
 0x24d   :  { %v3817_v55 = vpop.eup %3816 }
 0x24e   :  { %1890 = vrot.lane.b32.xlu0 %v3817_v55, %s3965_s24 }
 0x24f   :  { %v3819_v57 = vpop.eup %3818 }
 0x250   :  { %v1884_v58 = vadd.f32 1.0, %v3819_v57 }
 0x252   :  { %3820 = vrcp.f32 %v1884_v58 }
 0x25f   :  { %v3821_v59 = vpop.eup %3820 }
 0x260   :  { %v1888_v62 = vmul.f32 0.0, %v3821_v59 }
 0x2c0   :  { %v1891_v60 = vpop.permute.xlu0 %1890 }
 0x2c1   :  { %v1893_v61 = vmul.f32 %v3821_v59, %v1891_v60 }
 0x2c3   :  { %1895 = vrot.lane.b32.xlu0 %v1893_v61, %s3966_s4 }
 0x335   :  { %v1896_v63 = vpop.permute.xlu0 %1895 }
 0x336   :  { %v1898_v0 = vadd.f32 %v1896_v63, %v1888_v62 }
 0x338   :  { %3822 = vtanh.f32 %v1898_v0  ;;  %v2009_v16 = vrot.slane %v1898_v0, 4 }
 0x345   :  { %v3823_v1 = vpop.eup %3822 }
 0x346   :  { %1901 = vrot.lane.b32.xlu1 %v3823_v1, %s3965_s24 }
 0x3b8   :  { %v1902_v2 = vpop.permute.xlu1 %1901 }
 0x3b9   :  { %v1904_v3 = vmul.f32 %v3821_v59, %v1902_v2 }
 0x3bb   :  { %1923 = vrot.lane.b32.xlu1 %v1904_v3, %s3966_s4  ;;  %v1906_v21 = vsel %vm1905_vm3, %v1904_v3, 0.0  ;;  %v1915_v22 = vsel %vm1905_vm3, %v1904_v3, -inf  ;;  %v2791_v31 = vrot.slane %v1904_v3, 3 }
 0x3bc   :  { %v1907_v23 = vrot.slane %v1906_v21, 4  ;;  %v1916_v24 = vrot.slane %v1915_v22, 4 }
 0x3be   :  { %v1908_v25 = vadd.f32 %v1907_v23, %v1906_v21  ;;  %v1917_v26 = vmax.f32 %v1915_v22, %v1916_v24 }
 0x3c0   :  { %v1909_v29 = vrot.slane %v1908_v25, 2  ;;  %v1918_v30 = vrot.slane %v1917_v26, 2 }
 0x3c2   :  { %v1910_v43 = vadd.f32 %v1909_v29, %v1908_v25  ;;  %v1919_v44 = vmax.f32 %v1917_v26, %v1918_v30 }
 0x3c4   :  { %v1911_v52 = vrot.slane %v1910_v43, 1  ;;  %v1920_v53 = vrot.slane %v1919_v44, 1 }
 0x3c6   :  { %v1912_v58 = vadd.f32 %v1911_v52, %v1910_v43  ;;  %v1921_v59 = vmax.f32 %v1919_v44, %v1920_v53 }
 0x3c8   :  { %v1914_v0 = vmul.f32 0.25, %v1912_v58 }
 0x42d   :  { %v1924_v4 = vpop.permute.xlu1 %1923 }
 0x42e   :  { %3715 = vmatmul.mubr.msk.f32.vlgmr.msra.gmra.mxu0 %vm1806_vm2, %v1924_v4 }
 0x42f   :  { %3729 = vmatpush3.msra.mxu0 %v4120_v36  ;;  %3736 = vmatprep.mubr.msk.f32.mxu0 %vm3964_vm0, %v3963_v32 }
 0x430   :  { %3730 = vmatprep.subr.mxu0 %v3963_v32 }
 0x431   :  { %3731 = vmatpush3.msra.mxu0 %v4126_v39 }
 0x432   :  { %3732 = vmatprep.subr.mxu0 %v3963_v32 }
 0x433   :  { %3733 = vmatpush3.msra.mxu0 %v4138_v41 }
 0x434   :  { %3734 = vmatprep.subr.mxu0 %v3963_v32 }
 0x435   :  { %3735 = vmatpush3.msra.mxu0 %v4148_v42 }
 0x436   :  { %3750 = vmatprep.subr.mxu0 %v3963_v32 }
 0x4ee   :  { %v1993_v5 = vpop.f32.mrf.mxu0 }
 0x4ef   :  { %v1998_v6 = vrot.slane %v1993_v5, 4 }
 0x4f0   :  { %v3716_v7 = vpop.f32.mrf.mxu0 }
 0x4f1   :  { %v2000_v8 = vadd.f32 %v1998_v6, %v1784_v50 }
 0x4f3   :  { %3824 = vtanh.f32 %v2000_v8  ;;  %v3579_v10 = vmul.f32 -1.442695, %v2000_v8 }
 0x4f5   :  { %3826 = vpow2.f32 %v3579_v10 }
 0x500   :  { %v3825_v9 = vpop.eup %3824 }
 0x501   :  { %2013 = vrot.lane.b32.xlu0 %v3825_v9, %s3965_s24 }
 0x502   :  { %v3827_v11 = vpop.eup %3826 }
 0x503   :  { %v2004_v12 = vadd.f32 1.0, %v3827_v11 }
 0x505   :  { %3828 = vrcp.f32 %v2004_v12 }
 0x512   :  { %v3829_v13 = vpop.eup %3828 }
 0x513   :  { %v2011_v17 = vmul.f32 %v3829_v13, %v2009_v16 }
 0x573   :  { %v2014_v14 = vpop.permute.xlu0 %2013 }
 0x574   :  { %v2016_v15 = vmul.f32 %v3829_v13, %v2014_v14 }
 0x576   :  { %2018 = vrot.lane.b32.xlu1 %v2016_v15, %s3966_s4 }
 0x5e8   :  { %v2019_v18 = vpop.permute.xlu1 %2018 }
 0x5e9   :  { %v4196_v19 = vadd.f32 %v2019_v18, %v2011_v17 }
 0x5eb   :  { %3830 = vtanh.f32 %v4196_v19  ;;  %v2130_v14 = vrot.slane %v4196_v19, 4 }
 0x5f8   :  { %v3831_v20 = vpop.eup %3830 }
 0x5f9   :  { %2024 = vrot.lane.b32.xlu0 %v3831_v20, %s3965_s24 }
 0x66b   :  { %v2025_v27 = vpop.permute.xlu0 %2024 }
 0x66c   :  { %v2027_v28 = vmul.f32 %v3829_v13, %v2025_v27 }
 0x66e   :  { %v2040_v33 = vsel %vm2039_vm4, %v2027_v28, -inf  ;;  %v2793_v34 = vrot.slane %v2027_v28, 6  ;;  %v2029_v35 = vrot.slane %v2027_v28, 4 }
 0x66f   :  { %v2041_v37 = vrot.slane %v2040_v33, 4 }
 0x670   :  { %v4204_v38 = vsel %vm2770_vm5, %v2791_v31, %v2793_v34  ;;  %2047 = vrot.lane.b32.xlu1 %v2029_v35, %s3966_s4  ;;  %v2031_v40 = vsel %vm1905_vm3, %v2029_v35, 0.0 }
 0x671   :  { %v2042_v46 = vmax.f32 %v2040_v33, %v2041_v37  ;;  %v2032_v47 = vrot.slane %v2031_v40, 4 }
 0x673   :  { %v2043_v49 = vrot.slane %v2042_v46, 2  ;;  %v2033_v50 = vadd.f32 %v2032_v47, %v2031_v40 }
 0x675   :  { %v2044_v54 = vmax.f32 %v2042_v46, %v2043_v49  ;;  %v2034_v55 = vrot.slane %v2033_v50, 2 }
 0x677   :  { %v2045_v56 = vrot.slane %v2044_v54, 1  ;;  %v2035_v57 = vadd.f32 %v2034_v55, %v2033_v50 }
 0x679   :  { %v2046_v60 = vmax.f32 %v2044_v54, %v2045_v56  ;;  %v2036_v61 = vrot.slane %v2035_v57, 1 }
 0x67b   :  { %v2784_v62 = vsel %vm2770_vm5, %v1921_v59, %v2046_v60  ;;  %v2037_v63 = vadd.f32 %v2036_v61, %v2035_v57 }
 0x67d   :  { %v2038_v1 = vmul.f32 0.25, %v2037_v63 }
 0x67f   :  { %v2771_v2 = vsel %vm2770_vm5, %v1914_v0, %v2038_v1 }
 0x6e2   :  { %v2048_v3 = vpop.permute.xlu1 %2047 }
 0x6e3   :  { %3726 = vmatmul.mubr.msk.f32.vlgmr.msra.gmra.mxu1 %vm1806_vm2, %v2048_v3 }
 0x6e4   :  { %3740 = vmatpush3.msra.mxu1 %v4120_v36  ;;  %3747 = vmatprep.mubr.msk.f32.mxu1 %vm3964_vm0, %v3963_v32 }
 0x6e5   :  { %3741 = vmatprep.subr.mxu1 %v3963_v32 }
 0x6e6   :  { %3742 = vmatpush3.msra.mxu1 %v4126_v39 }
 0x6e7   :  { %3743 = vmatprep.subr.mxu1 %v3963_v32 }
 0x6e8   :  { %3744 = vmatpush3.msra.mxu1 %v4138_v41 }
 0x6e9   :  { %3745 = vmatprep.subr.mxu1 %v3963_v32 }
 0x6ea   :  { %3746 = vmatpush3.msra.mxu1 %v4148_v42 }
 0x6eb   :  { %3761 = vmatprep.subr.mxu1 %v3963_v32 }
 0x7a3   :  { %v2117_v4 = vpop.f32.mrf.mxu1 }
 0x7a4   :  { %v2121_v5 = vadd.f32 %v2117_v4, %v4173_v45 }
 0x7a5   :  { %v3727_v6 = vpop.f32.mrf.mxu1 }
 0x7a6   :  { %3832 = vtanh.f32 %v2121_v5  ;;  %v3581_v8 = vmul.f32 -1.442695, %v2121_v5 }
 0x7a8   :  { %3834 = vpow2.f32 %v3581_v8 }
 0x7b3   :  { %v3833_v7 = vpop.eup %3832 }
 0x7b4   :  { %2134 = vrot.lane.b32.xlu0 %v3833_v7, %s3965_s24 }
 0x7b5   :  { %v3835_v9 = vpop.eup %3834 }
 0x7b6   :  { %v2125_v10 = vadd.f32 1.0, %v3835_v9 }
 0x7b8   :  { %3836 = vrcp.f32 %v2125_v10 }
 0x7c5   :  { %v3837_v11 = vpop.eup %3836 }
 0x7c6   :  { %v2132_v15 = vmul.f32 %v3837_v11, %v2130_v14 }
 0x826   :  { %v2135_v12 = vpop.permute.xlu0 %2134 }
 0x827   :  { %v2137_v13 = vmul.f32 %v3837_v11, %v2135_v12 }
 0x829   :  { %2139 = vrot.lane.b32.xlu1 %v2137_v13, %s3966_s4 }
 0x89b   :  { %v2140_v16 = vpop.permute.xlu1 %2139 }
 0x89c   :  { %v2142_v17 = vadd.f32 %v2140_v16, %v2132_v15 }
 0x89e   :  { %3838 = vtanh.f32 %v2142_v17  ;;  %v2251_v60 = vrot.slane %v2142_v17, 4 }
 0x8ab   :  { %v3839_v18 = vpop.eup %3838 }
 0x8ac   :  { %2145 = vrot.lane.b32.xlu0 %v3839_v18, %s3965_s24 }
 0x91e   :  { %v2146_v20 = vpop.permute.xlu0 %2145 }
 0x91f   :  { %v2148_v21 = vmul.f32 %v3837_v11, %v2146_v20 }
 0x921   :  { %v2149_v22 = vsel %vm1905_vm3, %v2148_v21, 0.0  ;;  %v2157_v23 = vsel %vm1905_vm3, %v2148_v21, -inf  ;;  %v2795_v24 = vrot.slane %v2148_v21, 1  ;;  %2165 = vrot.lane.b32.xlu1 %v2148_v21, %s3966_s4 }
 0x922   :  { %v2150_v25 = vrot.slane %v2149_v22, 4  ;;  %v2158_v26 = vrot.slane %v2157_v23, 4 }
 0x923   :  { %v2804_v19 = vsel %vm2772_vm6, %v4204_v38, %v2795_v24 }
 0x924   :  { %v2151_v27 = vadd.f32 %v2150_v25, %v2149_v22  ;;  %v2159_v28 = vmax.f32 %v2157_v23, %v2158_v26 }
 0x926   :  { %v2152_v29 = vrot.slane %v2151_v27, 2  ;;  %v2160_v30 = vrot.slane %v2159_v28, 2 }
 0x928   :  { %v2153_v31 = vadd.f32 %v2152_v29, %v2151_v27  ;;  %v2161_v33 = vmax.f32 %v2159_v28, %v2160_v30 }
 0x92a   :  { %v2154_v34 = vrot.slane %v2153_v31, 1  ;;  %v2162_v35 = vrot.slane %v2161_v33, 1 }
 0x92c   :  { %v2155_v37 = vadd.f32 %v2154_v34, %v2153_v31  ;;  %v2163_v40 = vmax.f32 %v2161_v33, %v2162_v35 }
 0x92e   :  { %v2156_v43 = vmul.f32 0.25, %v2155_v37  ;;  %v2785_v44 = vsel %vm2772_vm6, %v2784_v62, %v2163_v40 }
 0x930   :  { %v2773_v46 = vsel %vm2772_vm6, %v2771_v2, %v2156_v43 }
 0x993   :  { %v2166_v47 = vpop.permute.xlu1 %2165 }
 0x994   :  { %3737 = vmatmul.mubr.msk.f32.vlgmr.msra.gmra.mxu0 %vm1806_vm2, %v2166_v47 }
 0x995   :  { %3751 = vmatpush3.msra.mxu0 %v4120_v36  ;;  %3758 = vmatprep.mubr.msk.f32.mxu0 %vm3964_vm0, %v3963_v32 }
 0x996   :  { %3752 = vmatprep.subr.mxu0 %v3963_v32 }
 0x997   :  { %3753 = vmatpush3.msra.mxu0 %v4126_v39 }
 0x998   :  { %3754 = vmatprep.subr.mxu0 %v3963_v32 }
 0x999   :  { %3755 = vmatpush3.msra.mxu0 %v4138_v41 }
 0x99a   :  { %3756 = vmatprep.subr.mxu0 %v3963_v32 }
 0x99b   :  { %3757 = vmatpush3.msra.mxu0 %v4148_v42 }
 0x99c   :  { %3772 = vmatprep.subr.mxu0 %v3963_v32 }
 0xa54   :  { %v2235_v38 = vpop.f32.mrf.mxu0 }
 0xa55   :  { %v2240_v49 = vrot.slane %v2235_v38, 4 }
 0xa56   :  { %v3738_v50 = vpop.f32.mrf.mxu0 }
 0xa57   :  { %v2242_v52 = vadd.f32 %v2240_v49, %v4173_v45 }
 0xa59   :  { %3840 = vtanh.f32 %v2242_v52  ;;  %v3583_v54 = vmul.f32 -1.442695, %v2242_v52 }
 0xa5b   :  { %3842 = vpow2.f32 %v3583_v54 }
 0xa66   :  { %v3841_v53 = vpop.eup %3840 }
 0xa67   :  { %2255 = vrot.lane.b32.xlu0 %v3841_v53, %s3965_s24 }
 0xa68   :  { %v3843_v55 = vpop.eup %3842 }
 0xa69   :  { %v2246_v56 = vadd.f32 1.0, %v3843_v55 }
 0xa6b   :  { %3844 = vrcp.f32 %v2246_v56 }
 0xa78   :  { %v3845_v57 = vpop.eup %3844 }
 0xa79   :  { %v2253_v61 = vmul.f32 %v3845_v57, %v2251_v60 }
 0xad9   :  { %v2256_v58 = vpop.permute.xlu0 %2255 }
 0xada   :  { %v2258_v59 = vmul.f32 %v3845_v57, %v2256_v58 }
 0xadc   :  { %2260 = vrot.lane.b32.xlu1 %v2258_v59, %s3966_s4 }
 0xb4e   :  { %v2261_v62 = vpop.permute.xlu1 %2260 }
 0xb4f   :  { %v2263_v63 = vadd.f32 %v2261_v62, %v2253_v61 }
 0xb51   :  { %3846 = vtanh.f32 %v2263_v63  ;;  %v2371_v33 = vrot.slane %v2263_v63, 4 }
 0xb5e   :  { %v3847_v45 = vpop.eup %3846 }
 0xb5f   :  { %2266 = vrot.lane.b32.xlu0 %v3847_v45, %s3965_s24 }
 0xbd1   :  { %v2267_v0 = vpop.permute.xlu0 %2266 }
 0xbd2   :  { %v2269_v1 = vmul.f32 %v3845_v57, %v2267_v0 }
 0xbd4   :  { %v2271_v2 = vrot.slane %v2269_v1, 4  ;;  %v2281_v3 = vsel %vm2039_vm4, %v2269_v1, -inf }
 0xbd5   :  { %v2282_v4 = vrot.slane %v2281_v3, 4 }
 0xbd6   :  { %v2273_v5 = vsel %vm1905_vm3, %v2271_v2, 0.0  ;;  %v2805_v6 = vsel %vm2774_vm7, %v2804_v19, %v2271_v2  ;;  %2288 = vrot.lane.b32.xlu1 %v2271_v2, %s3966_s4 }
 0xbd7   :  { %v2274_v7 = vrot.slane %v2273_v5, 4  ;;  %v2283_v8 = vmax.f32 %v2281_v3, %v2282_v4 }
 0xbd9   :  { %v2275_v9 = vadd.f32 %v2274_v7, %v2273_v5  ;;  %v2284_v10 = vrot.slane %v2283_v8, 2 }
 0xbdb   :  { %v2276_v11 = vrot.slane %v2275_v9, 2  ;;  %v2285_v12 = vmax.f32 %v2283_v8, %v2284_v10 }
 0xbdd   :  { %v2277_v13 = vadd.f32 %v2276_v11, %v2275_v9  ;;  %v2286_v14 = vrot.slane %v2285_v12, 1 }
 0xbdf   :  { %v2278_v15 = vrot.slane %v2277_v13, 1  ;;  %v2287_v16 = vmax.f32 %v2285_v12, %v2286_v14 }
 0xbe1   :  { %v2279_v17 = vadd.f32 %v2278_v15, %v2277_v13  ;;  %v2786_v18 = vsel %vm2774_vm7, %v2785_v44, %v2287_v16 }
 0xbe3   :  { %v2280_v20 = vmul.f32 0.25, %v2279_v17 }
 0xbe5   :  { %v2775_v21 = vsel %vm2774_vm7, %v2773_v46, %v2280_v20 }
 0xc48   :  { %v2289_v22 = vpop.permute.xlu1 %2288 }
 0xc49   :  { %3748 = vmatmul.mubr.msk.f32.vlgmr.msra.gmra.mxu1 %vm1806_vm2, %v2289_v22 }
 0xc4a   :  { %3762 = vmatpush3.msra.mxu1 %v4120_v36  ;;  %3769 = vmatprep.mubr.msk.f32.mxu1 %vm3964_vm0, %v3963_v32 }
 0xc4b   :  { %3763 = vmatprep.subr.mxu1 %v3963_v32 }
 0xc4c   :  { %3764 = vmatpush3.msra.mxu1 %v4126_v39 }
 0xc4d   :  { %3765 = vmatprep.subr.mxu1 %v3963_v32 }
 0xc4e   :  { %3766 = vmatpush3.msra.mxu1 %v4138_v41 }
 0xc4f   :  { %3767 = vmatprep.subr.mxu1 %v3963_v32 }
 0xc50   :  { %3768 = vmatpush3.msra.mxu1 %v4148_v42 }
 0xc51   :  { %3783 = vmatprep.subr.mxu1 %v3963_v32 }
 0xd09   :  { %v2358_v23 = vpop.f32.mrf.mxu1 }
 0xd0a   :  { %v2362_v24 = vadd.f32 %v2358_v23, %v4177_v51 }
 0xd0b   :  { %v3749_v25 = vpop.f32.mrf.mxu1 }
 0xd0c   :  { %3848 = vtanh.f32 %v2362_v24  ;;  %v3585_v19 = vmul.f32 -1.442695, %v2362_v24 }
 0xd0e   :  { %3850 = vpow2.f32 %v3585_v19 }
 0xd19   :  { %v3849_v26 = vpop.eup %3848 }
 0xd1a   :  { %2375 = vrot.lane.b32.xlu0 %v3849_v26, %s3965_s24 }
 0xd1b   :  { %v3851_v27 = vpop.eup %3850 }
 0xd1c   :  { %v2366_v28 = vadd.f32 1.0, %v3851_v27 }
 0xd1e   :  { %3852 = vrcp.f32 %v2366_v28 }
 0xd2b   :  { %v3853_v29 = vpop.eup %3852 }
 0xd2c   :  { %v2373_v34 = vmul.f32 %v3853_v29, %v2371_v33 }
 0xd8c   :  { %v2376_v30 = vpop.permute.xlu0 %2375 }
 0xd8d   :  { %v2378_v31 = vmul.f32 %v3853_v29, %v2376_v30 }
 0xd8f   :  { %2380 = vrot.lane.b32.xlu1 %v2378_v31, %s3966_s4 }
 0xe01   :  { %v2381_v35 = vpop.permute.xlu1 %2380 }
 0xe02   :  { %v2383_v37 = vadd.f32 %v2381_v35, %v2373_v34 }
 0xe04   :  { %3854 = vtanh.f32 %v2383_v37 }
 0xe11   :  { %v3855_v40 = vpop.eup %3854 }
 0xe12   :  { %2386 = vrot.lane.b32.xlu0 %v3855_v40, %s3965_s24 }
 0xe84   :  { %v2387_v43 = vpop.permute.xlu0 %2386 }
 0xe85   :  { %v2389_v44 = vmul.f32 %v3853_v29, %v2387_v43 }
 0xe87   :  { %v2390_v46 = vsel %vm1905_vm3, %v2389_v44, 0.0  ;;  %v2398_v47 = vsel %vm1905_vm3, %v2389_v44, -inf  ;;  %v2797_v38 = vrot.slane %v2389_v44, 7  ;;  %2406 = vrot.lane.b32.xlu1 %v2389_v44, %s3966_s4 }
 0xe88   :  { %v2391_v49 = vrot.slane %v2390_v46, 4  ;;  %v2399_v50 = vrot.slane %v2398_v47, 4 }
 0xe89   :  { %v2806_v52 = vsel %vm2776_vm8, %v2805_v6, %v2797_v38 }
 0xe8a   :  { %v2392_v53 = vadd.f32 %v2391_v49, %v2390_v46  ;;  %v2400_v54 = vmax.f32 %v2398_v47, %v2399_v50 }
 0xe8c   :  { %v2393_v55 = vrot.slane %v2392_v53, 2  ;;  %v2401_v56 = vrot.slane %v2400_v54, 2 }
 0xe8e   :  { %v2394_v57 = vadd.f32 %v2393_v55, %v2392_v53  ;;  %v2402_v58 = vmax.f32 %v2400_v54, %v2401_v56 }
 0xe90   :  { %v2395_v59 = vrot.slane %v2394_v57, 1  ;;  %v2403_v60 = vrot.slane %v2402_v58, 1 }
 0xe92   :  { %v2404_v61 = vmax.f32 %v2402_v58, %v2403_v60  ;;  %v2396_v62 = vadd.f32 %v2395_v59, %v2394_v57 }
 0xe94   :  { %v2787_v63 = vsel %vm2776_vm8, %v2786_v18, %v2404_v61  ;;  %v2397_v45 = vmul.f32 0.25, %v2396_v62 }
 0xe96   :  { %v2777_v0 = vsel %vm2776_vm8, %v2775_v21, %v2397_v45 }
 0xef9   :  { %v2407_v1 = vpop.permute.xlu1 %2406 }
 0xefa   :  { %3759 = vmatmul.mubr.msk.f32.vlgmr.msra.gmra.mxu0 %vm1806_vm2, %v2407_v1 }
 0xefb   :  { %3773 = vmatpush3.msra.mxu0 %v4120_v36  ;;  %3780 = vmatprep.mubr.msk.f32.mxu0 %vm3964_vm0, %v3963_v32 }
 0xefc   :  { %3774 = vmatprep.subr.mxu0 %v3963_v32 }
 0xefd   :  { %3775 = vmatpush3.msra.mxu0 %v4126_v39 }
 0xefe   :  { %3776 = vmatprep.subr.mxu0 %v3963_v32 }
 0xeff   :  { %3777 = vmatpush3.msra.mxu0 %v4138_v41 }
 0xf00   :  { %3778 = vmatprep.subr.mxu0 %v3963_v32 }
 0xf01   :  { %3779 = vmatpush3.msra.mxu0 %v4148_v42  ;;  %v2492_v42 = vrot.slane %v2383_v37, 4 }
 0xfba   :  { %v2476_v2 = vpop.f32.mrf.mxu0 }
 0xfbb   :  { %v2481_v3 = vrot.slane %v2476_v2, 4 }
 0xfbc   :  { %v3760_v4 = vpop.f32.mrf.mxu0 }
 0xfbd   :  { %v2483_v36 = vadd.f32 %v2481_v3, %v4177_v51 }
 0xfbf   :  { %3856 = vtanh.f32 %v2483_v36  ;;  %v3587_v6 = vmul.f32 -1.442695, %v2483_v36 }
 0xfc1   :  { %3858 = vpow2.f32 %v3587_v6 }
 0xfcc   :  { %v3857_v5 = vpop.eup %3856 }
 0xfcd   :  { %2496 = vrot.lane.b32.xlu0 %v3857_v5, %s3965_s24 }
 0xfce   :  { %v3859_v39 = vpop.eup %3858 }
 0xfcf   :  { %v2487_v7 = vadd.f32 1.0, %v3859_v39 }
 0xfd1   :  { %3860 = vrcp.f32 %v2487_v7 }
 0xfde   :  { %v3861_v8 = vpop.eup %3860 }
 0xfdf   :  { %v2494_v10 = vmul.f32 %v3861_v8, %v2492_v42 }
0x103f   :  { %v2497_v41 = vpop.permute.xlu0 %2496 }
0x1040   :  { %v2499_v9 = vmul.f32 %v3861_v8, %v2497_v41 }
0x1042   :  { %2501 = vrot.lane.b32.xlu1 %v2499_v9, %s3966_s4 }
0x10b4   :  { %v2502_v11 = vpop.permute.xlu1 %2501 }
0x10b5   :  { %v2504_v12 = vadd.f32 %v2502_v11, %v2494_v10 }
0x10b7   :  { %3862 = vtanh.f32 %v2504_v12  ;;  %v2612_v54 = vrot.slane %v2504_v12, 4 }
0x10c4   :  { %v3863_v51 = vpop.eup %3862 }
0x10c5   :  { %2507 = vrot.lane.b32.xlu0 %v3863_v51, %s3965_s24 }
0x1137   :  { %v2508_v13 = vpop.permute.xlu0 %2507 }
0x1138   :  { %v2510_v14 = vmul.f32 %v3861_v8, %v2508_v13 }
0x113a   :  { %v2522_v15 = vsel %vm2039_vm4, %v2510_v14, -inf  ;;  %v2799_v16 = vrot.slane %v2510_v14, 2  ;;  %v2512_v17 = vrot.slane %v2510_v14, 4 }
0x113b   :  { %v2523_v18 = vrot.slane %v2522_v15, 4 }
0x113c   :  { %2529 = vrot.lane.b32.xlu1 %v2512_v17, %s3966_s4  ;;  %v2514_v20 = vsel %vm1905_vm3, %v2512_v17, 0.0  ;;  %v2807_v21 = vsel %vm2778_vm9, %v2806_v52, %v2799_v16 }
0x113d   :  { %v2524_v22 = vmax.f32 %v2522_v15, %v2523_v18  ;;  %v2515_v23 = vrot.slane %v2514_v20, 4 }
0x113f   :  { %v2525_v24 = vrot.slane %v2524_v22, 2  ;;  %v2516_v25 = vadd.f32 %v2515_v23, %v2514_v20 }
0x1141   :  { %v2526_v26 = vmax.f32 %v2524_v22, %v2525_v24  ;;  %v2517_v19 = vrot.slane %v2516_v25, 2 }
0x1143   :  { %v2527_v27 = vrot.slane %v2526_v26, 1  ;;  %v2518_v28 = vadd.f32 %v2517_v19, %v2516_v25  ;;  %v2836_v19 = vld [vmem:[%s4388_s5 + $0x58] sm:$0xff] }
0x1145   :  { %v2528_v29 = vmax.f32 %v2526_v26, %v2527_v27  ;;  %v2519_v30 = vrot.slane %v2518_v28, 1  ;;  %v2835_v27 = vld [vmem:[%s4388_s5 + $0x50] sm:$0xff] }
0x1147   :  { %v2520_v31 = vadd.f32 %v2519_v30, %v2518_v28  ;;  %v2788_v33 = vsel %vm2778_vm9, %v2787_v63, %v2528_v29  ;;  %v2834_v28 = vld [vmem:[%s4388_s5 + $0x48] sm:$0xff]  ;;  %v2833_v29 = vld [vmem:[%s4388_s5 + $0x40] sm:$0xff]  ;;  %v2832_v30 = vld [vmem:[%s4388_s5 + $0x38] sm:$0xff] }
0x1149   :  { %v2521_v34 = vmul.f32 0.25, %v2520_v31  ;;  %v2831_v31 = vld [vmem:[%s4388_s5 + $0x30] sm:$0xff] }
0x114b   :  { %v2779_v35 = vsel %vm2778_vm9, %v2777_v0, %v2521_v34 }
0x11ae   :  { %v2530_v37 = vpop.permute.xlu1 %2529 }
0x11af   :  { %3770 = vmatmul.mubr.msk.f32.vlgmr.msra.gmra.mxu1 %vm1806_vm2, %v2530_v37 }
0x11b0   :  { %3807 = vmatprep.mubr.msk.f32.mxu1 %vm3964_vm0, %v3963_v32  ;;  %3784 = vmatpush3.msra.mxu1 %v2836_v19 }
0x11b1   :  { %3785 = vmatprep.subr.mxu1 %v3963_v32 }
0x11b2   :  { %3786 = vmatpush3.msra.mxu1 %v2835_v27 }
0x11b3   :  { %3787 = vmatprep.subr.mxu1 %v3963_v32 }
0x11b4   :  { %3788 = vmatpush3.msra.mxu1 %v2834_v28 }
0x11b5   :  { %3789 = vmatprep.subr.mxu1 %v3963_v32 }
0x11b6   :  { %3790 = vmatpush3.msra.mxu1 %v2833_v29 }
0x11b7   :  { %3791 = vmatprep.subr.mxu1 %v3963_v32 }
0x11b8   :  { %3792 = vmatpush3.msra.mxu1 %v2832_v30 }
0x11b9   :  { %3793 = vmatprep.subr.mxu1 %v3963_v32 }
0x11ba   :  { %3794 = vmatpush3.msra.mxu1 %v2831_v31 }
0x11bb   :  { %3795 = vmatprep.subr.mxu1 %v3963_v32 }
0x126f   :  { %v2599_v40 = vpop.f32.mrf.mxu1 }
0x1270   :  { %v2603_v43 = vadd.f32 %v2599_v40, %v4175_v48 }
0x1271   :  { %v3771_v44 = vpop.f32.mrf.mxu1 }
0x1272   :  { %3864 = vtanh.f32 %v2603_v43  ;;  %v3589_v47 = vmul.f32 -1.442695, %v2603_v43  ;;  %v2829_v43 = vld [vmem:[%s4388_s5 + $0x20] sm:$0xff]  ;;  %v2828_v44 = vld [vmem:[%s4388_s5 + $0x18] sm:$0xff] }
0x1274   :  { %3866 = vpow2.f32 %v3589_v47 }
0x127f   :  { %v3865_v46 = vpop.eup %3864 }
0x1280   :  { %2616 = vrot.lane.b32.xlu0 %v3865_v46, %s3965_s24 }
0x1281   :  { %v3867_v38 = vpop.eup %3866 }
0x1282   :  { %v2607_v49 = vadd.f32 1.0, %v3867_v38 }
0x1284   :  { %3868 = vrcp.f32 %v2607_v49 }
0x1291   :  { %v3869_v50 = vpop.eup %3868 }
0x1292   :  { %v2614_v55 = vmul.f32 %v3869_v50, %v2612_v54  ;;  %v2826_v54 = vld [vmem:[%s4388_s5 + $0x8] sm:$0xff] }
0x12f2   :  { %v2617_v52 = vpop.permute.xlu0 %2616 }
0x12f3   :  { %v2619_v53 = vmul.f32 %v3869_v50, %v2617_v52 }
0x12f5   :  { %2621 = vrot.lane.b32.xlu1 %v2619_v53, %s3966_s4 }
0x1367   :  { %v2622_v56 = vpop.permute.xlu1 %2621 }
0x1368   :  { %v2624_v57 = vadd.f32 %v2622_v56, %v2614_v55 }
0x136a   :  { %3870 = vtanh.f32 %v2624_v57  ;;  %v2733_v23 = vrot.slane %v2624_v57, 4  ;;  %v2825_v57 = vld [vmem:[%s4388_s5] sm:$0xff] }
0x1377   :  { %v3871_v58 = vpop.eup %3870 }
0x1378   :  { %2627 = vrot.lane.b32.xlu0 %v3871_v58, %s3965_s24 }
0x13ea   :  { %v2628_v59 = vpop.permute.xlu0 %2627 }
0x13eb   :  { %v2630_v60 = vmul.f32 %v3869_v50, %v2628_v59  ;;  %v2827_v50 = vld [vmem:[%s4388_s5 + $0x10] sm:$0xff] }
0x13ed   :  { %v2631_v61 = vsel %vm1905_vm3, %v2630_v60, 0.0  ;;  %v2639_v62 = vsel %vm1905_vm3, %v2630_v60, -inf  ;;  %2647 = vrot.lane.b32.xlu1 %v2630_v60, %s3966_s4  ;;  %v2801_v63 = vrot.slane %v2630_v60, 5 }
0x13ee   :  { %v2632_v45 = vrot.slane %v2631_v61, 4  ;;  %v2640_v0 = vrot.slane %v2639_v62, 4 }
0x13ef   :  { %v4306_v1 = vsel %vm2780_vm10, %v2807_v21, %v2801_v63 }
0x13f0   :  { %v2633_v2 = vadd.f32 %v2632_v45, %v2631_v61  ;;  %v2641_v3 = vmax.f32 %v2639_v62, %v2640_v0 }
0x13f2   :  { %v2634_v4 = vrot.slane %v2633_v2, 2  ;;  %v2642_v36 = vrot.slane %v2641_v3, 2 }
0x13f4   :  { %v2643_v5 = vmax.f32 %v2641_v3, %v2642_v36  ;;  %v2635_v6 = vadd.f32 %v2634_v4, %v2633_v2 }
0x13f6   :  { %v2644_v39 = vrot.slane %v2643_v5, 1  ;;  %v2636_v7 = vrot.slane %v2635_v6, 1 }
0x13f8   :  { %v2645_v8 = vmax.f32 %v2643_v5, %v2644_v39  ;;  %v2637_v41 = vadd.f32 %v2636_v7, %v2635_v6  ;;  %v3592_v6 = vld [vmem:[%s4389_s6] ss:$0 sm:$0xff] }
0x13fa   :  { %v4309_v9 = vsel %vm2780_vm10, %v2788_v33, %v2645_v8  ;;  %v2638_v42 = vmul.f32 0.25, %v2637_v41  ;;  %v2830_v33 = vld [vmem:[%s4388_s5 + $0x28] sm:$0xff] }
0x13fb   :  { %3796 = vmatpush3.msra.mxu1 %v2830_v33 }
0x13fc   :  { %v4312_v10 = vsel %vm2780_vm10, %v2779_v35, %v2638_v42  ;;  %3797 = vmatprep.subr.mxu1 %v3963_v32 }
0x13fd   :  { %3798 = vmatpush3.msra.mxu1 %v2829_v43 }
0x13fe   :  { %3799 = vmatprep.subr.mxu1 %v3963_v32 }
0x13ff   :  { %3800 = vmatpush3.msra.mxu1 %v2828_v44 }
0x1400   :  { %3801 = vmatprep.subr.mxu1 %v3963_v32 }
0x1401   :  { %3802 = vmatpush3.msra.mxu1 %v2827_v50 }
0x1402   :  { %3803 = vmatprep.subr.mxu1 %v3963_v32 }
0x1403   :  { %3804 = vmatpush3.msra.mxu1 %v2826_v54 }
0x1404   :  { %3805 = vmatprep.subr.mxu1 %v3963_v32 }
0x1405   :  { %3806 = vmatpush3.msra.mxu1 %v2825_v57 }
0x145f   :  { %v2648_v11 = vpop.permute.xlu1 %2647 }
0x1460   :  { %3781 = vmatmul.mubr.msk.f32.vlgmr.msra.gmra.mxu0 %vm1806_vm2, %v2648_v11 }
0x1520   :  { %v2717_v12 = vpop.f32.mrf.mxu0 }
0x1521   :  { %v2722_v51 = vrot.slane %v2717_v12, 4 }
0x1522   :  { %v3782_v13 = vpop.f32.mrf.mxu0 }
0x1523   :  { %v2724_v14 = vadd.f32 %v2722_v51, %v4175_v48 }
0x1525   :  { %3872 = vtanh.f32 %v2724_v14  ;;  %v3591_v16 = vmul.f32 -1.442695, %v2724_v14 }
0x1527   :  { %3874 = vpow2.f32 %v3591_v16 }
0x1532   :  { %v3873_v15 = vpop.eup %3872 }
0x1533   :  { %2737 = vrot.lane.b32.xlu0 %v3873_v15, %s3965_s24 }
0x1534   :  { %v3875_v17 = vpop.eup %3874 }
0x1535   :  { %v2728_v18 = vadd.f32 1.0, %v3875_v17 }
0x1537   :  { %3876 = vrcp.f32 %v2728_v18 }
0x1544   :  { %v3877_v20 = vpop.eup %3876 }
0x1545   :  { %v2735_v24 = vmul.f32 %v3877_v20, %v2733_v23 }
0x15a5   :  { %v2738_v21 = vpop.permute.xlu0 %2737 }
0x15a6   :  { %v2740_v22 = vmul.f32 %v3877_v20, %v2738_v21 }
0x15a8   :  { %2742 = vrot.lane.b32.xlu1 %v2740_v22, %s3966_s4 }
0x161a   :  { %v2743_v25 = vpop.permute.xlu1 %2742 }
0x161b   :  { %v2745_v26 = vadd.f32 %v2743_v25, %v2735_v24 }
0x161d   :  { %3878 = vtanh.f32 %v2745_v26 }
0x162a   :  { %v3879_v48 = vpop.eup %3878 }
0x162b   :  { %2748 = vrot.lane.b32.xlu0 %v3879_v48, %s3965_s24 }
0x169d   :  { %v2749_v34 = vpop.permute.xlu0 %2748 }
0x169e   :  { %v2751_v35 = vmul.f32 %v3877_v20, %v2749_v34 }
0x16a0   :  { %v2753_v37 = vrot.slane %v2751_v35, 4  ;;  %v2763_v40 = vsel %vm2039_vm4, %v2751_v35, -inf  ;;  %v2809_v32 = vsel %vm2782_vm11, %v4306_v1, %v2751_v35 }
0x16a1   :  { %v2764_v46 = vrot.slane %v2763_v40, 4 }
0x16a2   :  { %v2755_v47 = vsel %vm1905_vm3, %v2753_v37, 0.0 }
0x16a3   :  { %v2756_v38 = vrot.slane %v2755_v47, 4  ;;  %v2765_v49 = vmax.f32 %v2763_v40, %v2764_v46 }
0x16a5   :  { %v2757_v52 = vadd.f32 %v2756_v38, %v2755_v47  ;;  %v2766_v53 = vrot.slane %v2765_v49, 2 }
0x16a7   :  { %v2758_v55 = vrot.slane %v2757_v52, 2  ;;  %v2767_v56 = vmax.f32 %v2765_v49, %v2766_v53 }
0x16a9   :  { %v2768_v58 = vrot.slane %v2767_v56, 1  ;;  %v2759_v59 = vadd.f32 %v2758_v55, %v2757_v52 }
0x16ab   :  { %v2769_v60 = vmax.f32 %v2767_v56, %v2768_v58  ;;  %v2760_v61 = vrot.slane %v2759_v59, 1 }
0x16ad   :  { %v2790_v62 = vsel %vm2782_vm11, %v4309_v9, %v2769_v60  ;;  %v2761_v63 = vadd.f32 %v2760_v61, %v2759_v59 }
0x16ae   :  { %2815 = vrot.lane.b32.xlu0 %v2790_v62, %s3965_s24 }
0x16af   :  { %v2762_v45 = vmul.f32 0.25, %v2761_v63 }
0x16b1   :  { %v2783_v0 = vsel %vm2782_vm11, %v4312_v10, %v2762_v45 }
0x16b2   :  { %2811 = vrot.lane.b32.xlu1 %v2783_v0, %s3966_s4 }
0x16b6   :  { %2819 = vrot.lane.b32.xlu1 %v2809_v32, %s3967_s3 }
0x1720   :  { %v2816_v3 = vpop.permute.xlu0 %2815 }
0x1724   :  { %v2812_v2 = vpop.permute.xlu1 %2811 }
0x1725   :  { %v2822_v4 = vsel %vm1806_vm2, %v2812_v2, %v2816_v3 }
0x1728   :  { %v2820_v36 = vpop.permute.xlu1 %2819 }
0x1729   :  { %v2824_v5 = vsel %vm2823_vm12, %v2822_v4, %v2820_v36 }
0x172a   :  { %3808 = vmatmul.mubr.msk.f32.vlgmr.msra.gmra.mxu1 %vm2844_vm13, %v2824_v5 }
0x17ea   :  { %v2914_v39 = vpop.f32.mrf.mxu1 }
0x17eb   :  { %v2915_v7 = vadd.f32 %v3592_v6, %v2914_v39 }
0x17ec   :  { %v3809_v8 = vpop.f32.mrf.mxu1 }
0x17ed   :  { %v2919_v1 = vsel %vm2918_vm14, %v2915_v7, -inf }
0x17ee   :  { %2920 = vmax.xlane.f32.xlu0 %v2919_v1 }
0x1877   :  { %v2921_v41 = vpop.xlane.xlu0 %2920 }
0x1878   :  { %v2922_v9 = vsub.f32 %v2915_v7, %v2921_v41 }
0x187a   :  { %v2923_v42 = vmul.f32 1.442695, %v2922_v9 }
0x187c   :  { %3880 = vpow2.f32 %v2923_v42 }
0x1889   :  { %v3881_v10 = vpop.eup %3880 }
0x188a   :  { %v2925_v11 = vsel %vm2918_vm14, %v3881_v10, 0.0 }
0x188b   :  { %2926 = vadd.xlane.f32.xlu1 %v2925_v11 }
0x1914   :  { %v2927_v12 = vpop.xlane.xlu1 %2926 }
0x1915   :  { %3882 = vrcp.f32 %v2927_v12 }
0x1922   :  { %v3883_v51 = vpop.eup %3882 }
0x1923   :  { %v2929_v13 = vmul.f32 %v3883_v51, %v3881_v10 }
0x1925   :  { %2930 = vst.msk [vmem:[%s4390_s7] sm:$0xff] %vm2918_vm14, %v2929_v13 }
0x1926   :  { %2935 = vsyncmov [#allocation3] }
0x1929   :  { %s2936_s4 = vpop.sfrf %2935 }
0x192a   :  { %p3594_p5 = scmp.ne.s32.totalorder %s2936_s4, 0 }
0x192c   :  { %2940 = shalt.err (%p3594_p5)  }
0x192d   :  { %2942 = vsyncmov [#allocation3 + $0x1] }
0x1930   :  { %s2943_s25 = vpop.sfrf %2942 }
0x1931   :  { %p3595_p6 = scmp.ne.s32.totalorder %s2943_s25, 0 }
0x1933   :  { %2947 = shalt.err (%p3595_p6)  }
0x1934   :  { %2949 = vsyncmov [#allocation3 + $0x2] }
0x1937   :  { %s2950_s26 = vpop.sfrf %2949 }
0x1938   :  { %p3596_p7 = scmp.ne.s32.totalorder %s2950_s26, 0 }
0x193a   :  { %2954 = shalt.err (%p3596_p7)  }
0x193b   :  { %2956 = vsyncmov [#allocation3 + $0x3] }
0x193e   :  { %s2957_s27 = vpop.sfrf %2956 }
0x193f   :  { %p3597_p8 = scmp.ne.s32.totalorder %s2957_s27, 0 }
0x1941   :  { %2961 = shalt.err (%p3597_p8)  }
0x1942   :  { %2963 = vsyncmov [#allocation3 + $0x4] }
0x1945   :  { %s2964_s28 = vpop.sfrf %2963 }
0x1946   :  { %p3598_p9 = scmp.ne.s32.totalorder %s2964_s28, 0 }
0x1948   :  { %2968 = shalt.err (%p3598_p9)  }
0x1949   :  { %2970 = vsyncmov [#allocation3 + $0x5] }
0x194c   :  { %s2971_s7 = vpop.sfrf %2970 }
0x194d   :  { %p3599_p10 = scmp.ne.s32.totalorder %s2971_s7, 0 }
0x194f   :  { %2975 = shalt.err (%p3599_p10)  }
0x1950   :  { %2977 = vsyncmov [#allocation3 + $0x6] }
0x1953   :  { %s2978_s29 = vpop.sfrf %2977 }
0x1954   :  { %p3600_p11 = scmp.ne.s32.totalorder %s2978_s29, 0 }
0x1956   :  { %2982 = shalt.err (%p3600_p11)  }
0x1957   :  { %2984 = vsyncmov [#allocation3 + $0x7] }
0x195a   :  { %s2985_s30 = vpop.sfrf %2984 }
0x195b   :  { %p3601_p12 = scmp.ne.s32.totalorder %s2985_s30, 0 }
0x195d   :  { %2989 = shalt.err (%p3601_p12)  }
0x195e   :  { %2991 = vsyncmov [#allocation3 + $0x8] }
0x1961   :  { %s2992_s8 = vpop.sfrf %2991 }
0x1962   :  { %p3602_p13 = scmp.ne.s32.totalorder %s2992_s8, 0 }
0x1964   :  { %2996 = shalt.err (%p3602_p13)  }
0x1965   :  { %2998 = vsyncmov [#allocation3 + $0x9] }
0x1968   :  { %s2999_s9 = vpop.sfrf %2998 }
0x1969   :  { %p3603_p0 = scmp.ne.s32.totalorder %s2999_s9, 0 }
0x196b   :  { %3003 = shalt.err (%p3603_p0)  }
0x196c   :  { %3005 = vsyncmov [#allocation3 + $0xa] }
0x196f   :  { %s3006_s0 = vpop.sfrf %3005 }
0x1970   :  { %p3604_p1 = scmp.ne.s32.totalorder %s3006_s0, 0 }
0x1972   :  { %3010 = shalt.err (%p3604_p1)  }
0x1973   :  { %3012 = vsyncmov [#allocation3 + $0xb] }
0x1976   :  { %s3013_s10 = vpop.sfrf %3012 }
0x1977   :  { %p3605_p2 = scmp.ne.s32.totalorder %s3013_s10, 0 }
0x1979   :  { %3017 = shalt.err (%p3605_p2)  }
0x197a   :  { %3019 = vsyncmov [#allocation3 + $0xc] }
0x197d   :  { %s3020_s11 = vpop.sfrf %3019 }
0x197e   :  { %p3606_p3 = scmp.ne.s32.totalorder %s3020_s11, 0 }
0x1980   :  { %3024 = shalt.err (%p3606_p3)  }
0x1981   :  { %3026 = vsyncmov [#allocation3 + $0xd] }
0x1984   :  { %s3027_s12 = vpop.sfrf %3026 }
0x1985   :  { %p3607_p4 = scmp.ne.s32.totalorder %s3027_s12, 0 }
0x1987   :  { %3031 = shalt.err (%p3607_p4)  }
0x1988   :  { %3033 = vsyncmov [#allocation3 + $0xe] }
0x198b   :  { %s3034_s1 = vpop.sfrf %3033 }
0x198c   :  { %p3608_p5 = scmp.ne.s32.totalorder %s3034_s1, 0 }
0x198e   :  { %3038 = shalt.err (%p3608_p5)  }
0x198f   :  { %3040 = vsyncmov [#allocation3 + $0xf] }
0x1992   :  { %s3041_s13 = vpop.sfrf %3040 }
0x1993   :  { %p3609_p6 = scmp.ne.s32.totalorder %s3041_s13, 0 }
0x1995   :  { %3045 = shalt.err (%p3609_p6)  }
0x1996   :  { %3047 = vsyncmov [#allocation3 + $0x10] }
0x1999   :  { %s3048_s14 = vpop.sfrf %3047 }
0x199a   :  { %p3610_p7 = scmp.ne.s32.totalorder %s3048_s14, 0 }
0x199c   :  { %3052 = shalt.err (%p3610_p7)  }
0x199d   :  { %3054 = vsyncmov [#allocation3 + $0x11] }
0x19a0   :  { %s3055_s15 = vpop.sfrf %3054 }
0x19a1   :  { %p3611_p8 = scmp.ne.s32.totalorder %s3055_s15, 0 }
0x19a3   :  { %3059 = shalt.err (%p3611_p8)  }
0x19a4   :  { %3061 = vsyncmov [#allocation3 + $0x12] }
0x19a7   :  { %s3062_s16 = vpop.sfrf %3061 }
0x19a8   :  { %p3612_p9 = scmp.ne.s32.totalorder %s3062_s16, 0 }
0x19aa   :  { %3066 = shalt.err (%p3612_p9)  }
0x19ab   :  { %3068 = vsyncmov [#allocation3 + $0x13] }
0x19ae   :  { %s3069_s17 = vpop.sfrf %3068 }
0x19af   :  { %p3613_p10 = scmp.ne.s32.totalorder %s3069_s17, 0 }
0x19b1   :  { %3073 = shalt.err (%p3613_p10)  }
0x19b2   :  { %3075 = vsyncmov [#allocation3 + $0x14] }
0x19b5   :  { %s3076_s18 = vpop.sfrf %3075 }
0x19b6   :  { %p3614_p11 = scmp.ne.s32.totalorder %s3076_s18, 0 }
0x19b8   :  { %3080 = shalt.err (%p3614_p11)  }
0x19b9   :  { %3082 = vsyncmov [#allocation3 + $0x15] }
0x19bc   :  { %s3083_s19 = vpop.sfrf %3082 }
0x19bd   :  { %p3615_p12 = scmp.ne.s32.totalorder %s3083_s19, 0 }
0x19bf   :  { %3087 = shalt.err (%p3615_p12)  }
0x19c0   :  { %3089 = vsyncmov [#allocation3 + $0x16] }
0x19c3   :  { %s3090_s2 = vpop.sfrf %3089 }
0x19c4   :  { %p3616_p13 = scmp.ne.s32.totalorder %s3090_s2, 0 }
0x19c6   :  { %3094 = shalt.err (%p3616_p13)  }
0x19c7   :  { %3096 = vsyncmov [#allocation3 + $0x17] }
0x19ca   :  { %s3097_s20 = vpop.sfrf %3096 }
0x19cb   :  { %p3617_p0 = scmp.ne.s32.totalorder %s3097_s20, 0 }
0x19cd   :  { %3101 = shalt.err (%p3617_p0)  }
0x19ce   :  { %3103 = vsyncmov [#allocation3 + $0x18] }
0x19d1   :  { %s3104_s21 = vpop.sfrf %3103 }
0x19d2   :  { %p3618_p1 = scmp.ne.s32.totalorder %s3104_s21, 0 }
0x19d4   :  { %3108 = shalt.err (%p3618_p1)  }
0x19d5   :  { %3110 = vsyncmov [#allocation3 + $0x19] }
0x19d8   :  { %s3111_s22 = vpop.sfrf %3110 }
0x19d9   :  { %p3619_p2 = scmp.ne.s32.totalorder %s3111_s22, 0 }
0x19db   :  { %3115 = shalt.err (%p3619_p2)  }
0x19dc   :  { %3117 = vsyncmov [#allocation3 + $0x1a] }
0x19df   :  { %s3118_s3 = vpop.sfrf %3117 }
0x19e0   :  { %p3620_p3 = scmp.ne.s32.totalorder %s3118_s3, 0 }
0x19e2   :  { %3122 = shalt.err (%p3620_p3)  }
0x19e3   :  { %3124 = vsyncmov [#allocation3 + $0x1b] }
0x19e6   :  { %s3125_s5 = vpop.sfrf %3124 }
0x19e7   :  { %p3621_p4 = scmp.ne.s32.totalorder %s3125_s5, 0 }
0x19e9   :  { %3129 = shalt.err (%p3621_p4)  }
0x19ea   :  { %3131 = vsyncmov [#allocation3 + $0x1c] }
0x19ed   :  { %s3132_s23 = vpop.sfrf %3131 }
0x19ee   :  { %p3622_p5 = scmp.ne.s32.totalorder %s3132_s23, 0 }
0x19f0   :  { %3136 = shalt.err (%p3622_p5)  }
0x19f1   :  { %3138 = vsyncmov [#allocation3 + $0x1d] }
0x19f4   :  { %s3139_s6 = vpop.sfrf %3138 }
0x19f5   :  { %p3623_p6 = scmp.ne.s32.totalorder %s3139_s6, 0 }
0x19f7   :  { %3143 = shalt.err (%p3623_p6)  }
0x19f8   :  { %3145 = vsyncmov [#allocation3 + $0x1e] }
0x19fb   :  { %s3146_s24 = vpop.sfrf %3145 }
0x19fc   :  { %p3624_p7 = scmp.ne.s32.totalorder %s3146_s24, 0 }
0x19fe   :  { %3150 = shalt.err (%p3624_p7)  }
0x19ff   :  { %3152 = vsyncmov [#allocation3 + $0x1f] }
0x1a02   :  { %s3153_s4 = vpop.sfrf %3152 }
0x1a03   :  { %p3625_p8 = scmp.ne.s32.totalorder %s3153_s4, 0 }
0x1a05   :  { %3157 = shalt.err (%p3625_p8)  }

</bundles_post_ra>
